<compile_context>
chip_gen: v6e
topology: v6e:2x2x1
jax: 0.10.0
libtpu: 0.0.40
codegen_flags: <defaults>
</compile_context>

<pallas_src>
import functools
import math

import jax
import jax.numpy as jnp
from jax.experimental import pallas as pl
from jax.experimental.pallas import tpu as pltpu

# Full-f32 matmuls everywhere (kernel and reference).  The TPU default matmul
# precision is bf16-class; its error sits right at the test tolerance and was
# the source of the previous masked-path assertion failure.
jax.config.update("jax_default_matmul_precision", "highest")


def _mha_kernel(*refs, h, scale, has_mask):
    if has_mask:
        (q_ref, k_ref, v_ref, wq_ref, wk_ref, wv_ref, wo_ref,
         bq_ref, bk_ref, bv_ref, bo_ref, mask_ref, out_ref, attn_ref) = refs
    else:
        (q_ref, k_ref, v_ref, wq_ref, wk_ref, wv_ref, wo_ref,
         bq_ref, bk_ref, bv_ref, bo_ref, out_ref, attn_ref) = refs
        mask_ref = None

    S, D = q_ref.shape   # per-batch block; leading batch dim squeezed away

    # Per-head input projections as head-batched matmuls (contraction = D).
    # Broadcasting the (S, D) activations over the head axis keeps everything
    # in canonical batched-dot form: no in-kernel reshapes / lane slices.
    def project(x_ref, w_ref, b_ref):
        xb = jnp.broadcast_to(x_ref[...], (h, S, D))            # (h, S, D)
        return jnp.einsum('hsd,hdf->hsf', xb, w_ref[...],
                          preferred_element_type=jnp.float32) + b_ref[...]

    qh = project(q_ref, wq_ref, bq_ref) * scale                 # (h, S, d_k)
    kh = project(k_ref, wk_ref, bk_ref)                         # (h, S, d_k)
    vh = project(v_ref, wv_ref, bv_ref)                         # (h, S, d_k)

    # Scaled dot-product attention, batched over heads in one einsum.
    s = jnp.einsum('hqd,hkd->hqk', qh, kh,
                   preferred_element_type=jnp.float32)          # (h, S, S)
    if has_mask:
        mzero = (mask_ref[...] == 0)[None, :, :]                # (1, S, S)
        s = jnp.where(mzero, -1000000000.0, s)

    # Numerically stable softmax with EXACT normalization (attention
    # probabilities must sum to 1; cost is only O(h*S*S) divides).
    s_max = jnp.max(s, axis=-1, keepdims=True)
    e = jnp.exp(s - s_max)
    p = e / jnp.sum(e, axis=-1, keepdims=True)                  # (h, S, S)

    attn_ref[...] = jnp.mean(p, axis=0)                         # mean over heads

    ctx = jnp.einsum('hqk,hkd->hqd', p, vh,
                     preferred_element_type=jnp.float32)        # (h, S, d_k)

    # Output projection with per-head weight blocks, summed over heads.
    # Equivalent to concat-heads @ Wo^T; avoids a head-merge relayout.
    out = jnp.einsum('hsf,hfd->hsd', ctx, wo_ref[...],
                     preferred_element_type=jnp.float32)        # (h, S, D)
    out_ref[...] = jnp.sum(out, axis=0) + bo_ref[...]           # (S, D)


def prepare_mha_params(params, *, h):
    """One-time weight preparation (hoisted out of the per-call hot path).

    PyTorch Linear weights are (out_features, in_features); they are re-laid
    out once into head-blocked (in, out) form:
      wq/wk/wv: (h, d_model, d_k)   bq/bk/bv: (h, 1, d_k)
      wo:       (h, d_k, d_model)   bo:       (1, d_model)
    """
    D = params['wq'].shape[0]
    assert D % h == 0
    d_k = D // h

    def in_proj(w, b):
        wt = jnp.asarray(w).T                                   # (in, out)
        return (wt.reshape(D, h, d_k).transpose(1, 0, 2),       # (h, D, d_k)
                jnp.asarray(b).reshape(h, 1, d_k))

    wq, bq = in_proj(params['wq'], params['bq'])
    wk, bk = in_proj(params['wk'], params['bk'])
    wv, bv = in_proj(params['wv'], params['bv'])
    wo = jnp.asarray(params['wo']).T.reshape(h, d_k, D)          # (h, d_k, D)
    bo = jnp.asarray(params['bo']).reshape(1, D)
    return dict(wq=wq, wk=wk, wv=wv, wo=wo, bq=bq, bk=bk, bv=bv, bo=bo)


def multi_headed_attention(query, key, value, prepared, *, h, mask=None):
    """Pallas forward of MultiHeadedAttention (eval mode: dropout = identity).

    Returns (output (B, S, D), attention averaged over heads (B, S, S))."""
    B, S, D = query.shape
    assert D % h == 0
    d_k = D // h
    has_mask = mask is not None

    kernel = functools.partial(_mha_kernel, h=h,
                               scale=1.0 / math.sqrt(d_k), has_mask=has_mask)

    act_spec = pl.BlockSpec((None, S, D), lambda b: (b, 0, 0))
    w_in_spec = pl.BlockSpec((h, D, d_k), lambda b: (0, 0, 0))
    b_in_spec = pl.BlockSpec((h, 1, d_k), lambda b: (0, 0, 0))

    in_specs = [act_spec, act_spec, act_spec,
                w_in_spec, w_in_spec, w_in_spec,
                pl.BlockSpec((h, d_k, D), lambda b: (0, 0, 0)),   # wo
                b_in_spec, b_in_spec, b_in_spec,
                pl.BlockSpec((1, D), lambda b: (0, 0))]           # bo
    inputs = [query, key, value,
              prepared['wq'], prepared['wk'], prepared['wv'], prepared['wo'],
              prepared['bq'], prepared['bk'], prepared['bv'], prepared['bo']]
    if has_mask:
        # Compact int8 mask (4x fewer DMA bytes than int32); when mask is
        # None there is no mask input, DMA or select at all.
        in_specs.append(pl.BlockSpec((None, S, S), lambda b: (b, 0, 0)))
        inputs.append((jnp.asarray(mask) != 0).astype(jnp.int8))

    out, attn_mean = pl.pallas_call(
        kernel,
        grid=(B,),
        in_specs=in_specs,
        out_specs=(pl.BlockSpec((None, S, D), lambda b: (b, 0, 0)),
                   pl.BlockSpec((None, S, S), lambda b: (b, 0, 0))),
        out_shape=(jax.ShapeDtypeStruct((B, S, D), jnp.float32),
                   jax.ShapeDtypeStruct((B, S, S), jnp.float32)),
        compiler_params=pltpu.CompilerParams(
            dimension_semantics=("parallel",)),
    )(*inputs)
    return out, attn_mean


def _reference(query, key, value, params, *, h, mask=None):
    """Plain-JAX reference mirroring the PyTorch forward (eval mode)."""
    B, S, D = query.shape
    d_k = D // h

    def lin(x, w, b):
        return x @ w.T + b

    def split(x):
        return jnp.transpose(x.reshape(B, S, h, d_k), (0, 2, 1, 3))

    q = split(lin(query, params['wq'], params['bq']))
    k = split(lin(key, params['wk'], params['bk']))
    v = split(lin(value, params['wv'], params['bv']))

    scores = jnp.einsum('bhqd,bhkd->bhqk', q, k) / math.sqrt(d_k)
    if mask is not None:
        scores = jnp.where(mask[:, None, :, :] == 0, -1e9, scores)
    p = jax.nn.softmax(scores, axis=-1)
    x = jnp.einsum('bhqk,bhkd->bhqd', p, v)
    x = jnp.transpose(x, (0, 2, 1, 3)).reshape(B, S, D)
    return lin(x, params['wo'], params['bo']), jnp.mean(p, axis=1)


if __name__ == "__main__":
    B, S, D, H = 2, 8, 32, 4   # batch, seq, d_model, heads  (d_k = 8)

    key = jax.random.PRNGKey(0)
    ks = jax.random.split(key, 16)
    scale = 1.0 / math.sqrt(D)

    params = {
        'wq': jax.random.uniform(ks[0], (D, D), jnp.float32, -scale, scale),
        'bq': jax.random.uniform(ks[1], (D,),   jnp.float32, -scale, scale),
        'wk': jax.random.uniform(ks[2], (D, D), jnp.float32, -scale, scale),
        'bk': jax.random.uniform(ks[3], (D,),   jnp.float32, -scale, scale),
        'wv': jax.random.uniform(ks[4], (D, D), jnp.float32, -scale, scale),
        'bv': jax.random.uniform(ks[5], (D,),   jnp.float32, -scale, scale),
        'wo': jax.random.uniform(ks[6], (D, D), jnp.float32, -scale, scale),
        'bo': jax.random.uniform(ks[7], (D,),   jnp.float32, -scale, scale),
    }

    query = jax.random.normal(ks[8], (B, S, D), jnp.float32)
    key_in = jax.random.normal(ks[9], (B, S, D), jnp.float32)
    value = jax.random.normal(ks[10], (B, S, D), jnp.float32)

    # One-time weight prep, outside the per-call hot path.
    prepared = prepare_mha_params(params, h=H)

    # --- no-mask path (specialized kernel: no mask input / DMA / select) ---
    out, attn_mean = multi_headed_attention(query, key_in, value, prepared, h=H)
    out, attn_mean = jax.block_until_ready((out, attn_mean))

    ref_out, ref_attn = _reference(query, key_in, value, params, h=H)
    assert out.shape == (B, S, D) and attn_mean.shape == (B, S, S)
    assert jnp.allclose(out, ref_out, atol=2e-3, rtol=2e-3)
    assert jnp.allclose(attn_mean, ref_attn, atol=2e-3, rtol=2e-3)

    # --- masked (causal) path ---
    mask = jnp.broadcast_to(jnp.tril(jnp.ones((S, S), jnp.float32)), (B, S, S))
    out_m, attn_m = multi_headed_attention(query, key_in, value, prepared,
                                           h=H, mask=mask)
    out_m, attn_m = jax.block_until_ready((out_m, attn_m))

    ref_out_m, ref_attn_m = _reference(query, key_in, value, params,
                                       h=H, mask=mask)
    assert jnp.allclose(out_m, ref_out_m, atol=2e-3, rtol=2e-3)
    assert jnp.allclose(attn_m, ref_attn_m, atol=2e-3, rtol=2e-3)

    print("KERNEL_OK")
</pallas_src>

<mosaic_0001>
module attributes {stable_mosaic.version = 11 : i64} {
  func.func @_mha_kernel(%arg0: i32, %arg1: memref<1x8x32xf32, #tpu.memory_space<vmem>>, %arg2: memref<1x8x32xf32, #tpu.memory_space<vmem>>, %arg3: memref<1x8x32xf32, #tpu.memory_space<vmem>>, %arg4: memref<4x32x8xf32, #tpu.memory_space<vmem>>, %arg5: memref<4x32x8xf32, #tpu.memory_space<vmem>>, %arg6: memref<4x32x8xf32, #tpu.memory_space<vmem>>, %arg7: memref<4x8x32xf32, #tpu.memory_space<vmem>>, %arg8: memref<4x1x8xf32, #tpu.memory_space<vmem>>, %arg9: memref<4x1x8xf32, #tpu.memory_space<vmem>>, %arg10: memref<4x1x8xf32, #tpu.memory_space<vmem>>, %arg11: memref<1x32xf32, #tpu.memory_space<vmem>>, %arg12: memref<1x8x32xf32, #tpu.memory_space<vmem>>, %arg13: memref<1x8x8xf32, #tpu.memory_space<vmem>>) attributes {dimension_semantics = [#tpu.dimension_semantics<parallel>], iteration_bounds = array<i64: 2>, scalar_prefetch = 0 : i64, scratch_operands = 0 : i64, tpu.core_type = #tpu.core_type<tc>, window_params = [{transform_indices = @transform_0, window_bounds = array<i64: 1, 8, 32>}, {transform_indices = @transform_1, window_bounds = array<i64: 1, 8, 32>}, {transform_indices = @transform_2, window_bounds = array<i64: 1, 8, 32>}, {pipeline_mode = #tpu.pipeline_mode<synchronous>, transform_indices = @transform_3, window_bounds = array<i64: 4, 32, 8>}, {pipeline_mode = #tpu.pipeline_mode<synchronous>, transform_indices = @transform_4, window_bounds = array<i64: 4, 32, 8>}, {pipeline_mode = #tpu.pipeline_mode<synchronous>, transform_indices = @transform_5, window_bounds = array<i64: 4, 32, 8>}, {pipeline_mode = #tpu.pipeline_mode<synchronous>, transform_indices = @transform_6, window_bounds = array<i64: 4, 8, 32>}, {pipeline_mode = #tpu.pipeline_mode<synchronous>, transform_indices = @transform_7, window_bounds = array<i64: 4, 1, 8>}, {pipeline_mode = #tpu.pipeline_mode<synchronous>, transform_indices = @transform_8, window_bounds = array<i64: 4, 1, 8>}, {pipeline_mode = #tpu.pipeline_mode<synchronous>, transform_indices = @transform_9, window_bounds = array<i64: 4, 1, 8>}, {pipeline_mode = #tpu.pipeline_mode<synchronous>, transform_indices = @transform_10, window_bounds = array<i64: 1, 32>}, {transform_indices = @transform_11, window_bounds = array<i64: 1, 8, 32>}, {transform_indices = @transform_12, window_bounds = array<i64: 1, 8, 8>}]} {
    %c0 = arith.constant 0 : index
    %c0_0 = arith.constant 0 : index
    %c0_1 = arith.constant 0 : index
    %0 = vector.load %arg1[%c0, %c0_0, %c0_1] : memref<1x8x32xf32, #tpu.memory_space<vmem>>, vector<1x8x32xf32>
    %1 = vector.shape_cast %0 : vector<1x8x32xf32> to vector<8x32xf32>
    %2 = vector.shape_cast %1 : vector<8x32xf32> to vector<1x8x32xf32>
    %3 = vector.broadcast %2 : vector<1x8x32xf32> to vector<4x8x32xf32>
    %c0_2 = arith.constant 0 : index
    %c0_3 = arith.constant 0 : index
    %c0_4 = arith.constant 0 : index
    %4 = vector.load %arg4[%c0_2, %c0_3, %c0_4] : memref<4x32x8xf32, #tpu.memory_space<vmem>>, vector<4x32x8xf32>
    "tpu.trace_start"() <{level = 10 : i32, message = "hsd,hdf->hsf"}> : () -> ()
    %cst = arith.constant dense<0.000000e+00> : vector<4x8x8xf32>
    %5 = tpu.matmul %3, %4, %cst {dimension_numbers = #tpu.dot_dimension_numbers<[2], [1], [1], [2], [0, 0, 0, 1, 1, 2], [0], [0]>, precision = #tpu.contract_precision<fp32>} : vector<4x8x32xf32>, vector<4x32x8xf32>, vector<4x8x8xf32> -> vector<4x8x8xf32>
    "tpu.trace_stop"() : () -> ()
    %c0_5 = arith.constant 0 : index
    %c0_6 = arith.constant 0 : index
    %c0_7 = arith.constant 0 : index
    %6 = vector.load %arg8[%c0_5, %c0_6, %c0_7] : memref<4x1x8xf32, #tpu.memory_space<vmem>>, vector<4x1x8xf32>
    %7 = vector.broadcast %6 : vector<4x1x8xf32> to vector<4x8x8xf32>
    %8 = arith.addf %5, %7 : vector<4x8x8xf32>
    %cst_8 = arith.constant 0.353553385 : f32
    %9 = vector.broadcast %cst_8 : f32 to vector<4x8x8xf32>
    %10 = arith.mulf %8, %9 : vector<4x8x8xf32>
    %c0_9 = arith.constant 0 : index
    %c0_10 = arith.constant 0 : index
    %c0_11 = arith.constant 0 : index
    %11 = vector.load %arg2[%c0_9, %c0_10, %c0_11] : memref<1x8x32xf32, #tpu.memory_space<vmem>>, vector<1x8x32xf32>
    %12 = vector.shape_cast %11 : vector<1x8x32xf32> to vector<8x32xf32>
    %13 = vector.shape_cast %12 : vector<8x32xf32> to vector<1x8x32xf32>
    %14 = vector.broadcast %13 : vector<1x8x32xf32> to vector<4x8x32xf32>
    %c0_12 = arith.constant 0 : index
    %c0_13 = arith.constant 0 : index
    %c0_14 = arith.constant 0 : index
    %15 = vector.load %arg5[%c0_12, %c0_13, %c0_14] : memref<4x32x8xf32, #tpu.memory_space<vmem>>, vector<4x32x8xf32>
    "tpu.trace_start"() <{level = 10 : i32, message = "hsd,hdf->hsf"}> : () -> ()
    %cst_15 = arith.constant dense<0.000000e+00> : vector<4x8x8xf32>
    %16 = tpu.matmul %14, %15, %cst_15 {dimension_numbers = #tpu.dot_dimension_numbers<[2], [1], [1], [2], [0, 0, 0, 1, 1, 2], [0], [0]>, precision = #tpu.contract_precision<fp32>} : vector<4x8x32xf32>, vector<4x32x8xf32>, vector<4x8x8xf32> -> vector<4x8x8xf32>
    "tpu.trace_stop"() : () -> ()
    %c0_16 = arith.constant 0 : index
    %c0_17 = arith.constant 0 : index
    %c0_18 = arith.constant 0 : index
    %17 = vector.load %arg9[%c0_16, %c0_17, %c0_18] : memref<4x1x8xf32, #tpu.memory_space<vmem>>, vector<4x1x8xf32>
    %18 = vector.broadcast %17 : vector<4x1x8xf32> to vector<4x8x8xf32>
    %19 = arith.addf %16, %18 : vector<4x8x8xf32>
    %c0_19 = arith.constant 0 : index
    %c0_20 = arith.constant 0 : index
    %c0_21 = arith.constant 0 : index
    %20 = vector.load %arg3[%c0_19, %c0_20, %c0_21] : memref<1x8x32xf32, #tpu.memory_space<vmem>>, vector<1x8x32xf32>
    %21 = vector.shape_cast %20 : vector<1x8x32xf32> to vector<8x32xf32>
    %22 = vector.shape_cast %21 : vector<8x32xf32> to vector<1x8x32xf32>
    %23 = vector.broadcast %22 : vector<1x8x32xf32> to vector<4x8x32xf32>
    %c0_22 = arith.constant 0 : index
    %c0_23 = arith.constant 0 : index
    %c0_24 = arith.constant 0 : index
    %24 = vector.load %arg6[%c0_22, %c0_23, %c0_24] : memref<4x32x8xf32, #tpu.memory_space<vmem>>, vector<4x32x8xf32>
    "tpu.trace_start"() <{level = 10 : i32, message = "hsd,hdf->hsf"}> : () -> ()
    %cst_25 = arith.constant dense<0.000000e+00> : vector<4x8x8xf32>
    %25 = tpu.matmul %23, %24, %cst_25 {dimension_numbers = #tpu.dot_dimension_numbers<[2], [1], [1], [2], [0, 0, 0, 1, 1, 2], [0], [0]>, precision = #tpu.contract_precision<fp32>} : vector<4x8x32xf32>, vector<4x32x8xf32>, vector<4x8x8xf32> -> vector<4x8x8xf32>
    "tpu.trace_stop"() : () -> ()
    %c0_26 = arith.constant 0 : index
    %c0_27 = arith.constant 0 : index
    %c0_28 = arith.constant 0 : index
    %26 = vector.load %arg10[%c0_26, %c0_27, %c0_28] : memref<4x1x8xf32, #tpu.memory_space<vmem>>, vector<4x1x8xf32>
    %27 = vector.broadcast %26 : vector<4x1x8xf32> to vector<4x8x8xf32>
    %28 = arith.addf %25, %27 : vector<4x8x8xf32>
    "tpu.trace_start"() <{level = 10 : i32, message = "hqd,hkd->hqk"}> : () -> ()
    %cst_29 = arith.constant dense<0.000000e+00> : vector<4x8x8xf32>
    %29 = tpu.matmul %10, %19, %cst_29 {dimension_numbers = #tpu.dot_dimension_numbers<[2], [2], [1], [1], [0, 0, 0, 1, 1, 1], [0], [0]>, precision = #tpu.contract_precision<fp32>} : vector<4x8x8xf32>, vector<4x8x8xf32>, vector<4x8x8xf32> -> vector<4x8x8xf32>
    "tpu.trace_stop"() : () -> ()
    %cst_30 = arith.constant dense<0xFF800000> : vector<4x8xf32>
    %30 = vector.multi_reduction <maximumf>, %29, %cst_30 [2] : vector<4x8x8xf32> to vector<4x8xf32>
    %31 = vector.shape_cast %30 : vector<4x8xf32> to vector<4x8x1xf32>
    %32 = vector.broadcast %31 : vector<4x8x1xf32> to vector<4x8x8xf32>
    %33 = arith.subf %29, %32 : vector<4x8x8xf32>
    %34 = math.exp %33 : vector<4x8x8xf32>
    %cst_31 = arith.constant dense<0.000000e+00> : vector<4x8xf32>
    %35 = vector.multi_reduction <add>, %34, %cst_31 [2] : vector<4x8x8xf32> to vector<4x8xf32>
    %36 = vector.shape_cast %35 : vector<4x8xf32> to vector<4x8x1xf32>
    %37 = vector.broadcast %36 : vector<4x8x1xf32> to vector<4x8x8xf32>
    %38 = arith.divf %34, %37 : vector<4x8x8xf32>
    %cst_32 = arith.constant dense<0.000000e+00> : vector<8x8xf32>
    %39 = vector.multi_reduction <add>, %38, %cst_32 [0] : vector<4x8x8xf32> to vector<8x8xf32>
    %cst_33 = arith.constant 4.000000e+00 : f32
    %40 = vector.broadcast %cst_33 : f32 to vector<8x8xf32>
    %41 = arith.divf %39, %40 : vector<8x8xf32>
    %c0_34 = arith.constant 0 : index
    %c0_35 = arith.constant 0 : index
    %c0_36 = arith.constant 0 : index
    %42 = vector.load %arg13[%c0_34, %c0_35, %c0_36] : memref<1x8x8xf32, #tpu.memory_space<vmem>>, vector<1x8x8xf32>
    %43 = vector.shape_cast %42 : vector<1x8x8xf32> to vector<8x8xf32>
    %44 = vector.shape_cast %41 : vector<8x8xf32> to vector<1x8x8xf32>
    tpu.vector_store %arg13[%c0_34, %c0_35, %c0_36], %44 {strides = array<i32>} : memref<1x8x8xf32, #tpu.memory_space<vmem>>, vector<1x8x8xf32>,
    "tpu.trace_start"() <{level = 10 : i32, message = "hqk,hkd->hqd"}> : () -> ()
    %cst_37 = arith.constant dense<0.000000e+00> : vector<4x8x8xf32>
    %45 = tpu.matmul %38, %28, %cst_37 {dimension_numbers = #tpu.dot_dimension_numbers<[2], [1], [1], [2], [0, 0, 0, 1, 1, 2], [0], [0]>, precision = #tpu.contract_precision<fp32>} : vector<4x8x8xf32>, vector<4x8x8xf32>, vector<4x8x8xf32> -> vector<4x8x8xf32>
    "tpu.trace_stop"() : () -> ()
    %c0_38 = arith.constant 0 : index
    %c0_39 = arith.constant 0 : index
    %c0_40 = arith.constant 0 : index
    %46 = vector.load %arg7[%c0_38, %c0_39, %c0_40] : memref<4x8x32xf32, #tpu.memory_space<vmem>>, vector<4x8x32xf32>
    "tpu.trace_start"() <{level = 10 : i32, message = "hsf,hfd->hsd"}> : () -> ()
    %cst_41 = arith.constant dense<0.000000e+00> : vector<4x8x32xf32>
    %47 = tpu.matmul %45, %46, %cst_41 {dimension_numbers = #tpu.dot_dimension_numbers<[2], [1], [1], [2], [0, 0, 0, 1, 1, 2], [0], [0]>, precision = #tpu.contract_precision<fp32>} : vector<4x8x8xf32>, vector<4x8x32xf32>, vector<4x8x32xf32> -> vector<4x8x32xf32>
    "tpu.trace_stop"() : () -> ()
    %cst_42 = arith.constant dense<0.000000e+00> : vector<8x32xf32>
    %48 = vector.multi_reduction <add>, %47, %cst_42 [0] : vector<4x8x32xf32> to vector<8x32xf32>
    %c0_43 = arith.constant 0 : index
    %c0_44 = arith.constant 0 : index
    %49 = vector.load %arg11[%c0_43, %c0_44] : memref<1x32xf32, #tpu.memory_space<vmem>>, vector<1x32xf32>
    %50 = vector.broadcast %49 : vector<1x32xf32> to vector<8x32xf32>
    %51 = arith.addf %48, %50 : vector<8x32xf32>
    %c0_45 = arith.constant 0 : index
    %c0_46 = arith.constant 0 : index
    %c0_47 = arith.constant 0 : index
    %52 = vector.load %arg12[%c0_45, %c0_46, %c0_47] : memref<1x8x32xf32, #tpu.memory_space<vmem>>, vector<1x8x32xf32>
    %53 = vector.shape_cast %52 : vector<1x8x32xf32> to vector<8x32xf32>
    %54 = vector.shape_cast %51 : vector<8x32xf32> to vector<1x8x32xf32>
    tpu.vector_store %arg12[%c0_45, %c0_46, %c0_47], %54 {strides = array<i32>} : memref<1x8x32xf32, #tpu.memory_space<vmem>>, vector<1x8x32xf32>,
    return
  }
  func.func @transform_0(%arg0: i32) -> (i32, i32, i32) {
    %c0_i32 = arith.constant 0 : i32
    %c0_i32_0 = arith.constant 0 : i32
    %c0_i32_1 = arith.constant 0 : i32
    return %arg0, %c0_i32, %c0_i32_0 : i32, i32, i32
  }
  func.func @transform_1(%arg0: i32) -> (i32, i32, i32) {
    %c0_i32 = arith.constant 0 : i32
    %c0_i32_0 = arith.constant 0 : i32
    %c0_i32_1 = arith.constant 0 : i32
    return %arg0, %c0_i32, %c0_i32_0 : i32, i32, i32
  }
  func.func @transform_2(%arg0: i32) -> (i32, i32, i32) {
    %c0_i32 = arith.constant 0 : i32
    %c0_i32_0 = arith.constant 0 : i32
    %c0_i32_1 = arith.constant 0 : i32
    return %arg0, %c0_i32, %c0_i32_0 : i32, i32, i32
  }
  func.func @transform_3(%arg0: i32) -> (i32, i32, i32) {
    %c0_i32 = arith.constant 0 : i32
    %c0_i32_0 = arith.constant 0 : i32
    %c0_i32_1 = arith.constant 0 : i32
    %c0_i32_2 = arith.constant 0 : i32
    return %c0_i32, %c0_i32_0, %c0_i32_1 : i32, i32, i32
  }
  func.func @transform_4(%arg0: i32) -> (i32, i32, i32) {
    %c0_i32 = arith.constant 0 : i32
    %c0_i32_0 = arith.constant 0 : i32
    %c0_i32_1 = arith.constant 0 : i32
    %c0_i32_2 = arith.constant 0 : i32
    return %c0_i32, %c0_i32_0, %c0_i32_1 : i32, i32, i32
  }
  func.func @transform_5(%arg0: i32) -> (i32, i32, i32) {
    %c0_i32 = arith.constant 0 : i32
    %c0_i32_0 = arith.constant 0 : i32
    %c0_i32_1 = arith.constant 0 : i32
    %c0_i32_2 = arith.constant 0 : i32
    return %c0_i32, %c0_i32_0, %c0_i32_1 : i32, i32, i32
  }
  func.func @transform_6(%arg0: i32) -> (i32, i32, i32) {
    %c0_i32 = arith.constant 0 : i32
    %c0_i32_0 = arith.constant 0 : i32
    %c0_i32_1 = arith.constant 0 : i32
    %c0_i32_2 = arith.constant 0 : i32
    return %c0_i32, %c0_i32_0, %c0_i32_1 : i32, i32, i32
  }
  func.func @transform_7(%arg0: i32) -> (i32, i32, i32) {
    %c0_i32 = arith.constant 0 : i32
    %c0_i32_0 = arith.constant 0 : i32
    %c0_i32_1 = arith.constant 0 : i32
    %c0_i32_2 = arith.constant 0 : i32
    return %c0_i32, %c0_i32_0, %c0_i32_1 : i32, i32, i32
  }
  func.func @transform_8(%arg0: i32) -> (i32, i32, i32) {
    %c0_i32 = arith.constant 0 : i32
    %c0_i32_0 = arith.constant 0 : i32
    %c0_i32_1 = arith.constant 0 : i32
    %c0_i32_2 = arith.constant 0 : i32
    return %c0_i32, %c0_i32_0, %c0_i32_1 : i32, i32, i32
  }
  func.func @transform_9(%arg0: i32) -> (i32, i32, i32) {
    %c0_i32 = arith.constant 0 : i32
    %c0_i32_0 = arith.constant 0 : i32
    %c0_i32_1 = arith.constant 0 : i32
    %c0_i32_2 = arith.constant 0 : i32
    return %c0_i32, %c0_i32_0, %c0_i32_1 : i32, i32, i32
  }
  func.func @transform_10(%arg0: i32) -> (i32, i32) {
    %c0_i32 = arith.constant 0 : i32
    %c0_i32_0 = arith.constant 0 : i32
    %c0_i32_1 = arith.constant 0 : i32
    return %c0_i32, %c0_i32_0 : i32, i32
  }
  func.func @transform_11(%arg0: i32) -> (i32, i32, i32) {
    %c0_i32 = arith.constant 0 : i32
    %c0_i32_0 = arith.constant 0 : i32
    %c0_i32_1 = arith.constant 0 : i32
    return %arg0, %c0_i32, %c0_i32_0 : i32, i32, i32
  }
  func.func @transform_12(%arg0: i32) -> (i32, i32, i32) {
    %c0_i32 = arith.constant 0 : i32
    %c0_i32_0 = arith.constant 0 : i32
    %c0_i32_1 = arith.constant 0 : i32
    return %arg0, %c0_i32, %c0_i32_0 : i32, i32, i32
  }
}

</mosaic_0001>

<bundles_post_ra>
// kernel: tpu_custom_call.1
= control target key start
LH: loop header
LB: loop body
LE: loop exit
PB: predicated region body
PF: predicated region fallthrough
CT: control target
= control target key end

     0   :  { %s15980_s0 = inlined_call_operand.vmem [shape: f32[2,8,32], index: 0, kind: input, shape index: {}]   ;;  %s15981_s1 = inlined_call_operand.vmem [shape: f32[2,8,32], index: 1, kind: input, shape index: {}]   ;;  %s15982_s2 = inlined_call_operand.vmem [shape: f32[2,8,32], index: 2, kind: input, shape index: {}]   ;;  %s15983_s3 = inlined_call_operand.vmem [shape: f32[4,32,8], index: 3, kind: input, shape index: {}]   ;;  %s15984_s4 = inlined_call_operand.vmem [shape: f32[4,32,8], index: 4, kind: input, shape index: {}]   ;;  %s15985_s5 = inlined_call_operand.vmem [shape: f32[4,32,8], index: 5, kind: input, shape index: {}]   ;;  %s15986_s6 = inlined_call_operand.vmem [shape: f32[4,8,32], index: 6, kind: input, shape index: {}]   ;;  %s15987_s7 = inlined_call_operand.vmem [shape: f32[4,1,8], index: 7, kind: input, shape index: {}]   ;;  %s15988_s8 = inlined_call_operand.vmem [shape: f32[4,1,8], index: 8, kind: input, shape index: {}]   ;;  %s15989_s9 = inlined_call_operand.vmem [shape: f32[4,1,8], index: 9, kind: input, shape index: {}]   ;;  %s15990_s10 = inlined_call_operand.vmem [shape: f32[1,32], index: 10, kind: input, shape index: {}]   ;;  %s15991_s11 = inlined_call_operand.hbm [shape: f32[2,8,32], index: 11, kind: output, shape index: {0}]   ;;  %s15992_s12 = inlined_call_operand.hbm [shape: f32[2,8,8], index: 12, kind: output, shape index: {1}]  }
   0x1   :  { %15995 = sst [smem:[#allocation8_spill]] %s15980_s0 }
   0x2   :  { %15996 = sst [smem:[#allocation9_spill]] %s15981_s1 }
   0x3   :  { %15997 = sst [smem:[#allocation10_spill]] %s15982_s2 }
   0x4   :  { %15998 = sst [smem:[#allocation11_spill]] %s15983_s3 }
   0x5   :  { %15999 = sst [smem:[#allocation12_spill]] %s15984_s4 }
   0x6   :  { %18 = vsyncpa [#allocation3], 0 }
   0x7   :  { %20 = vsyncpa [#allocation3 + $0x1], 0 }
   0x8   :  { %21 = vsyncpa [#allocation5], 0 }
   0x9   :  { %23 = vsyncpa [#allocation5 + $0x1], 0  ;;  %s13952_s21 = smov 0   ;;  %s13954_s22 = smov 0  }
   0xa   :  { %s13956_s23 = smov 0   ;;  %s13958_s24 = smov 0  }
   0xb LB: > { %s13973_s25 = sadd.s32 4294967295, %s13881_s24   ;;  %s12045_s26 = sadd.s32 4294967294, %s13881_s24   ;;  %s13881_s24 = sphi %s13958_s24, %s16012_s24   ;;  %s13877_s23 = sphi %s13956_s23, %s16011_s23   ;;  %s13873_s22 = sphi %s13954_s22, %s16010_s22   ;;  %s13869_s21 = sphi %s13952_s21, %s16009_s21  }
   0xc   : > { %s13977_s27 = sadd.s32 1, %s13881_s24   ;;  %s282_s28 = sadd.s32 1, %s13877_s23 }
   0xd   : > { %s279_s29 = ssub.s32 %s13881_s24, %s13977_s27  ;;  %p292_p0 = scmp.ne.s32.totalorder %s13877_s23, %s13873_s22 }
   0xe   : > { %p280_p1 = scmp.eq.s32.totalorder %s279_s29, 0  ;;  %p293_p2 = scmp.eq.s32.totalorder %s13973_s25, 1 }
   0xf   : > { %p298_p3 = scmp.ne.s32.totalorder %s13873_s22, %s13869_s21  ;;  %p299_p4 = scmp.eq.s32.totalorder %s12045_s26, 1 }
  0x10   : > { %s13988_s30 = scalar_select %p280_p1, %s13877_s23, %s282_s28  }
  0x11   : > { %p13990_p5 = por %p293_p2, %p292_p0  ;;  %p13994_p6 = por %p299_p4, %p298_p3 }
  0x12   : > { %p12048_p7 = scmp.ge.s32.totalorder %s13881_s24, 1  ;;  %p388_p8 = scmp.lt.s32.totalorder %s13881_s24, 3 }
  0x14   : > { %p389_p9 = pnand %p12048_p7, %p388_p8 }
  0x15   : > { %s16002_s3 = sld [smem:[#allocation11_spill]] (!%p389_p9)  ;;  %p442_p10 = scmp.lt.s32.totalorder (!%p389_p9), %s13973_s25, 1 }
  0x16   : > { %392 = sbr.rel (%p389_p9) target bundleno = 1448 (0x5a8), region = 64  ;;  %s16003_s0 = sld [smem:[#allocation8_spill]] (!%p389_p9) }
  0x17   : > { %s16004_s4 = sld [smem:[#allocation12_spill]] (!%p389_p9)  ;;  %s15745_s19 = sand.u32 (!%p389_p9), 1, %s13873_s22  }
  0x18   : > { %s16005_s1 = sld [smem:[#allocation9_spill]] (!%p389_p9)  ;;  %s15993_s20 = sshll.u32 (!%p389_p9), %s15745_s19, 3 }
  0x19   : > { %s16006_s2 = sld [smem:[#allocation10_spill]] (!%p389_p9)  ;;  %s11904_s28 = scalar_lea.sflag (!%p389_p9), [#allocation5], %s15745_s19 }
  0x1b   : > { %v458_v0 = vld [vmem:[%s16002_s3 + $0x18] sm:$0xff]  ;;  %v457_v1 = vld [vmem:[%s16002_s3 + $0x10] sm:$0xff]  ;;  %v456_v2 = vld [vmem:[%s16002_s3 + $0x8] sm:$0xff]  ;;  %v13883_v3 = vmov 0.0   ;;  %vm13884_vm0 = vmmov 0   ;;  %s443_s29 = scalar_select %p442_p10, %s13973_s25, 1 }
  0x1c   : > { %12577 = vmatprep.subr.mxu0 %v13883_v3  ;;  %v14011_v4 = vand.u32 4294901760, %v458_v0  ;;  %12588 = vmatprep.subr.mxu1 %v13883_v3  ;;  %v14014_v5 = vand.u32 4294901760, %v457_v1  ;;  %v14016_v6 = vand.u32 4294901760, %v456_v2  ;;  %v455_v7 = vld [vmem:[%s16002_s3] sm:$0xff]  ;;  %vm499_vm1 = vcmask 261120   ;;  %v462_v32 = vld [vmem:[%s16002_s3 + $0x38] sm:$0xff] }
  0x1d   : > { %v14021_v8 = vand.u32 4294901760, %v455_v7  ;;  %12585 = vmatprep.mubr.msk.f32.mxu0 %vm13884_vm0, %v13883_v3  ;;  %12596 = vmatprep.mubr.msk.f32.mxu1 %vm13884_vm0, %v13883_v3  ;;  %s14042_s15 = sshll.u32 %s443_s29, 3  ;;  %v461_v33 = vld [vmem:[%s16002_s3 + $0x30] sm:$0xff]  ;;  %v14098_v34 = vand.u32 4294901760, %v462_v32  ;;  %v460_v35 = vld [vmem:[%s16002_s3 + $0x28] sm:$0xff]  ;;  %v459_v39 = vld [vmem:[%s16002_s3 + $0x20] sm:$0xff] }
  0x1e   : > { %12578 = vmatpush3.msra.mxu0 %v14011_v4  ;;  %v14030_v9 = vsub.f32 %v458_v0, %v14011_v4  ;;  %v14033_v10 = vsub.f32 %v457_v1, %v14014_v5  ;;  %v14036_v11 = vsub.f32 %v456_v2, %v14016_v6  ;;  %s445_s18 = scalar_lea.vmem %s16003_s0, %s14042_s15  ;;  %v14107_v36 = vand.u32 4294901760, %v461_v33  ;;  %v466_v56 = vld [vmem:[%s16002_s3 + $0x58] sm:$0xff]  ;;  %v465_v57 = vld [vmem:[%s16002_s3 + $0x50] sm:$0xff]  ;;  %v464_v59 = vld [vmem:[%s16002_s3 + $0x48] sm:$0xff]  ;;  %s449_s29 = scalar_lea.vmem %s16005_s1, %s14042_s15 }
  0x1f   : > { %12579 = vmatprep.subr.mxu0 %v13883_v3  ;;  %v14040_v12 = vsub.f32 %v455_v7, %v14021_v8  ;;  %v454_v17 = vld [vmem:[%s445_s18] sm:$0xff]  ;;  %v14114_v37 = vsub.f32 %v462_v32, %v14098_v34  ;;  %v14116_v38 = vand.u32 4294901760, %v460_v35  ;;  %v14132_v41 = vand.u32 4294901760, %v459_v39  ;;  %s453_s18 = scalar_lea.vmem %s16006_s2, %s14042_s15  ;;  %s15758_s15 = scalar_lea.vmem [#allocation4], %s15993_s20 }
  0x20   : > { %v609_v13 = vand.u32 4294901760, %v14030_v9  ;;  %12580 = vmatpush3.msra.mxu0 %v14014_v5  ;;  %v616_v14 = vand.u32 4294901760, %v14033_v10  ;;  %v623_v15 = vand.u32 4294901760, %v14036_v11  ;;  %v501_v21 = vsel %vm499_vm1, %v454_v17, 0  ;;  %v463_v63 = vld [vmem:[%s16002_s3 + $0x40] sm:$0xff]  ;;  %v470_v17 = vld [vmem:[%s16002_s3 + $0x78] sm:$0xff] }
  0x21   : > { %12581 = vmatprep.subr.mxu0 %v13883_v3  ;;  %v630_v16 = vand.u32 4294901760, %v14040_v12  ;;  %v14066_v22 = vand.u32 4294901760, %v501_v21  ;;  %v14127_v40 = vsub.f32 %v461_v33, %v14107_v36  ;;  %v1094_v42 = vand.u32 4294901760, %v14114_v37  ;;  %s11930_s26 = sshll.u32 %s15758_s15, 4  ;;  %s13885_s0 = smov [#allocation4]   ;;  %s11931_s26 = int_to_ptr.vmem [resolvable:$true] %s11930_s26 }
  0x22   : > { %v610_v18 = vsub.f32 %v14030_v9, %v609_v13  ;;  %v617_v19 = vsub.f32 %v14033_v10, %v616_v14  ;;  %12582 = vmatpush3.msra.mxu0 %v14016_v6  ;;  %v624_v20 = vsub.f32 %v14036_v11, %v623_v15  ;;  %v14138_v43 = vsub.f32 %v460_v35, %v14116_v38  ;;  %s13791_s20 = scalar_lea.vmem %s11931_s26, 128  ;;  %s13795_s1 = sshll.u32 %s13885_s0, 4  ;;  %s13796_s1 = int_to_ptr.vmem [resolvable:$false] %s13795_s1 }
  0x23   : > { %12583 = vmatprep.subr.mxu0 %v13883_v3  ;;  %v631_v25 = vsub.f32 %v14040_v12, %v630_v16  ;;  %v14074_v26 = vsub.f32 %v501_v21, %v14066_v22  ;;  %v1101_v44 = vand.u32 4294901760, %v14127_v40  ;;  %v14150_v45 = vsub.f32 %v459_v39, %v14132_v41  ;;  %p13792_p11 = scmp.ne.s32.totalorder %s11931_s26, %s13791_s20  ;;  %s13797_s2 = scalar_lea.vmem %s13796_s1, 256 }
  0x24   : > { %v611_v23 = vand.u32 4294901760, %v610_v18  ;;  %v618_v24 = vand.u32 4294901760, %v617_v19  ;;  %12584 = vmatpush3.msra.mxu0 %v14021_v8  ;;  %v625_v27 = vand.u32 4294901760, %v624_v20  ;;  %v1095_v46 = vsub.f32 %v14114_v37, %v1094_v42  ;;  %v469_v18 = vld [vmem:[%s16002_s3 + $0x70] sm:$0xff]  ;;  %v468_v20 = vld [vmem:[%s16002_s3 + $0x68] sm:$0xff]  ;;  %p13798_p0 = scmp.lt.s32.totalorder %s11931_s26, %s13796_s1  ;;  %p13799_p1 = scmp.lt.s32.totalorder %s13797_s2, %s13791_s20 }
  0x25   : > { %12599 = vmatprep.subr.mxu0 %v13883_v3  ;;  %v14078_v28 = vand.u32 4294901760, %v14074_v26  ;;  %v632_v29 = vand.u32 4294901760, %v631_v25  ;;  %v1108_v47 = vand.u32 4294901760, %v14138_v43  ;;  %v1102_v48 = vsub.f32 %v14127_v40, %v1101_v44  ;;  %v467_v25 = vld [vmem:[%s16002_s3 + $0x60] sm:$0xff]  ;;  %p13793_p12 = pnand %p13792_p11, %p13990_p5 }
  0x26   : > { %12589 = vmatpush3.msra.mxu1 %v611_v23  ;;  %v1115_v49 = vand.u32 4294901760, %v14150_v45  ;;  %v1096_v50 = vand.u32 4294901760, %v1095_v46  ;;  %v14212_v58 = vand.u32 4294901760, %v466_v56  ;;  %v14221_v60 = vand.u32 4294901760, %v465_v57  ;;  %p13800_p2 = por %p13799_p1, %p13798_p0 }
  0x27   : > { %12590 = vmatprep.subr.mxu1 %v13883_v3  ;;  %v575_v30 = vsub.f32 %v14074_v26, %v14078_v28  ;;  %v1109_v51 = vsub.f32 %v14138_v43, %v1108_v47  ;;  %v1103_v52 = vand.u32 4294901760, %v1102_v48  ;;  %v14230_v62 = vand.u32 4294901760, %v464_v59  ;;  %v2449_v48 = vld [vmem:[%s16004_s4 + $0x8] sm:$0xff]  ;;  %p13794_p13 = pneg %p13793_p12 }
  0x28   : > { %12591 = vmatpush3.msra.mxu1 %v618_v24  ;;  %v1116_v53 = vsub.f32 %v14150_v45, %v1115_v49  ;;  %v14228_v61 = vsub.f32 %v466_v56, %v14212_v58  ;;  %v14241_v0 = vsub.f32 %v465_v57, %v14221_v60  ;;  %v14246_v1 = vand.u32 4294901760, %v463_v63 }
  0x29   : > { %12592 = vmatprep.subr.mxu1 %v13883_v3  ;;  %v14084_v31 = vand.u32 4294901760, %v575_v30  ;;  %v1110_v54 = vand.u32 4294901760, %v1109_v51  ;;  %v14326_v19 = vand.u32 4294901760, %v470_v17  ;;  %v14335_v21 = vand.u32 4294901760, %v469_v18  ;;  %p13801_p3 = pnand %p13800_p2, %p13794_p13 }
  0x2a   : > { %12593 = vmatpush3.msra.mxu1 %v625_v27  ;;  %v1117_v55 = vand.u32 4294901760, %v1116_v53  ;;  %v1579_v2 = vand.u32 4294901760, %v14228_v61  ;;  %v14344_v24 = vand.u32 4294901760, %v468_v20  ;;  %v2448_v53 = vld [vmem:[%s16004_s4] sm:$0xff]  ;;  %vm6423_vm2 = vcmask 64512  }
  0x2b   : > { %12594 = vmatprep.subr.mxu1 %v13883_v3  ;;  %12586 = vmatmul.mubr.f32.vlgmr.msra.gmra.mxu0 %v14084_v31  ;;  %v14342_v23 = vsub.f32 %v470_v17, %v14326_v19  ;;  %v14355_v27 = vsub.f32 %v469_v18, %v14335_v21  ;;  %v14481_v56 = vand.u32 4294901760, %v2448_v53 }
  0x2c   : > { %12595 = vmatpush3.msra.mxu1 %v632_v29  ;;  %12600 = vmatpush3.msra.mxu0 %v14030_v9  ;;  %v1580_v7 = vsub.f32 %v14228_v61, %v1579_v2  ;;  %v14360_v29 = vand.u32 4294901760, %v467_v25  ;;  %v14366_v32 = vsub.f32 %v468_v20, %v14344_v24 }
  0x2d   : > { %12597 = vmatmul.mubr.f32.vlgmr.msra.gmra.mxu1 %v14066_v22  ;;  %12610 = vmatprep.subr.mxu1 %v13883_v3  ;;  %v2064_v30 = vand.u32 4294901760, %v14342_v23  ;;  %v2071_v33 = vand.u32 4294901760, %v14355_v27 }
  0x2e   : > { %12601 = vmatprep.subr.mxu0 %v13883_v3  ;;  %12611 = vmatpush3.msra.mxu1 %v14011_v4 }
  0x2f   : > { %12602 = vmatpush3.msra.mxu0 %v14033_v10  ;;  %12612 = vmatprep.subr.mxu1 %v13883_v3  ;;  %v2065_v35 = vsub.f32 %v14342_v23, %v2064_v30 }
  0x30   : > { %12603 = vmatprep.subr.mxu0 %v13883_v3  ;;  %12613 = vmatpush3.msra.mxu1 %v14014_v5 }
  0x31   : > { %12604 = vmatpush3.msra.mxu0 %v14036_v11  ;;  %12614 = vmatprep.subr.mxu1 %v13883_v3  ;;  %v1581_v11 = vand.u32 4294901760, %v1580_v7  ;;  %v2066_v39 = vand.u32 4294901760, %v2065_v35 }
  0x32   : > { %12605 = vmatprep.subr.mxu0 %v13883_v3  ;;  %12615 = vmatpush3.msra.mxu1 %v14016_v6 }
  0x33   : > { %12606 = vmatpush3.msra.mxu0 %v14040_v12  ;;  %12607 = vmatprep.mubr.msk.f32.mxu0 %vm13884_vm0, %v13883_v3 }
  0x34   : > { %12616 = vmatprep.subr.mxu1 %v13883_v3  ;;  %12608 = vmatmul.mubr.f32.vlgmr.msra.gmra.mxu0 %v14074_v26 }
  0x35   : > { %12617 = vmatpush3.msra.mxu1 %v14021_v8  ;;  %12618 = vmatprep.mubr.msk.f32.mxu1 %vm13884_vm0, %v13883_v3 }
  0x36   : > { %12621 = vmatprep.subr.mxu0 %v13883_v3  ;;  %12619 = vmatmul.mubr.f32.vlgmr.msra.gmra.mxu1 %v14078_v28 }
  0x37   : > { %12622 = vmatpush3.msra.mxu0 %v609_v13  ;;  %12632 = vmatprep.subr.mxu1 %v13883_v3 }
  0x38   : > { %12623 = vmatprep.subr.mxu0 %v13883_v3  ;;  %12633 = vmatpush3.msra.mxu1 %v14011_v4  ;;  %v14252_v4 = vsub.f32 %v464_v59, %v14230_v62 }
  0x39   : > { %12624 = vmatpush3.msra.mxu0 %v616_v14  ;;  %12634 = vmatprep.subr.mxu1 %v13883_v3 }
  0x3a   : > { %12625 = vmatprep.subr.mxu0 %v13883_v3  ;;  %12635 = vmatpush3.msra.mxu1 %v14014_v5  ;;  %v1586_v5 = vand.u32 4294901760, %v14241_v0 }
  0x3b   : > { %12626 = vmatpush3.msra.mxu0 %v623_v15  ;;  %12636 = vmatprep.subr.mxu1 %v13883_v3 }
  0x3c   : > { %12627 = vmatprep.subr.mxu0 %v13883_v3  ;;  %12637 = vmatpush3.msra.mxu1 %v14016_v6  ;;  %v14264_v6 = vsub.f32 %v463_v63, %v14246_v1  ;;  %v1587_v9 = vsub.f32 %v14241_v0, %v1586_v5 }
  0x3d   : > { %12628 = vmatpush3.msra.mxu0 %v630_v16  ;;  %12629 = vmatprep.mubr.msk.f32.mxu0 %vm13884_vm0, %v13883_v3 }
  0x3e   : > { %12638 = vmatprep.subr.mxu1 %v13883_v3  ;;  %12630 = vmatmul.mubr.f32.vlgmr.msra.gmra.mxu0 %v14066_v22  ;;  %v1600_v10 = vand.u32 4294901760, %v14264_v6  ;;  %v1588_v13 = vand.u32 4294901760, %v1587_v9  ;;  %v2455_v9 = vld [vmem:[%s16004_s4 + $0x38] sm:$0xff] }
  0x3f   : > { %12639 = vmatpush3.msra.mxu1 %v14021_v8  ;;  %12640 = vmatprep.mubr.msk.f32.mxu1 %vm13884_vm0, %v13883_v3  ;;  %v1593_v8 = vand.u32 4294901760, %v14252_v4 }
  0x40   : > { %12643 = vmatprep.subr.mxu0 %v13883_v3  ;;  %12641 = vmatmul.mubr.f32.vlgmr.msra.gmra.mxu1 %v14066_v22  ;;  %v1601_v14 = vsub.f32 %v14264_v6, %v1600_v10 }
  0x41   : > { %12644 = vmatpush3.msra.mxu0 %v14098_v34  ;;  %12654 = vmatprep.subr.mxu1 %v13883_v3  ;;  %v1594_v12 = vsub.f32 %v14252_v4, %v1593_v8 }
  0x42   : > { %12645 = vmatprep.subr.mxu0 %v13883_v3  ;;  %12655 = vmatpush3.msra.mxu1 %v1096_v50  ;;  %v1602_v16 = vand.u32 4294901760, %v1601_v14 }
  0x43   : > { %12646 = vmatpush3.msra.mxu0 %v14107_v36  ;;  %12656 = vmatprep.subr.mxu1 %v13883_v3  ;;  %v1595_v15 = vand.u32 4294901760, %v1594_v12  ;;  %v2453_v12 = vld [vmem:[%s16004_s4 + $0x28] sm:$0xff] }
  0x44   : > { %12647 = vmatprep.subr.mxu0 %v13883_v3  ;;  %12657 = vmatpush3.msra.mxu1 %v1103_v52  ;;  %v14463_v52 = vand.u32 4294901760, %v2449_v48 }
  0x45   : > { %12648 = vmatpush3.msra.mxu0 %v14116_v38  ;;  %12658 = vmatprep.subr.mxu1 %v13883_v3 }
  0x46   : > { %12649 = vmatprep.subr.mxu0 %v13883_v3  ;;  %12659 = vmatpush3.msra.mxu1 %v1110_v54 }
  0x47   : > { %12650 = vmatpush3.msra.mxu0 %v14132_v41  ;;  %12651 = vmatprep.mubr.msk.f32.mxu0 %vm13884_vm0, %v13883_v3 }
  0x48   : > { %12660 = vmatprep.subr.mxu1 %v13883_v3  ;;  %12652 = vmatmul.mubr.f32.vlgmr.msra.gmra.mxu0 %v14084_v31 }
  0x49   : > { %12661 = vmatpush3.msra.mxu1 %v1117_v55  ;;  %12662 = vmatprep.mubr.msk.f32.mxu1 %vm13884_vm0, %v13883_v3 }
  0x4a   : > { %12665 = vmatprep.subr.mxu0 %v13883_v3  ;;  %12663 = vmatmul.mubr.f32.vlgmr.msra.gmra.mxu1 %v14066_v22 }
  0x4b   : > { %12666 = vmatpush3.msra.mxu0 %v14114_v37  ;;  %12676 = vmatprep.subr.mxu1 %v13883_v3  ;;  %v2072_v37 = vsub.f32 %v14355_v27, %v2071_v33 }
  0x4c   : > { %12667 = vmatprep.subr.mxu0 %v13883_v3  ;;  %12677 = vmatpush3.msra.mxu1 %v14098_v34 }
  0x4d   : > { %12668 = vmatpush3.msra.mxu0 %v14127_v40  ;;  %12678 = vmatprep.subr.mxu1 %v13883_v3 }
  0x4e   : > { %12669 = vmatprep.subr.mxu0 %v13883_v3  ;;  %12679 = vmatpush3.msra.mxu1 %v14107_v36 }
  0x4f   : > { %12670 = vmatpush3.msra.mxu0 %v14138_v43  ;;  %12680 = vmatprep.subr.mxu1 %v13883_v3 }
  0x50   : > { %12671 = vmatprep.subr.mxu0 %v13883_v3  ;;  %12681 = vmatpush3.msra.mxu1 %v14116_v38 }
  0x51   : > { %12672 = vmatpush3.msra.mxu0 %v14150_v45  ;;  %12673 = vmatprep.mubr.msk.f32.mxu0 %vm13884_vm0, %v13883_v3  ;;  %v2451_v45 = vld [vmem:[%s16004_s4 + $0x18] sm:$0xff] }
  0x52   : > { %12682 = vmatprep.subr.mxu1 %v13883_v3  ;;  %12674 = vmatmul.mubr.f32.vlgmr.msra.gmra.mxu0 %v14074_v26  ;;  %v14444_v46 = vand.u32 4294901760, %v2451_v45 }
  0x53   : > { %12683 = vmatpush3.msra.mxu1 %v14132_v41  ;;  %12684 = vmatprep.mubr.msk.f32.mxu1 %vm13884_vm0, %v13883_v3 }
  0x54   : > { %12687 = vmatprep.subr.mxu0 %v13883_v3  ;;  %12685 = vmatmul.mubr.f32.vlgmr.msra.gmra.mxu1 %v14078_v28  ;;  %v14461_v51 = vsub.f32 %v2451_v45, %v14444_v46 }
  0x55   : > { %12688 = vmatpush3.msra.mxu0 %v1094_v42  ;;  %12698 = vmatprep.subr.mxu1 %v13883_v3 }
  0x56   : > { %12689 = vmatprep.subr.mxu0 %v13883_v3  ;;  %12699 = vmatpush3.msra.mxu1 %v14098_v34  ;;  %v14378_v34 = vsub.f32 %v467_v25, %v14360_v29  ;;  %v2601_v57 = vand.u32 4294901760, %v14461_v51 }
  0x57   : > { %12690 = vmatpush3.msra.mxu0 %v1101_v44  ;;  %12700 = vmatprep.subr.mxu1 %v13883_v3 }
  0x58   : > { %12691 = vmatprep.subr.mxu0 %v13883_v3  ;;  %12701 = vmatpush3.msra.mxu1 %v14107_v36  ;;  %v2078_v36 = vand.u32 4294901760, %v14366_v32 }
  0x59   : > { %12692 = vmatpush3.msra.mxu0 %v1108_v47  ;;  %12702 = vmatprep.subr.mxu1 %v13883_v3  ;;  %v2447_v47 = vld [vmem:[%s449_s29] sm:$0xff]  ;;  %s15994_s29 = sshll.u32 %s13973_s25, 7 }
  0x5a   : > { %12693 = vmatprep.subr.mxu0 %v13883_v3  ;;  %12703 = vmatpush3.msra.mxu1 %v14116_v38  ;;  %v2085_v38 = vand.u32 4294901760, %v14378_v34  ;;  %v2079_v40 = vsub.f32 %v14366_v32, %v2078_v36  ;;  %v2493_v50 = vsel %vm499_vm1, %v2447_v47, 0 }
  0x5b   : > { %12694 = vmatpush3.msra.mxu0 %v1115_v49  ;;  %12695 = vmatprep.mubr.msk.f32.mxu0 %vm13884_vm0, %v13883_v3  ;;  %v14476_v55 = vand.u32 4294901760, %v2493_v50 }
  0x5c   : > { %12704 = vmatprep.subr.mxu1 %v13883_v3  ;;  %12696 = vmatmul.mubr.f32.vlgmr.msra.gmra.mxu0 %v14066_v22  ;;  %v2086_v42 = vsub.f32 %v14378_v34, %v2085_v38  ;;  %v2080_v43 = vand.u32 4294901760, %v2079_v40  ;;  %v2457_v40 = vld [vmem:[%s16004_s4 + $0x48] sm:$0xff] }
  0x5d   : > { %12705 = vmatpush3.msra.mxu1 %v14132_v41  ;;  %12706 = vmatprep.mubr.msk.f32.mxu1 %vm13884_vm0, %v13883_v3  ;;  %v2073_v41 = vand.u32 4294901760, %v2072_v37  ;;  %v14496_v59 = vsub.f32 %v2493_v50, %v14476_v55  ;;  %v2459_v37 = vld [vmem:[%s16004_s4 + $0x58] sm:$0xff] }
  0x5e   : > { %12709 = vmatprep.subr.mxu0 %v13883_v3  ;;  %12707 = vmatmul.mubr.f32.vlgmr.msra.gmra.mxu1 %v14066_v22  ;;  %v2087_v44 = vand.u32 4294901760, %v2086_v42 }
  0x5f   : > { %12710 = vmatpush3.msra.mxu0 %v14212_v58  ;;  %12720 = vmatprep.subr.mxu1 %v13883_v3  ;;  %v14519_v63 = vand.u32 4294901760, %v14496_v59 }
  0x60   : > { %12711 = vmatprep.subr.mxu0 %v13883_v3  ;;  %12721 = vmatpush3.msra.mxu1 %v1581_v11  ;;  %v14571_v11 = vand.u32 4294901760, %v2455_v9 }
  0x61   : > { %12712 = vmatpush3.msra.mxu0 %v14221_v60  ;;  %12722 = vmatprep.subr.mxu1 %v13883_v3 }
  0x62   : > { %12713 = vmatprep.subr.mxu0 %v13883_v3  ;;  %12723 = vmatpush3.msra.mxu1 %v1588_v13  ;;  %v14587_v14 = vsub.f32 %v2455_v9, %v14571_v11 }
  0x63   : > { %12714 = vmatpush3.msra.mxu0 %v14230_v62  ;;  %12724 = vmatprep.subr.mxu1 %v13883_v3 }
  0x64   : > { %12715 = vmatprep.subr.mxu0 %v13883_v3  ;;  %12725 = vmatpush3.msra.mxu1 %v1595_v15  ;;  %v14589_v15 = vand.u32 4294901760, %v2453_v12 }
  0x65   : > { %12716 = vmatpush3.msra.mxu0 %v14246_v1  ;;  %12717 = vmatprep.mubr.msk.f32.mxu0 %vm13884_vm0, %v13883_v3 }
  0x66   : > { %12726 = vmatprep.subr.mxu1 %v13883_v3  ;;  %12718 = vmatmul.mubr.f32.vlgmr.msra.gmra.mxu0 %v14084_v31  ;;  %v14611_v20 = vsub.f32 %v2453_v12, %v14589_v15 }
  0x67   : > { %12727 = vmatpush3.msra.mxu1 %v1602_v16  ;;  %12728 = vmatprep.mubr.msk.f32.mxu1 %vm13884_vm0, %v13883_v3  ;;  %v2452_v16 = vld [vmem:[%s16004_s4 + $0x20] sm:$0xff] }
  0x68   : > { %12731 = vmatprep.subr.mxu0 %v13883_v3  ;;  %12729 = vmatmul.mubr.f32.vlgmr.msra.gmra.mxu1 %v14066_v22  ;;  %v14605_v18 = vand.u32 4294901760, %v2452_v16  ;;  %v3100_v25 = vand.u32 4294901760, %v14611_v20 }
  0x69   : > { %12732 = vmatpush3.msra.mxu0 %v14228_v61  ;;  %12742 = vmatprep.subr.mxu1 %v13883_v3 }
  0x6a   : > { %12733 = vmatprep.subr.mxu0 %v13883_v3  ;;  %12743 = vmatpush3.msra.mxu1 %v14212_v58 }
  0x6b   : > { %12734 = vmatpush3.msra.mxu0 %v14241_v0  ;;  %12744 = vmatprep.subr.mxu1 %v13883_v3 }
  0x6c   : > { %12735 = vmatprep.subr.mxu0 %v13883_v3  ;;  %12745 = vmatpush3.msra.mxu1 %v14221_v60 }
  0x6d   : > { %12736 = vmatpush3.msra.mxu0 %v14252_v4  ;;  %12746 = vmatprep.subr.mxu1 %v13883_v3 }
  0x6e   : > { %12737 = vmatprep.subr.mxu0 %v13883_v3  ;;  %12747 = vmatpush3.msra.mxu1 %v14230_v62 }
  0x6f   : > { %12738 = vmatpush3.msra.mxu0 %v14264_v6  ;;  %12739 = vmatprep.mubr.msk.f32.mxu0 %vm13884_vm0, %v13883_v3 }
  0x70   : > { %12748 = vmatprep.subr.mxu1 %v13883_v3  ;;  %12740 = vmatmul.mubr.f32.vlgmr.msra.gmra.mxu0 %v14074_v26 }
  0x71   : > { %12749 = vmatpush3.msra.mxu1 %v14246_v1  ;;  %12750 = vmatprep.mubr.msk.f32.mxu1 %vm13884_vm0, %v13883_v3 }
  0x72   : > { %12753 = vmatprep.subr.mxu0 %v13883_v3  ;;  %12751 = vmatmul.mubr.f32.vlgmr.msra.gmra.mxu1 %v14078_v28 }
  0x73   : > { %12754 = vmatpush3.msra.mxu0 %v1579_v2  ;;  %12764 = vmatprep.subr.mxu1 %v13883_v3 }
  0x74   : > { %12755 = vmatprep.subr.mxu0 %v13883_v3  ;;  %12765 = vmatpush3.msra.mxu1 %v14212_v58 }
  0x75   : > { %12756 = vmatpush3.msra.mxu0 %v1586_v5  ;;  %12766 = vmatprep.subr.mxu1 %v13883_v3  ;;  %v2567_v5 = vsub.f32 %v14496_v59, %v14519_v63 }
  0x76   : > { %12757 = vmatprep.subr.mxu0 %v13883_v3  ;;  %12767 = vmatpush3.msra.mxu1 %v14221_v60  ;;  %v2602_v60 = vsub.f32 %v14461_v51, %v2601_v57 }
  0x77   : > { %12758 = vmatpush3.msra.mxu0 %v1593_v8  ;;  %12768 = vmatprep.subr.mxu1 %v13883_v3 }
  0x78   : > { %12759 = vmatprep.subr.mxu0 %v13883_v3  ;;  %12769 = vmatpush3.msra.mxu1 %v14230_v62 }
  0x79   : > { %12760 = vmatpush3.msra.mxu0 %v1600_v10  ;;  %12761 = vmatprep.mubr.msk.f32.mxu0 %vm13884_vm0, %v13883_v3  ;;  %v2454_v10 = vld [vmem:[%s16004_s4 + $0x30] sm:$0xff] }
  0x7a   : > { %12770 = vmatprep.subr.mxu1 %v13883_v3  ;;  %12762 = vmatmul.mubr.f32.vlgmr.msra.gmra.mxu0 %v14066_v22  ;;  %v14580_v13 = vand.u32 4294901760, %v2454_v10 }
  0x7b   : > { %12771 = vmatpush3.msra.mxu1 %v14246_v1  ;;  %12772 = vmatprep.mubr.msk.f32.mxu1 %vm13884_vm0, %v13883_v3  ;;  %v2603_v1 = vand.u32 4294901760, %v2602_v60  ;;  %v2463_v60 = vld [vmem:[%s16004_s4 + $0x78] sm:$0xff] }
  0x7c   : > { %12775 = vmatprep.subr.mxu0 %v13883_v3  ;;  %12773 = vmatmul.mubr.f32.vlgmr.msra.gmra.mxu1 %v14066_v22  ;;  %v14600_v17 = vsub.f32 %v2454_v10, %v14580_v13  ;;  %v12054_v10 = vld [vmem:[%s15987_s7] ss:$0 sm:$0xff] }
  0x7d   : > { %12776 = vmatpush3.msra.mxu0 %v14326_v19  ;;  %12786 = vmatprep.subr.mxu1 %v13883_v3 }
  0x7e   : > { %12777 = vmatprep.subr.mxu0 %v13883_v3  ;;  %12787 = vmatpush3.msra.mxu1 %v2066_v39  ;;  %v14685_v39 = vand.u32 4294901760, %v2459_v37 }
  0x7f   : > { %12778 = vmatpush3.msra.mxu0 %v14335_v21  ;;  %12788 = vmatprep.subr.mxu1 %v13883_v3 }
  0x80   : > { %12779 = vmatprep.subr.mxu0 %v13883_v3  ;;  %12789 = vmatpush3.msra.mxu1 %v2073_v41  ;;  %v14701_v42 = vsub.f32 %v2459_v37, %v14685_v39 }
  0x81   : > { %12780 = vmatpush3.msra.mxu0 %v14344_v24  ;;  %12790 = vmatprep.subr.mxu1 %v13883_v3 }
  0x82   : > { %12781 = vmatprep.subr.mxu0 %v13883_v3  ;;  %12791 = vmatpush3.msra.mxu1 %v2080_v43  ;;  %v14703_v43 = vand.u32 4294901760, %v2457_v40 }
  0x83   : > { %12782 = vmatpush3.msra.mxu0 %v14360_v29  ;;  %12783 = vmatprep.mubr.msk.f32.mxu0 %vm13884_vm0, %v13883_v3 }
  0x84   : > { %12792 = vmatprep.subr.mxu1 %v13883_v3  ;;  %12784 = vmatmul.mubr.f32.vlgmr.msra.gmra.mxu0 %v14084_v31  ;;  %v2450_v31 = vld [vmem:[%s16004_s4 + $0x10] sm:$0xff]  ;;  %v14725_v47 = vsub.f32 %v2457_v40, %v14703_v43  ;;  %v4439_v40 = vld [vmem:[%s15985_s5 + $0x18] sm:$0xff] }
  0x85   : > { %12793 = vmatpush3.msra.mxu1 %v2087_v44  ;;  %12794 = vmatprep.mubr.msk.f32.mxu1 %vm13884_vm0, %v13883_v3  ;;  %v14453_v49 = vand.u32 4294901760, %v2450_v31  ;;  %v2456_v44 = vld [vmem:[%s16004_s4 + $0x40] sm:$0xff] }
  0x86   : > { %12797 = vmatprep.subr.mxu0 %v13883_v3  ;;  %12795 = vmatmul.mubr.f32.vlgmr.msra.gmra.mxu1 %v14066_v22 }
  0x87   : > { %12798 = vmatpush3.msra.mxu0 %v14342_v23  ;;  %12808 = vmatprep.subr.mxu1 %v13883_v3  ;;  %v14474_v54 = vsub.f32 %v2450_v31, %v14453_v49  ;;  %v14623_v23 = vsub.f32 %v2452_v16, %v14605_v18  ;;  %v14719_v31 = vand.u32 4294901760, %v2456_v44 }
  0x88   : > { %12799 = vmatprep.subr.mxu0 %v13883_v3  ;;  %12809 = vmatpush3.msra.mxu1 %v14326_v19 }
  0x89   : > { %12800 = vmatpush3.msra.mxu0 %v14355_v27  ;;  %12810 = vmatprep.subr.mxu1 %v13883_v3  ;;  %v2608_v58 = vand.u32 4294901760, %v14474_v54 }
  0x8a   : > { %12801 = vmatprep.subr.mxu0 %v13883_v3  ;;  %12811 = vmatpush3.msra.mxu1 %v14335_v21 }
  0x8b   : > { %12802 = vmatpush3.msra.mxu0 %v14366_v32  ;;  %12812 = vmatprep.subr.mxu1 %v13883_v3  ;;  %v2609_v62 = vsub.f32 %v14474_v54, %v2608_v58  ;;  %v3101_v32 = vsub.f32 %v14611_v20, %v3100_v25 }
  0x8c   : > { %12803 = vmatprep.subr.mxu0 %v13883_v3  ;;  %12813 = vmatpush3.msra.mxu1 %v14344_v24 }
  0x8d   : > { %12804 = vmatpush3.msra.mxu0 %v14378_v34  ;;  %12805 = vmatprep.mubr.msk.f32.mxu0 %vm13884_vm0, %v13883_v3  ;;  %v2610_v4 = vand.u32 4294901760, %v2609_v62  ;;  %v3102_v35 = vand.u32 4294901760, %v3101_v32  ;;  %v14799_v62 = vand.u32 4294901760, %v2463_v60 }
  0x8e   : > { %12814 = vmatprep.subr.mxu1 %v13883_v3  ;;  %12806 = vmatmul.mubr.f32.vlgmr.msra.gmra.mxu0 %v14074_v26  ;;  %v14487_v26 = vsub.f32 %v2449_v48, %v14463_v52 }
  0x8f   : > { %12815 = vmatpush3.msra.mxu1 %v14360_v29  ;;  %12816 = vmatprep.mubr.msk.f32.mxu1 %vm13884_vm0, %v13883_v3 }
  0x90   : > { %12819 = vmatprep.subr.mxu0 %v13883_v3  ;;  %12817 = vmatmul.mubr.f32.vlgmr.msra.gmra.mxu1 %v14078_v28  ;;  %v14502_v28 = vsub.f32 %v2448_v53, %v14481_v56  ;;  %v2615_v61 = vand.u32 4294901760, %v14487_v26 }
  0x91   : > { %12820 = vmatpush3.msra.mxu0 %v2064_v30  ;;  %12830 = vmatprep.subr.mxu1 %v13883_v3 }
  0x92   : > { %12821 = vmatprep.subr.mxu0 %v13883_v3  ;;  %12831 = vmatpush3.msra.mxu1 %v14326_v19  ;;  %v2622_v0 = vand.u32 4294901760, %v14502_v28  ;;  %v2616_v2 = vsub.f32 %v14487_v26, %v2615_v61  ;;  %v3086_v19 = vand.u32 4294901760, %v14587_v14 }
  0x93   : > { %12822 = vmatpush3.msra.mxu0 %v2071_v33  ;;  %12832 = vmatprep.subr.mxu1 %v13883_v3 }
  0x94   : > { %12823 = vmatprep.subr.mxu0 %v13883_v3  ;;  %12833 = vmatpush3.msra.mxu1 %v14335_v21  ;;  %v2623_v6 = vsub.f32 %v14502_v28, %v2622_v0  ;;  %v2617_v7 = vand.u32 4294901760, %v2616_v2  ;;  %v3093_v21 = vand.u32 4294901760, %v14600_v17  ;;  %v14815_v2 = vsub.f32 %v2463_v60, %v14799_v62 }
  0x95   : > { %12824 = vmatpush3.msra.mxu0 %v2078_v36  ;;  %12834 = vmatprep.subr.mxu1 %v13883_v3 }
  0x96   : > { %12825 = vmatprep.subr.mxu0 %v13883_v3  ;;  %12835 = vmatpush3.msra.mxu1 %v14344_v24  ;;  %v2624_v8 = vand.u32 4294901760, %v2623_v6  ;;  %v3087_v24 = vsub.f32 %v14587_v14, %v3086_v19  ;;  %v3094_v27 = vsub.f32 %v14600_v17, %v3093_v21 }
  0x97   : > { %12826 = vmatpush3.msra.mxu0 %v2085_v38  ;;  %12827 = vmatprep.mubr.msk.f32.mxu0 %vm13884_vm0, %v13883_v3  ;;  %v2458_v38 = vld [vmem:[%s16004_s4 + $0x50] sm:$0xff] }
  0x98   : > { %12836 = vmatprep.subr.mxu1 %v13883_v3  ;;  %12828 = vmatmul.mubr.f32.vlgmr.msra.gmra.mxu0 %v14066_v22  ;;  %v3088_v30 = vand.u32 4294901760, %v3087_v24  ;;  %v3095_v33 = vand.u32 4294901760, %v3094_v27  ;;  %v14694_v41 = vand.u32 4294901760, %v2458_v38 }
  0x99   : > { %12837 = vmatpush3.msra.mxu1 %v14360_v29  ;;  %12838 = vmatprep.mubr.msk.f32.mxu1 %vm13884_vm0, %v13883_v3  ;;  %v3107_v29 = vand.u32 4294901760, %v14623_v23 }
  0x9a   : > { %12841 = vmatprep.subr.mxu0 %v13883_v3  ;;  %12839 = vmatmul.mubr.f32.vlgmr.msra.gmra.mxu1 %v14066_v22  ;;  %v14547_v22 = vand.u32 4294901760, %v2567_v5  ;;  %v14714_v45 = vsub.f32 %v2458_v38, %v14694_v41  ;;  %v2460_v5 = vld [vmem:[%s16004_s4 + $0x60] sm:$0xff] }
  0x9b   : > { %12842 = vmatpush3.msra.mxu0 %v14444_v46  ;;  %12852 = vmatprep.subr.mxu1 %v13883_v3  ;;  %v3108_v34 = vsub.f32 %v14623_v23, %v3107_v29 }
  0x9c   : > { %12843 = vmatprep.subr.mxu0 %v13883_v3  ;;  %12853 = vmatpush3.msra.mxu1 %v2603_v1  ;;  %v3578_v48 = vand.u32 4294901760, %v14714_v45 }
  0x9d   : > { %12844 = vmatpush3.msra.mxu0 %v14453_v49  ;;  %12854 = vmatprep.subr.mxu1 %v13883_v3  ;;  %v3109_v36 = vand.u32 4294901760, %v3108_v34 }
  0x9e   : > { %12845 = vmatprep.subr.mxu0 %v13883_v3  ;;  %12855 = vmatpush3.msra.mxu1 %v2610_v4 }
  0x9f   : > { %12846 = vmatpush3.msra.mxu0 %v14463_v52  ;;  %12856 = vmatprep.subr.mxu1 %v13883_v3 }
  0xa0   : > { %12847 = vmatprep.subr.mxu0 %v13883_v3  ;;  %12857 = vmatpush3.msra.mxu1 %v2617_v7  ;;  %v14833_v7 = vand.u32 4294901760, %v2460_v5 }
  0xa1   : > { %12848 = vmatpush3.msra.mxu0 %v14481_v56  ;;  %12849 = vmatprep.mubr.msk.f32.mxu0 %vm13884_vm0, %v13883_v3 }
  0xa2   : > { %12858 = vmatprep.subr.mxu1 %v13883_v3  ;;  %12850 = vmatmul.mubr.f32.vlgmr.msra.gmra.mxu0 %v14547_v22 }
  0xa3   : > { %12859 = vmatpush3.msra.mxu1 %v2624_v8  ;;  %12860 = vmatprep.mubr.msk.f32.mxu1 %vm13884_vm0, %v13883_v3  ;;  %v4056_v8 = vand.u32 4294901760, %v14815_v2 }
  0xa4   : > { %12863 = vmatprep.subr.mxu0 %v13883_v3  ;;  %12861 = vmatmul.mubr.f32.vlgmr.msra.gmra.mxu1 %v14476_v55 }
  0xa5   : > { %12864 = vmatpush3.msra.mxu0 %v14461_v51  ;;  %12874 = vmatprep.subr.mxu1 %v13883_v3  ;;  %v3585_v51 = vand.u32 4294901760, %v14725_v47  ;;  %v4057_v16 = vsub.f32 %v14815_v2, %v4056_v8 }
  0xa6   : > { %12865 = vmatprep.subr.mxu0 %v13883_v3  ;;  %12875 = vmatpush3.msra.mxu1 %v14444_v46 }
  0xa7   : > { %12866 = vmatpush3.msra.mxu0 %v14474_v54  ;;  %12876 = vmatprep.subr.mxu1 %v13883_v3  ;;  %v4058_v24 = vand.u32 4294901760, %v4057_v16 }
  0xa8   : > { %12867 = vmatprep.subr.mxu0 %v13883_v3  ;;  %12877 = vmatpush3.msra.mxu1 %v14453_v49 }
  0xa9   : > { %12868 = vmatpush3.msra.mxu0 %v14487_v26  ;;  %12878 = vmatprep.subr.mxu1 %v13883_v3 }
  0xaa   : > { %12869 = vmatprep.subr.mxu0 %v13883_v3  ;;  %12879 = vmatpush3.msra.mxu1 %v14463_v52 }
  0xab   : > { %12870 = vmatpush3.msra.mxu0 %v14502_v28  ;;  %12871 = vmatprep.mubr.msk.f32.mxu0 %vm13884_vm0, %v13883_v3 }
  0xac   : > { %12880 = vmatprep.subr.mxu1 %v13883_v3  ;;  %12872 = vmatmul.mubr.f32.vlgmr.msra.gmra.mxu0 %v14496_v59 }
  0xad   : > { %12881 = vmatpush3.msra.mxu1 %v14481_v56  ;;  %12882 = vmatprep.mubr.msk.f32.mxu1 %vm13884_vm0, %v13883_v3 }
  0xae   : > { %12885 = vmatprep.subr.mxu0 %v13883_v3  ;;  %12883 = vmatmul.mubr.f32.vlgmr.msra.gmra.mxu1 %v14519_v63 }
  0xaf   : > { %12886 = vmatpush3.msra.mxu0 %v2601_v57  ;;  %12896 = vmatprep.subr.mxu1 %v13883_v3 }
  0xb0   : > { %12887 = vmatprep.subr.mxu0 %v13883_v3  ;;  %12897 = vmatpush3.msra.mxu1 %v14444_v46  ;;  %v3571_v46 = vand.u32 4294901760, %v14701_v42 }
  0xb1   : > { %12888 = vmatpush3.msra.mxu0 %v2608_v58  ;;  %12898 = vmatprep.subr.mxu1 %v13883_v3 }
  0xb2   : > { %12889 = vmatprep.subr.mxu0 %v13883_v3  ;;  %12899 = vmatpush3.msra.mxu1 %v14453_v49  ;;  %v14737_v49 = vsub.f32 %v2456_v44, %v14719_v31  ;;  %v3572_v50 = vsub.f32 %v14701_v42, %v3571_v46  ;;  %v4435_v44 = vld [vmem:[%s453_s18] sm:$0xff]  ;;  %s11928_s18 = scalar_lea.hbm %s15992_s12, %s15994_s29 }
  0xb3   : > { %12890 = vmatpush3.msra.mxu0 %v2615_v61  ;;  %12900 = vmatprep.subr.mxu1 %v13883_v3  ;;  %v2462_v61 = vld [vmem:[%s16004_s4 + $0x70] sm:$0xff] }
  0xb4   : > { %12891 = vmatprep.subr.mxu0 %v13883_v3  ;;  %12901 = vmatpush3.msra.mxu1 %v14463_v52  ;;  %v3579_v52 = vsub.f32 %v14714_v45, %v3578_v48  ;;  %v3592_v53 = vand.u32 4294901760, %v14737_v49  ;;  %v3573_v54 = vand.u32 4294901760, %v3572_v50  ;;  %v14808_v1 = vand.u32 4294901760, %v2462_v61 }
  0xb5   : > { %12892 = vmatpush3.msra.mxu0 %v2622_v0  ;;  %12893 = vmatprep.mubr.msk.f32.mxu0 %vm13884_vm0, %v13883_v3  ;;  %v2461_v0 = vld [vmem:[%s16004_s4 + $0x68] sm:$0xff] }
  0xb6   : > { %12902 = vmatprep.subr.mxu1 %v13883_v3  ;;  %12894 = vmatmul.mubr.f32.vlgmr.msra.gmra.mxu0 %v14476_v55  ;;  %v3580_v57 = vand.u32 4294901760, %v3579_v52  ;;  %v3593_v26 = vsub.f32 %v14737_v49, %v3592_v53  ;;  %v14817_v4 = vand.u32 4294901760, %v2461_v0  ;;  %v14828_v6 = vsub.f32 %v2462_v61, %v14808_v1  ;;  %v4436_v52 = vld [vmem:[%s15985_s5] sm:$0xff] }
  0xb7   : > { %12903 = vmatpush3.msra.mxu1 %v14481_v56  ;;  %12904 = vmatprep.mubr.msk.f32.mxu1 %vm13884_vm0, %v13883_v3  ;;  %v3586_v56 = vsub.f32 %v14725_v47, %v3585_v51 }
  0xb8   : > { %12907 = vmatprep.subr.mxu0 %v13883_v3  ;;  %12905 = vmatmul.mubr.f32.vlgmr.msra.gmra.mxu1 %v14476_v55  ;;  %v3594_v28 = vand.u32 4294901760, %v3593_v26  ;;  %v14839_v9 = vsub.f32 %v2461_v0, %v14817_v4 }
  0xb9   : > { %12908 = vmatpush3.msra.mxu0 %v14571_v11  ;;  %12918 = vmatprep.subr.mxu1 %v13883_v3  ;;  %v3587_v58 = vand.u32 4294901760, %v3586_v56 }
  0xba   : > { %12909 = vmatprep.subr.mxu0 %v13883_v3  ;;  %12919 = vmatpush3.msra.mxu1 %v3088_v30 }
  0xbb   : > { %12910 = vmatpush3.msra.mxu0 %v14580_v13  ;;  %12920 = vmatprep.subr.mxu1 %v13883_v3 }
  0xbc   : > { %12911 = vmatprep.subr.mxu0 %v13883_v3  ;;  %12921 = vmatpush3.msra.mxu1 %v3095_v33 }
  0xbd   : > { %12912 = vmatpush3.msra.mxu0 %v14589_v15  ;;  %12922 = vmatprep.subr.mxu1 %v13883_v3 }
  0xbe   : > { %12913 = vmatprep.subr.mxu0 %v13883_v3  ;;  %12923 = vmatpush3.msra.mxu1 %v3102_v35 }
  0xbf   : > { %12914 = vmatpush3.msra.mxu0 %v14605_v18  ;;  %12915 = vmatprep.mubr.msk.f32.mxu0 %vm13884_vm0, %v13883_v3 }
  0xc0   : > { %12924 = vmatprep.subr.mxu1 %v13883_v3  ;;  %12916 = vmatmul.mubr.f32.vlgmr.msra.gmra.mxu0 %v14547_v22 }
  0xc1   : > { %12925 = vmatpush3.msra.mxu1 %v3109_v36  ;;  %12926 = vmatprep.mubr.msk.f32.mxu1 %vm13884_vm0, %v13883_v3 }
  0xc2   : > { %12929 = vmatprep.subr.mxu0 %v13883_v3  ;;  %12927 = vmatmul.mubr.f32.vlgmr.msra.gmra.mxu1 %v14476_v55 }
  0xc3   : > { %12930 = vmatpush3.msra.mxu0 %v14587_v14  ;;  %12940 = vmatprep.subr.mxu1 %v13883_v3  ;;  %v14854_v14 = vsub.f32 %v2460_v5, %v14833_v7 }
  0xc4   : > { %12931 = vmatprep.subr.mxu0 %v13883_v3  ;;  %12941 = vmatpush3.msra.mxu1 %v14571_v11 }
  0xc5   : > { %12932 = vmatpush3.msra.mxu0 %v14600_v17  ;;  %12942 = vmatprep.subr.mxu1 %v13883_v3  ;;  %v4070_v17 = vand.u32 4294901760, %v14839_v9 }
  0xc6   : > { %12933 = vmatprep.subr.mxu0 %v13883_v3  ;;  %12943 = vmatpush3.msra.mxu1 %v14580_v13 }
  0xc7   : > { %12934 = vmatpush3.msra.mxu0 %v14611_v20  ;;  %12944 = vmatprep.subr.mxu1 %v13883_v3 }
  0xc8   : > { %12935 = vmatprep.subr.mxu0 %v13883_v3  ;;  %12945 = vmatpush3.msra.mxu1 %v14589_v15 }
  0xc9   : > { %12936 = vmatpush3.msra.mxu0 %v14623_v23  ;;  %12937 = vmatprep.mubr.msk.f32.mxu0 %vm13884_vm0, %v13883_v3  ;;  %v4077_v23 = vand.u32 4294901760, %v14854_v14 }
  0xca   : > { %12946 = vmatprep.subr.mxu1 %v13883_v3  ;;  %12938 = vmatmul.mubr.f32.vlgmr.msra.gmra.mxu0 %v14496_v59 }
  0xcb   : > { %12947 = vmatpush3.msra.mxu1 %v14605_v18  ;;  %12948 = vmatprep.mubr.msk.f32.mxu1 %vm13884_vm0, %v13883_v3  ;;  %v4078_v30 = vsub.f32 %v14854_v14, %v4077_v23 }
  0xcc   : > { %12951 = vmatprep.subr.mxu0 %v13883_v3  ;;  %12949 = vmatmul.mubr.f32.vlgmr.msra.gmra.mxu1 %v14519_v63 }
  0xcd   : > { %12952 = vmatpush3.msra.mxu0 %v3086_v19  ;;  %12962 = vmatprep.subr.mxu1 %v13883_v3  ;;  %v4079_v38 = vand.u32 4294901760, %v4078_v30  ;;  %v4443_v30 = vld [vmem:[%s15985_s5 + $0x38] sm:$0xff] }
  0xce   : > { %12953 = vmatprep.subr.mxu0 %v13883_v3  ;;  %12963 = vmatpush3.msra.mxu1 %v14571_v11  ;;  %v4063_v11 = vand.u32 4294901760, %v14828_v6 }
  0xcf   : > { %12954 = vmatpush3.msra.mxu0 %v3093_v21  ;;  %12964 = vmatprep.subr.mxu1 %v13883_v3 }
  0xd0   : > { %12955 = vmatprep.subr.mxu0 %v13883_v3  ;;  %12965 = vmatpush3.msra.mxu1 %v14580_v13  ;;  %v4064_v21 = vsub.f32 %v14828_v6, %v4063_v11 }
  0xd1   : > { %12956 = vmatpush3.msra.mxu0 %v3100_v25  ;;  %12966 = vmatprep.subr.mxu1 %v13883_v3  ;;  %v4071_v25 = vsub.f32 %v14839_v9, %v4070_v17 }
  0xd2   : > { %12957 = vmatprep.subr.mxu0 %v13883_v3  ;;  %12967 = vmatpush3.msra.mxu1 %v14589_v15  ;;  %v4065_v27 = vand.u32 4294901760, %v4064_v21 }
  0xd3   : > { %12958 = vmatpush3.msra.mxu0 %v3107_v29  ;;  %12959 = vmatprep.mubr.msk.f32.mxu0 %vm13884_vm0, %v13883_v3  ;;  %v4072_v33 = vand.u32 4294901760, %v4071_v25 }
  0xd4   : > { %12968 = vmatprep.subr.mxu1 %v13883_v3  ;;  %12960 = vmatmul.mubr.f32.vlgmr.msra.gmra.mxu0 %v14476_v55 }
  0xd5   : > { %12969 = vmatpush3.msra.mxu1 %v14605_v18  ;;  %12970 = vmatprep.mubr.msk.f32.mxu1 %vm13884_vm0, %v13883_v3 }
  0xd6   : > { %12973 = vmatprep.subr.mxu0 %v13883_v3  ;;  %12971 = vmatmul.mubr.f32.vlgmr.msra.gmra.mxu1 %v14476_v55 }
  0xd7   : > { %12974 = vmatpush3.msra.mxu0 %v14685_v39  ;;  %12984 = vmatprep.subr.mxu1 %v13883_v3 }
  0xd8   : > { %12975 = vmatprep.subr.mxu0 %v13883_v3  ;;  %12985 = vmatpush3.msra.mxu1 %v3573_v54 }
  0xd9   : > { %12976 = vmatpush3.msra.mxu0 %v14694_v41  ;;  %12986 = vmatprep.subr.mxu1 %v13883_v3 }
  0xda   : > { %12977 = vmatprep.subr.mxu0 %v13883_v3  ;;  %12987 = vmatpush3.msra.mxu1 %v3580_v57 }
  0xdb   : > { %12978 = vmatpush3.msra.mxu0 %v14703_v43  ;;  %12988 = vmatprep.subr.mxu1 %v13883_v3 }
  0xdc   : > { %12979 = vmatprep.subr.mxu0 %v13883_v3  ;;  %12989 = vmatpush3.msra.mxu1 %v3587_v58 }
  0xdd   : > { %12980 = vmatpush3.msra.mxu0 %v14719_v31  ;;  %12981 = vmatprep.mubr.msk.f32.mxu0 %vm13884_vm0, %v13883_v3 }
  0xde   : > { %12990 = vmatprep.subr.mxu1 %v13883_v3  ;;  %12982 = vmatmul.mubr.f32.vlgmr.msra.gmra.mxu0 %v14547_v22 }
  0xdf   : > { %12991 = vmatpush3.msra.mxu1 %v3594_v28  ;;  %12992 = vmatprep.mubr.msk.f32.mxu1 %vm13884_vm0, %v13883_v3 }
  0xe0   : > { %12995 = vmatprep.subr.mxu0 %v13883_v3  ;;  %12993 = vmatmul.mubr.f32.vlgmr.msra.gmra.mxu1 %v14476_v55 }
  0xe1   : > { %12996 = vmatpush3.msra.mxu0 %v14701_v42  ;;  %13006 = vmatprep.subr.mxu1 %v13883_v3 }
  0xe2   : > { %12997 = vmatprep.subr.mxu0 %v13883_v3  ;;  %13007 = vmatpush3.msra.mxu1 %v14685_v39 }
  0xe3   : > { %12998 = vmatpush3.msra.mxu0 %v14714_v45  ;;  %13008 = vmatprep.subr.mxu1 %v13883_v3 }
  0xe4   : > { %12999 = vmatprep.subr.mxu0 %v13883_v3  ;;  %13009 = vmatpush3.msra.mxu1 %v14694_v41 }
  0xe5   : > { %13000 = vmatpush3.msra.mxu0 %v14725_v47  ;;  %13010 = vmatprep.subr.mxu1 %v13883_v3  ;;  %v4437_v47 = vld [vmem:[%s15985_s5 + $0x8] sm:$0xff] }
  0xe6   : > { %13001 = vmatprep.subr.mxu0 %v13883_v3  ;;  %13011 = vmatpush3.msra.mxu1 %v14703_v43 }
  0xe7   : > { %13002 = vmatpush3.msra.mxu0 %v14737_v49  ;;  %13003 = vmatprep.mubr.msk.f32.mxu0 %vm13884_vm0, %v13883_v3  ;;  %v4481_v49 = vsel %vm499_vm1, %v4435_v44, 0 }
  0xe8   : > { %13012 = vmatprep.subr.mxu1 %v13883_v3  ;;  %13004 = vmatmul.mubr.f32.vlgmr.msra.gmra.mxu0 %v14496_v59  ;;  %v14954_v54 = vand.u32 4294901760, %v4481_v49 }
  0xe9   : > { %13013 = vmatpush3.msra.mxu1 %v14719_v31  ;;  %13014 = vmatprep.mubr.msk.f32.mxu1 %vm13884_vm0, %v13883_v3 }
  0xea   : > { %13017 = vmatprep.subr.mxu0 %v13883_v3  ;;  %13015 = vmatmul.mubr.f32.vlgmr.msra.gmra.mxu1 %v14519_v63  ;;  %v14976_v61 = vsub.f32 %v4481_v49, %v14954_v54 }
  0xeb   : > { %13018 = vmatpush3.msra.mxu0 %v3571_v46  ;;  %13028 = vmatprep.subr.mxu1 %v13883_v3  ;;  %v578_v12 = vpop.f32.mrf.mxu0 }
  0xec   : > { %13019 = vmatprep.subr.mxu0 %v13883_v3  ;;  %13029 = vmatpush3.msra.mxu1 %v14685_v39  ;;  %v579_v15 = vadd.f32 %v12054_v10, %v578_v12 }
  0xed   : > { %v669_v13 = vpop.f32.mrf.mxu1  ;;  %13020 = vmatpush3.msra.mxu0 %v3578_v48  ;;  %13030 = vmatprep.subr.mxu1 %v13883_v3  ;;  %v12587_v18 = vpop.f32.mrf.mxu0 }
  0xee   : > { %13021 = vmatprep.subr.mxu0 %v13883_v3  ;;  %13031 = vmatpush3.msra.mxu1 %v14694_v41  ;;  %v670_v20 = vadd.f32 %v669_v13, %v579_v15 }
  0xef   : > { %v12598_v19 = vpop.f32.mrf.mxu1  ;;  %13022 = vmatpush3.msra.mxu0 %v3585_v51  ;;  %13032 = vmatprep.subr.mxu1 %v13883_v3  ;;  %v14944_v51 = vand.u32 4294901760, %v4437_v47 }
  0xf0   : > { %13023 = vmatprep.subr.mxu0 %v13883_v3  ;;  %13033 = vmatpush3.msra.mxu1 %v14703_v43  ;;  %v4438_v43 = vld [vmem:[%s15985_s5 + $0x10] sm:$0xff] }
  0xf1   : > { %13024 = vmatpush3.msra.mxu0 %v3592_v53  ;;  %13025 = vmatprep.mubr.msk.f32.mxu0 %vm13884_vm0, %v13883_v3  ;;  %v14933_v48 = vand.u32 4294901760, %v4438_v43  ;;  %v12055_v53 = vld [vmem:[%s15987_s7 + $0x1] ss:$0 sm:$0xff]  ;;  %v14970_v58 = vsub.f32 %v4437_v47, %v14944_v51 }
  0xf2   : > { %13034 = vmatprep.subr.mxu1 %v13883_v3  ;;  %13026 = vmatmul.mubr.f32.vlgmr.msra.gmra.mxu0 %v14476_v55 }
  0xf3   : > { %13035 = vmatpush3.msra.mxu1 %v14719_v31  ;;  %13036 = vmatprep.mubr.msk.f32.mxu1 %vm13884_vm0, %v13883_v3  ;;  %v14924_v31 = vand.u32 4294901760, %v4439_v40  ;;  %v14960_v56 = vsub.f32 %v4438_v43, %v14933_v48 }
  0xf4   : > { %13039 = vmatprep.subr.mxu0 %v13883_v3  ;;  %13037 = vmatmul.mubr.f32.vlgmr.msra.gmra.mxu1 %v14476_v55  ;;  %v749_v29 = vpop.f32.mrf.mxu0 }
  0xf5   : > { %13040 = vmatpush3.msra.mxu0 %v14799_v62  ;;  %13050 = vmatprep.subr.mxu1 %v13883_v3  ;;  %v750_v32 = vadd.f32 %v749_v29, %v670_v20  ;;  %v14942_v50 = vsub.f32 %v4439_v40, %v14924_v31 }
  0xf6   : > { %13041 = vmatprep.subr.mxu0 %v13883_v3  ;;  %13051 = vmatpush3.msra.mxu1 %v4058_v24  ;;  %v826_v34 = vpop.f32.mrf.mxu1  ;;  %v12609_v35 = vpop.f32.mrf.mxu0 }
  0xf7   : > { %13042 = vmatpush3.msra.mxu0 %v14808_v1  ;;  %13052 = vmatprep.subr.mxu1 %v13883_v3  ;;  %v827_v36 = vadd.f32 %v826_v34, %v750_v32  ;;  %v4589_v28 = vand.u32 4294901760, %v14942_v50  ;;  %v15063_v34 = vand.u32 4294901760, %v4443_v30  ;;  %v4441_v35 = vld [vmem:[%s15985_s5 + $0x28] sm:$0xff] }
  0xf8   : > { %13043 = vmatprep.subr.mxu0 %v13883_v3  ;;  %13053 = vmatpush3.msra.mxu1 %v4065_v27  ;;  %v12620_v37 = vpop.f32.mrf.mxu1 }
  0xf9   : > { %13044 = vmatpush3.msra.mxu0 %v14817_v4  ;;  %13054 = vmatprep.subr.mxu1 %v13883_v3  ;;  %v15087_v40 = vsub.f32 %v4443_v30, %v15063_v34 }
  0xfa   : > { %13045 = vmatprep.subr.mxu0 %v13883_v3  ;;  %13055 = vmatpush3.msra.mxu1 %v4072_v33  ;;  %v4442_v33 = vld [vmem:[%s15985_s5 + $0x30] sm:$0xff] }
  0xfb   : > { %13046 = vmatpush3.msra.mxu0 %v14833_v7  ;;  %13047 = vmatprep.mubr.msk.f32.mxu0 %vm13884_vm0, %v13883_v3  ;;  %v15076_v37 = vand.u32 4294901760, %v4442_v33 }
  0xfc   : > { %13056 = vmatprep.subr.mxu1 %v13883_v3  ;;  %13048 = vmatmul.mubr.f32.vlgmr.msra.gmra.mxu0 %v14547_v22 }
  0xfd   : > { %13057 = vmatpush3.msra.mxu1 %v4079_v38  ;;  %13058 = vmatprep.mubr.msk.f32.mxu1 %vm13884_vm0, %v13883_v3  ;;  %v4440_v38 = vld [vmem:[%s15985_s5 + $0x20] sm:$0xff]  ;;  %v15097_v44 = vsub.f32 %v4442_v33, %v15076_v37 }
  0xfe   : > { %13061 = vmatprep.subr.mxu0 %v13883_v3  ;;  %13059 = vmatmul.mubr.f32.vlgmr.msra.gmra.mxu1 %v14476_v55  ;;  %v909_v39 = vpop.f32.mrf.mxu0 }
  0xff   : > { %13062 = vmatpush3.msra.mxu0 %v14815_v2  ;;  %13072 = vmatprep.subr.mxu1 %v13883_v3  ;;  %v910_v22 = vadd.f32 %v909_v39, %v827_v36  ;;  %v4596_v2 = vand.u32 4294901760, %v14960_v56  ;;  %v12056_v36 = vld [vmem:[%s15987_s7 + $0x2] ss:$0 sm:$0xff] }
 0x100   : > { %13063 = vmatprep.subr.mxu0 %v13883_v3  ;;  %13073 = vmatpush3.msra.mxu1 %v14799_v62  ;;  %v984_v41 = vpop.f32.mrf.mxu1  ;;  %v12631_v42 = vpop.f32.mrf.mxu0 }
 0x101   : > { %13064 = vmatpush3.msra.mxu0 %v14828_v6  ;;  %13074 = vmatprep.subr.mxu1 %v13883_v3  ;;  %v14922_v45 = vadd.f32 %v984_v41, %v910_v22  ;;  %v4590_v6 = vsub.f32 %v14942_v50, %v4589_v28  ;;  %v15089_v22 = vand.u32 4294901760, %v4441_v35 }
 0x102   : > { %13065 = vmatprep.subr.mxu0 %v13883_v3  ;;  %13075 = vmatpush3.msra.mxu1 %v14808_v1  ;;  %v12642_v46 = vpop.f32.mrf.mxu1 }
 0x103   : > { %13066 = vmatpush3.msra.mxu0 %v14839_v9  ;;  %13076 = vmatprep.subr.mxu1 %v13883_v3  ;;  %v4597_v9 = vsub.f32 %v14960_v56, %v4596_v2  ;;  %v15099_v46 = vand.u32 4294901760, %v4440_v38 }
 0x104   : > { %13067 = vmatprep.subr.mxu0 %v13883_v3  ;;  %13077 = vmatpush3.msra.mxu1 %v14817_v4 }
 0x105   : > { %13068 = vmatpush3.msra.mxu0 %v14854_v14  ;;  %13069 = vmatprep.mubr.msk.f32.mxu0 %vm13884_vm0, %v13883_v3  ;;  %v4598_v14 = vand.u32 4294901760, %v4597_v9 }
 0x106   : > { %13078 = vmatprep.subr.mxu1 %v13883_v3  ;;  %13070 = vmatmul.mubr.f32.vlgmr.msra.gmra.mxu0 %v14496_v59  ;;  %v14964_v59 = vand.u32 4294901760, %v4436_v52 }
 0x107   : > { %13079 = vmatpush3.msra.mxu1 %v14833_v7  ;;  %13080 = vmatprep.mubr.msk.f32.mxu1 %vm13884_vm0, %v13883_v3 }
 0x108   : > { %13083 = vmatprep.subr.mxu0 %v13883_v3  ;;  %13081 = vmatmul.mubr.f32.vlgmr.msra.gmra.mxu1 %v14519_v63  ;;  %v1063_v57 = vpop.f32.mrf.mxu0 }
 0x109   : > { %13084 = vmatpush3.msra.mxu0 %v4056_v8  ;;  %13094 = vmatprep.subr.mxu1 %v13883_v3  ;;  %v1064_v26 = vadd.f32 %v12055_v53, %v1063_v57  ;;  %v4603_v8 = vand.u32 4294901760, %v14970_v58  ;;  %v15117_v53 = vsub.f32 %v4440_v38, %v15099_v46 }
 0x10a   : > { %13085 = vmatprep.subr.mxu0 %v13883_v3  ;;  %13095 = vmatpush3.msra.mxu1 %v14799_v62  ;;  %v1154_v60 = vpop.f32.mrf.mxu1  ;;  %v12653_v63 = vpop.f32.mrf.mxu0  ;;  %v14985_v62 = vsub.f32 %v4436_v52, %v14964_v59  ;;  %v5074_v52 = vand.u32 4294901760, %v15087_v40 }
 0x10b   : > { %13086 = vmatpush3.msra.mxu0 %v4063_v11  ;;  %13096 = vmatprep.subr.mxu1 %v13883_v3  ;;  %v1155_v0 = vadd.f32 %v1154_v60, %v1064_v26  ;;  %v4604_v11 = vsub.f32 %v14970_v58, %v4603_v8 }
 0x10c   : > { %13087 = vmatprep.subr.mxu0 %v13883_v3  ;;  %13097 = vmatpush3.msra.mxu1 %v14808_v1  ;;  %v12664_v5 = vpop.f32.mrf.mxu1  ;;  %v14997_v1 = vand.u32 4294901760, %v14976_v61  ;;  %v4610_v10 = vand.u32 4294901760, %v14985_v62  ;;  %v5075_v57 = vsub.f32 %v15087_v40, %v5074_v52 }
 0x10d   : > { %13088 = vmatpush3.msra.mxu0 %v4070_v17  ;;  %13098 = vmatprep.subr.mxu1 %v13883_v3  ;;  %v4605_v18 = vand.u32 4294901760, %v4604_v11 }
 0x10e   : > { %13089 = vmatprep.subr.mxu0 %v13883_v3  ;;  %13099 = vmatpush3.msra.mxu1 %v14817_v4  ;;  %v4591_v4 = vand.u32 4294901760, %v4590_v6  ;;  %v4555_v13 = vsub.f32 %v14976_v61, %v14997_v1  ;;  %v5076_v60 = vand.u32 4294901760, %v5075_v57 }
 0x10f   : > { %13090 = vmatpush3.msra.mxu0 %v4077_v23  ;;  %13091 = vmatprep.mubr.msk.f32.mxu0 %vm13884_vm0, %v13883_v3 }
 0x110   : > { %13100 = vmatprep.subr.mxu1 %v13883_v3  ;;  %13092 = vmatmul.mubr.f32.vlgmr.msra.gmra.mxu0 %v14476_v55  ;;  %v15029_v19 = vand.u32 4294901760, %v4555_v13  ;;  %v4447_v13 = vld [vmem:[%s15985_s5 + $0x58] sm:$0xff] }
 0x111   : > { %13101 = vmatpush3.msra.mxu1 %v14833_v7  ;;  %13102 = vmatprep.mubr.msk.f32.mxu1 %vm13884_vm0, %v13883_v3 }
 0x112   : > { %13103 = vmatmul.mubr.f32.vlgmr.msra.gmra.mxu1 %v14476_v55  ;;  %13105 = vmatprep.subr.mxu0 %v13883_v3  ;;  %v1234_v12 = vpop.f32.mrf.mxu0  ;;  %v4611_v55 = vsub.f32 %v14985_v62, %v4610_v10 }
 0x113   : > { %13106 = vmatpush3.msra.mxu0 %v14924_v31  ;;  %13113 = vmatprep.mubr.msk.f32.mxu0 %vm13884_vm0, %v13883_v3  ;;  %v1235_v7 = vadd.f32 %v1234_v12, %v1155_v0 }
 0x114   : > { %13107 = vmatprep.subr.mxu0 %v13883_v3  ;;  %13116 = vmatprep.subr.mxu1 %v13883_v3  ;;  %v1311_v15 = vpop.f32.mrf.mxu1  ;;  %v12675_v16 = vpop.f32.mrf.mxu0  ;;  %v4612_v21 = vand.u32 4294901760, %v4611_v55  ;;  %v12057_v55 = vld [vmem:[%s15987_s7 + $0x3] ss:$0 sm:$0xff] }
 0x115   : > { %13108 = vmatpush3.msra.mxu0 %v14933_v48  ;;  %13117 = vmatpush3.msra.mxu1 %v4591_v4  ;;  %v1312_v17 = vadd.f32 %v1311_v15, %v1235_v7  ;;  %v15182_v15 = vand.u32 4294901760, %v4447_v13  ;;  %v4445_v16 = vld [vmem:[%s15985_s5 + $0x48] sm:$0xff] }
 0x116   : > { %13109 = vmatprep.subr.mxu0 %v13883_v3  ;;  %13118 = vmatprep.subr.mxu1 %v13883_v3  ;;  %v12686_v20 = vpop.f32.mrf.mxu1 }
 0x117   : > { %13110 = vmatpush3.msra.mxu0 %v14944_v51  ;;  %13119 = vmatpush3.msra.mxu1 %v4598_v14  ;;  %v4446_v14 = vld [vmem:[%s15985_s5 + $0x50] sm:$0xff] }
 0x118   : > { %13111 = vmatprep.subr.mxu0 %v13883_v3  ;;  %13120 = vmatprep.subr.mxu1 %v13883_v3 }
 0x119   : > { %13112 = vmatpush3.msra.mxu0 %v14964_v59  ;;  %13121 = vmatpush3.msra.mxu1 %v4605_v18  ;;  %v4444_v18 = vld [vmem:[%s15985_s5 + $0x40] sm:$0xff] }
 0x11a   : > { %13127 = vmatprep.subr.mxu0 %v13883_v3  ;;  %13114 = vmatmul.mubr.f32.vlgmr.msra.gmra.mxu0 %v15029_v19 }
 0x11b   : > { %13128 = vmatpush3.msra.mxu0 %v14942_v50  ;;  %13122 = vmatprep.subr.mxu1 %v13883_v3  ;;  %v15109_v50 = vsub.f32 %v4441_v35, %v15089_v22 }
 0x11c   : > { %13129 = vmatprep.subr.mxu0 %v13883_v3  ;;  %13123 = vmatpush3.msra.mxu1 %v4612_v21  ;;  %v1394_v23 = vpop.f32.mrf.mxu0  ;;  %v15206_v21 = vsub.f32 %v4447_v13, %v15182_v15 }
 0x11d   : > { %13130 = vmatpush3.msra.mxu0 %v14960_v56  ;;  %13124 = vmatprep.mubr.msk.f32.mxu1 %vm13884_vm0, %v13883_v3  ;;  %v1395_v24 = vadd.f32 %v1394_v23, %v1312_v17  ;;  %v5081_v56 = vand.u32 4294901760, %v15097_v44  ;;  %v5088_v26 = vand.u32 4294901760, %v15109_v50  ;;  %v15195_v17 = vand.u32 4294901760, %v4446_v14 }
 0x11e   : > { %13131 = vmatprep.subr.mxu0 %v13883_v3  ;;  %13135 = vmatprep.mubr.msk.f32.mxu0 %vm13884_vm0, %v13883_v3  ;;  %v1469_v25 = vpop.f32.mrf.mxu1  ;;  %v12697_v27 = vpop.f32.mrf.mxu0  ;;  %v15208_v23 = vand.u32 4294901760, %v4445_v16  ;;  %v5559_v38 = vand.u32 4294901760, %v15206_v21 }
 0x11f   : > { %13132 = vmatpush3.msra.mxu0 %v14970_v58  ;;  %13138 = vmatprep.subr.mxu1 %v13883_v3  ;;  %v15049_v29 = vadd.f32 %v1469_v25, %v1395_v24  ;;  %v5082_v58 = vsub.f32 %v15097_v44, %v5081_v56  ;;  %v15216_v30 = vsub.f32 %v4446_v14, %v15195_v17 }
 0x120   : > { %13133 = vmatprep.subr.mxu0 %v13883_v3  ;;  %13125 = vmatmul.mubr.f32.vlgmr.msra.gmra.mxu1 %v14954_v54  ;;  %v12708_v32 = vpop.f32.mrf.mxu1 }
 0x121   : > { %13134 = vmatpush3.msra.mxu0 %v14985_v62  ;;  %13139 = vmatpush3.msra.mxu1 %v14924_v31  ;;  %v5083_v5 = vand.u32 4294901760, %v5082_v58  ;;  %v15218_v32 = vand.u32 4294901760, %v4444_v18 }
 0x122   : > { %13149 = vmatprep.subr.mxu0 %v13883_v3  ;;  %13136 = vmatmul.mubr.f32.vlgmr.msra.gmra.mxu0 %v14976_v61 }
 0x123   : > { %13150 = vmatpush3.msra.mxu0 %v4589_v28  ;;  %13140 = vmatprep.subr.mxu1 %v13883_v3 }
 0x124   : > { %13151 = vmatprep.subr.mxu0 %v13883_v3  ;;  %13141 = vmatpush3.msra.mxu1 %v14933_v48 }
 0x125   : > { %13152 = vmatpush3.msra.mxu0 %v4596_v2  ;;  %13142 = vmatprep.subr.mxu1 %v13883_v3 }
 0x126   : > { %13153 = vmatprep.subr.mxu0 %v13883_v3  ;;  %13143 = vmatpush3.msra.mxu1 %v14944_v51  ;;  %v1548_v39 = vpop.f32.mrf.mxu0 }
 0x127   : > { %13154 = vmatpush3.msra.mxu0 %v4603_v8  ;;  %13144 = vmatprep.subr.mxu1 %v13883_v3  ;;  %v1549_v41 = vadd.f32 %v12056_v36, %v1548_v39  ;;  %v15228_v36 = vsub.f32 %v4445_v16, %v15208_v23  ;;  %v15236_v39 = vsub.f32 %v4444_v18, %v15218_v32 }
 0x128   : > { %13155 = vmatprep.subr.mxu0 %v13883_v3  ;;  %13145 = vmatpush3.msra.mxu1 %v14964_v59  ;;  %v1639_v42 = vpop.f32.mrf.mxu1  ;;  %v12719_v43 = vpop.f32.mrf.mxu0 }
 0x129   : > { %13156 = vmatpush3.msra.mxu0 %v4610_v10  ;;  %13146 = vmatprep.mubr.msk.f32.mxu1 %vm13884_vm0, %v13883_v3  ;;  %v1640_v47 = vadd.f32 %v1639_v42, %v1549_v41  ;;  %v5560_v41 = vsub.f32 %v15206_v21, %v5559_v38  ;;  %v5573_v42 = vand.u32 4294901760, %v15228_v36 }
 0x12a   : > { %13157 = vmatprep.mubr.msk.f32.mxu0 %vm13884_vm0, %v13883_v3  ;;  %13160 = vmatprep.subr.mxu1 %v13883_v3  ;;  %v12730_v49 = vpop.f32.mrf.mxu1 }
 0x12b   : > { %13171 = vmatprep.subr.mxu0 %v13883_v3  ;;  %13147 = vmatmul.mubr.f32.vlgmr.msra.gmra.mxu1 %v14997_v1 }
 0x12c   : > { %13158 = vmatmul.mubr.f32.vlgmr.msra.gmra.mxu0 %v14954_v54  ;;  %13161 = vmatpush3.msra.mxu1 %v14924_v31 }
 0x12d   : > { %13172 = vmatpush3.msra.mxu0 %v15063_v34  ;;  %13162 = vmatprep.subr.mxu1 %v13883_v3 }
 0x12e   : > { %13173 = vmatprep.subr.mxu0 %v13883_v3  ;;  %13163 = vmatpush3.msra.mxu1 %v14933_v48  ;;  %v5095_v48 = vand.u32 4294901760, %v15117_v53 }
 0x12f   : > { %13174 = vmatpush3.msra.mxu0 %v15076_v37  ;;  %13164 = vmatprep.subr.mxu1 %v13883_v3 }
 0x130   : > { %13175 = vmatprep.subr.mxu0 %v13883_v3  ;;  %13165 = vmatpush3.msra.mxu1 %v14944_v51  ;;  %v1719_v31 = vpop.f32.mrf.mxu0  ;;  %v5089_v51 = vsub.f32 %v15109_v50, %v5088_v26  ;;  %v5096_v62 = vsub.f32 %v15117_v53, %v5095_v48 }
 0x131   : > { %13176 = vmatpush3.msra.mxu0 %v15089_v22  ;;  %13166 = vmatprep.subr.mxu1 %v13883_v3  ;;  %v1720_v28 = vadd.f32 %v1719_v31, %v1640_v47  ;;  %v5561_v47 = vand.u32 4294901760, %v5560_v41 }
 0x132   : > { %13177 = vmatprep.subr.mxu0 %v13883_v3  ;;  %13167 = vmatpush3.msra.mxu1 %v14964_v59  ;;  %v1796_v63 = vpop.f32.mrf.mxu1  ;;  %v12741_v0 = vpop.f32.mrf.mxu0  ;;  %v5090_v6 = vand.u32 4294901760, %v5089_v51  ;;  %v5097_v8 = vand.u32 4294901760, %v5096_v62  ;;  %v4450_v51 = vld [vmem:[%s15985_s5 + $0x70] sm:$0xff]  ;;  %v4448_v62 = vld [vmem:[%s15985_s5 + $0x60] sm:$0xff] }
 0x133   : > { %13178 = vmatpush3.msra.mxu0 %v15099_v46  ;;  %13168 = vmatprep.mubr.msk.f32.mxu1 %vm13884_vm0, %v13883_v3  ;;  %v1797_v2 = vadd.f32 %v1796_v63, %v1720_v28  ;;  %v4451_v63 = vld [vmem:[%s15985_s5 + $0x78] sm:$0xff]  ;;  %v15334_v13 = vand.u32 4294901760, %v4448_v62 }
 0x134   : > { %13179 = vmatprep.mubr.msk.f32.mxu0 %vm13884_vm0, %v13883_v3  ;;  %13182 = vmatprep.subr.mxu1 %v13883_v3  ;;  %v12752_v59 = vpop.f32.mrf.mxu1 }
 0x135   : > { %13193 = vmatprep.subr.mxu0 %v13883_v3  ;;  %13169 = vmatmul.mubr.f32.vlgmr.msra.gmra.mxu1 %v14954_v54  ;;  %v15311_v59 = vand.u32 4294901760, %v4450_v51  ;;  %v15355_v18 = vsub.f32 %v4448_v62, %v15334_v13 }
 0x136   : > { %13180 = vmatmul.mubr.f32.vlgmr.msra.gmra.mxu0 %v15029_v19  ;;  %13183 = vmatpush3.msra.mxu1 %v5076_v60 }
 0x137   : > { %13194 = vmatpush3.msra.mxu0 %v15087_v40  ;;  %13184 = vmatprep.subr.mxu1 %v13883_v3  ;;  %v5566_v40 = vand.u32 4294901760, %v15216_v30 }
 0x138   : > { %13195 = vmatprep.subr.mxu0 %v13883_v3  ;;  %13185 = vmatpush3.msra.mxu1 %v5083_v5  ;;  %v4449_v5 = vld [vmem:[%s15985_s5 + $0x68] sm:$0xff] }
 0x139   : > { %13196 = vmatpush3.msra.mxu0 %v15097_v44  ;;  %13186 = vmatprep.subr.mxu1 %v13883_v3  ;;  %v5567_v43 = vsub.f32 %v15216_v30, %v5566_v40 }
 0x13a   : > { %13197 = vmatprep.subr.mxu0 %v13883_v3  ;;  %13187 = vmatpush3.msra.mxu1 %v5090_v6  ;;  %v1879_v9 = vpop.f32.mrf.mxu0 }
 0x13b   : > { %13198 = vmatpush3.msra.mxu0 %v15109_v50  ;;  %13188 = vmatprep.subr.mxu1 %v13883_v3  ;;  %v1880_v10 = vadd.f32 %v1879_v9, %v1797_v2  ;;  %v15301_v2 = vand.u32 4294901760, %v4451_v63  ;;  %v15324_v9 = vand.u32 4294901760, %v4449_v5 }
 0x13c   : > { %13199 = vmatprep.subr.mxu0 %v13883_v3  ;;  %13189 = vmatpush3.msra.mxu1 %v5097_v8  ;;  %v1954_v4 = vpop.f32.mrf.mxu1  ;;  %v12763_v11 = vpop.f32.mrf.mxu0 }
 0x13d   : > { %13200 = vmatpush3.msra.mxu0 %v15117_v53  ;;  %13190 = vmatprep.mubr.msk.f32.mxu1 %vm13884_vm0, %v13883_v3  ;;  %v15167_v12 = vadd.f32 %v1954_v4, %v1880_v10  ;;  %v5568_v53 = vand.u32 4294901760, %v5567_v43  ;;  %v15322_v8 = vsub.f32 %v4451_v63, %v15301_v2  ;;  %v15332_v11 = vsub.f32 %v4450_v51, %v15311_v59 }
 0x13e   : > { %13201 = vmatprep.mubr.msk.f32.mxu0 %vm13884_vm0, %v13883_v3  ;;  %13204 = vmatprep.subr.mxu1 %v13883_v3  ;;  %v12774_v7 = vpop.f32.mrf.mxu1  ;;  %v15344_v14 = vsub.f32 %v4449_v5, %v15324_v9  ;;  %v2444_v63 = vmul.f32 0.35355338, %v15049_v29 }
 0x13f   : > { %13215 = vmatprep.subr.mxu0 %v13883_v3  ;;  %13191 = vmatmul.mubr.f32.vlgmr.msra.gmra.mxu1 %v14954_v54  ;;  %v6044_v16 = vand.u32 4294901760, %v15322_v8 }
 0x140   : > { %13202 = vmatmul.mubr.f32.vlgmr.msra.gmra.mxu0 %v14976_v61  ;;  %13205 = vmatpush3.msra.mxu1 %v15063_v34  ;;  %v6877_v62 = vsel %vm6423_vm2, %v2444_v63, 0 }
 0x141   : > { %13216 = vmatpush3.msra.mxu0 %v5074_v52  ;;  %13206 = vmatprep.subr.mxu1 %v13883_v3 }
 0x142   : > { %13217 = vmatprep.subr.mxu0 %v13883_v3  ;;  %13207 = vmatpush3.msra.mxu1 %v15076_v37 }
 0x143   : > { %13218 = vmatpush3.msra.mxu0 %v5081_v56  ;;  %13208 = vmatprep.subr.mxu1 %v13883_v3 }
 0x144   : > { %13219 = vmatprep.subr.mxu0 %v13883_v3  ;;  %13209 = vmatpush3.msra.mxu1 %v15089_v22  ;;  %v2033_v20 = vpop.f32.mrf.mxu0 }
 0x145   : > { %13220 = vmatpush3.msra.mxu0 %v5088_v26  ;;  %13210 = vmatprep.subr.mxu1 %v13883_v3  ;;  %v2034_v24 = vadd.f32 %v12057_v55, %v2033_v20  ;;  %v12058_v55 = vld [vmem:[%s15988_s8] ss:$0 sm:$0xff]  ;;  %v6051_v20 = vand.u32 4294901760, %v15332_v11 }
 0x146   : > { %13221 = vmatprep.subr.mxu0 %v13883_v3  ;;  %13211 = vmatpush3.msra.mxu1 %v15099_v46  ;;  %v2124_v25 = vpop.f32.mrf.mxu1  ;;  %v12785_v27 = vpop.f32.mrf.mxu0 }
 0x147   : > { %13222 = vmatpush3.msra.mxu0 %v5095_v48  ;;  %13212 = vmatprep.mubr.msk.f32.mxu1 %vm13884_vm0, %v13883_v3  ;;  %v2125_v33 = vadd.f32 %v2124_v25, %v2034_v24  ;;  %v6058_v24 = vand.u32 4294901760, %v15344_v14  ;;  %v6065_v27 = vand.u32 4294901760, %v15355_v18 }
 0x148   : > { %13223 = vmatprep.mubr.msk.f32.mxu0 %vm13884_vm0, %v13883_v3  ;;  %13226 = vmatprep.subr.mxu1 %v13883_v3  ;;  %v12796_v35 = vpop.f32.mrf.mxu1 }
 0x149   : > { %13237 = vmatprep.subr.mxu0 %v13883_v3  ;;  %13213 = vmatmul.mubr.f32.vlgmr.msra.gmra.mxu1 %v14997_v1 }
 0x14a   : > { %13224 = vmatmul.mubr.f32.vlgmr.msra.gmra.mxu0 %v14954_v54  ;;  %13227 = vmatpush3.msra.mxu1 %v15063_v34 }
 0x14b   : > { %13238 = vmatpush3.msra.mxu0 %v15182_v15  ;;  %13228 = vmatprep.subr.mxu1 %v13883_v3 }
 0x14c   : > { %13239 = vmatprep.subr.mxu0 %v13883_v3  ;;  %13229 = vmatpush3.msra.mxu1 %v15076_v37  ;;  %v5580_v37 = vand.u32 4294901760, %v15236_v39 }
 0x14d   : > { %13240 = vmatpush3.msra.mxu0 %v15195_v17  ;;  %13230 = vmatprep.subr.mxu1 %v13883_v3 }
 0x14e   : > { %13241 = vmatprep.subr.mxu0 %v13883_v3  ;;  %13231 = vmatpush3.msra.mxu1 %v15089_v22  ;;  %v2204_v34 = vpop.f32.mrf.mxu0  ;;  %v5574_v22 = vsub.f32 %v15228_v36, %v5573_v42  ;;  %v5581_v56 = vsub.f32 %v15236_v39, %v5580_v37 }
 0x14f   : > { %13242 = vmatpush3.msra.mxu0 %v15208_v23  ;;  %13232 = vmatprep.subr.mxu1 %v13883_v3  ;;  %v2205_v44 = vadd.f32 %v2204_v34, %v2125_v33 }
 0x150   : > { %13243 = vmatprep.subr.mxu0 %v13883_v3  ;;  %13233 = vmatpush3.msra.mxu1 %v15099_v46  ;;  %v2281_v49 = vpop.f32.mrf.mxu1  ;;  %v12807_v50 = vpop.f32.mrf.mxu0  ;;  %v5575_v57 = vand.u32 4294901760, %v5574_v22  ;;  %v5582_v26 = vand.u32 4294901760, %v5581_v56 }
 0x151   : > { %13244 = vmatpush3.msra.mxu0 %v15218_v32  ;;  %13234 = vmatprep.mubr.msk.f32.mxu1 %vm13884_vm0, %v13883_v3  ;;  %v2282_v52 = vadd.f32 %v2281_v49, %v2205_v44 }
 0x152   : > { %13245 = vmatprep.mubr.msk.f32.mxu0 %vm13884_vm0, %v13883_v3  ;;  %13248 = vmatprep.subr.mxu1 %v13883_v3  ;;  %v12818_v46 = vpop.f32.mrf.mxu1 }
 0x153   : > { %13259 = vmatprep.subr.mxu0 %v13883_v3  ;;  %13235 = vmatmul.mubr.f32.vlgmr.msra.gmra.mxu1 %v14954_v54 }
 0x154   : > { %13246 = vmatmul.mubr.f32.vlgmr.msra.gmra.mxu0 %v15029_v19  ;;  %13249 = vmatpush3.msra.mxu1 %v5561_v47 }
 0x155   : > { %13260 = vmatpush3.msra.mxu0 %v15206_v21  ;;  %13250 = vmatprep.subr.mxu1 %v13883_v3  ;;  %v6045_v21 = vsub.f32 %v15322_v8, %v6044_v16 }
 0x156   : > { %13261 = vmatprep.subr.mxu0 %v13883_v3  ;;  %13251 = vmatpush3.msra.mxu1 %v5568_v53 }
 0x157   : > { %13262 = vmatpush3.msra.mxu0 %v15216_v30  ;;  %13252 = vmatprep.subr.mxu1 %v13883_v3  ;;  %v6046_v30 = vand.u32 4294901760, %v6045_v21 }
 0x158   : > { %13263 = vmatprep.subr.mxu0 %v13883_v3  ;;  %13253 = vmatpush3.msra.mxu1 %v5575_v57  ;;  %v2364_v31 = vpop.f32.mrf.mxu0 }
 0x159   : > { %13264 = vmatpush3.msra.mxu0 %v15228_v36  ;;  %13254 = vmatprep.subr.mxu1 %v13883_v3  ;;  %v2365_v58 = vadd.f32 %v2364_v31, %v2282_v52 }
 0x15a   : > { %13265 = vmatprep.subr.mxu0 %v13883_v3  ;;  %13255 = vmatpush3.msra.mxu1 %v5582_v26  ;;  %v2439_v48 = vpop.f32.mrf.mxu1  ;;  %v12829_v28 = vpop.f32.mrf.mxu0 }
 0x15b   : > { %13266 = vmatpush3.msra.mxu0 %v15236_v39  ;;  %13256 = vmatprep.mubr.msk.f32.mxu1 %vm13884_vm0, %v13883_v3  ;;  %v15286_v60 = vadd.f32 %v2439_v48, %v2365_v58 }
 0x15c   : > { %13267 = vmatprep.mubr.msk.f32.mxu0 %vm13884_vm0, %v13883_v3  ;;  %13270 = vmatprep.subr.mxu1 %v13883_v3  ;;  %v12840_v0 = vpop.f32.mrf.mxu1 }
 0x15d   : > { %13281 = vmatprep.subr.mxu0 %v13883_v3  ;;  %13257 = vmatmul.mubr.f32.vlgmr.msra.gmra.mxu1 %v14954_v54  ;;  %v12059_v0 = vld [vmem:[%s15988_s8 + $0x1] ss:$0 sm:$0xff] }
 0x15e   : > { %13268 = vmatmul.mubr.f32.vlgmr.msra.gmra.mxu0 %v14976_v61  ;;  %13271 = vmatpush3.msra.mxu1 %v15182_v15 }
 0x15f   : > { %13282 = vmatpush3.msra.mxu0 %v5559_v38  ;;  %13272 = vmatprep.subr.mxu1 %v13883_v3  ;;  %v2443_v38 = vmul.f32 0.35355338, %v14922_v45 }
 0x160   : > { %13283 = vmatprep.subr.mxu0 %v13883_v3  ;;  %13273 = vmatpush3.msra.mxu1 %v15195_v17 }
 0x161   : > { %13284 = vmatpush3.msra.mxu0 %v5566_v40  ;;  %13274 = vmatprep.subr.mxu1 %v13883_v3  ;;  %v6066_v40 = vsub.f32 %v15355_v18, %v6065_v27 }
 0x162   : > { %13285 = vmatprep.subr.mxu0 %v13883_v3  ;;  %13275 = vmatpush3.msra.mxu1 %v15208_v23  ;;  %v2570_v6 = vpop.f32.mrf.mxu0 }
 0x163   : > { %13286 = vmatpush3.msra.mxu0 %v5573_v42  ;;  %13276 = vmatprep.subr.mxu1 %v13883_v3  ;;  %v6425_v42 = vsel %vm6423_vm2, %v2443_v38, 0  ;;  %v6067_v34 = vand.u32 4294901760, %v6066_v40 }
 0x164   : > { %13287 = vmatprep.subr.mxu0 %v13883_v3  ;;  %13277 = vmatpush3.msra.mxu1 %v15218_v32  ;;  %v2661_v10 = vpop.f32.mrf.mxu1  ;;  %v12851_v4 = vpop.f32.mrf.mxu0 }
 0x165   : > { %13288 = vmatpush3.msra.mxu0 %v5580_v37  ;;  %13278 = vmatprep.mubr.msk.f32.mxu1 %vm13884_vm0, %v13883_v3  ;;  %v15401_v37 = vand.u32 4294901760, %v6425_v42 }
 0x166   : > { %13289 = vmatprep.mubr.msk.f32.mxu0 %vm13884_vm0, %v13883_v3  ;;  %13292 = vmatprep.subr.mxu1 %v13883_v3  ;;  %v12862_v7 = vpop.f32.mrf.mxu1 }
 0x167   : > { %13303 = vmatprep.subr.mxu0 %v13883_v3  ;;  %13279 = vmatmul.mubr.f32.vlgmr.msra.gmra.mxu1 %v14997_v1  ;;  %v15413_v52 = vsub.f32 %v6425_v42, %v15401_v37 }
 0x168   : > { %13290 = vmatmul.mubr.f32.vlgmr.msra.gmra.mxu0 %v14954_v54  ;;  %13293 = vmatpush3.msra.mxu1 %v15182_v15  ;;  %v2571_v15 = vadd.f32 %v12058_v55, %v2570_v6 }
 0x169   : > { %13304 = vmatpush3.msra.mxu0 %v15301_v2  ;;  %13294 = vmatprep.subr.mxu1 %v13883_v3  ;;  %v6498_v56 = vand.u32 4294901760, %v15413_v52 }
 0x16a   : > { %13305 = vmatprep.subr.mxu0 %v13883_v3  ;;  %13295 = vmatpush3.msra.mxu1 %v15195_v17  ;;  %v6052_v17 = vsub.f32 %v15332_v11, %v6051_v20  ;;  %v2662_v36 = vadd.f32 %v2661_v10, %v2571_v15 }
 0x16b   : > { %13306 = vmatpush3.msra.mxu0 %v15311_v59  ;;  %13296 = vmatprep.subr.mxu1 %v13883_v3  ;;  %v6499_v48 = vsub.f32 %v15413_v52, %v6498_v56 }
 0x16c   : > { %13307 = vmatprep.subr.mxu0 %v13883_v3  ;;  %13297 = vmatpush3.msra.mxu1 %v15208_v23  ;;  %v2741_v25 = vpop.f32.mrf.mxu0  ;;  %v6059_v23 = vsub.f32 %v15344_v14, %v6058_v24 }
 0x16d   : > { %13308 = vmatpush3.msra.mxu0 %v15324_v9  ;;  %13298 = vmatprep.subr.mxu1 %v13883_v3  ;;  %v2742_v41 = vadd.f32 %v2741_v25, %v2662_v36  ;;  %v6500_v51 = vand.u32 4294901760, %v6499_v48 }
 0x16e   : > { %13309 = vmatprep.subr.mxu0 %v13883_v3  ;;  %13299 = vmatpush3.msra.mxu1 %v15218_v32  ;;  %v2818_v33 = vpop.f32.mrf.mxu1  ;;  %v12873_v35 = vpop.f32.mrf.mxu0  ;;  %v6053_v32 = vand.u32 4294901760, %v6052_v17  ;;  %v6060_v45 = vand.u32 4294901760, %v6059_v23 }
 0x16f   : > { %13310 = vmatpush3.msra.mxu0 %v15334_v13  ;;  %13300 = vmatprep.mubr.msk.f32.mxu1 %vm13884_vm0, %v13883_v3  ;;  %v2819_v43 = vadd.f32 %v2818_v33, %v2742_v41 }
 0x170   : > { %13311 = vmatprep.mubr.msk.f32.mxu0 %vm13884_vm0, %v13883_v3  ;;  %13314 = vmatprep.subr.mxu1 %v13883_v3  ;;  %v12884_v39 = vpop.f32.mrf.mxu1 }
 0x171   : > { %13325 = vmatprep.subr.mxu0 %v13883_v3  ;;  %13301 = vmatmul.mubr.f32.vlgmr.msra.gmra.mxu1 %v14954_v54  ;;  %v12060_v39 = vld [vmem:[%s15988_s8 + $0x2] ss:$0 sm:$0xff] }
 0x172   : > { %13312 = vmatmul.mubr.f32.vlgmr.msra.gmra.mxu0 %v15029_v19  ;;  %13315 = vmatpush3.msra.mxu1 %v6046_v30 }
 0x173   : > { %13326 = vmatpush3.msra.mxu0 %v15322_v8  ;;  %13316 = vmatprep.subr.mxu1 %v13883_v3  ;;  %v15471_v8 = vand.u32 4294901760, %v6877_v62 }
 0x174   : > { %13327 = vmatprep.subr.mxu0 %v13883_v3  ;;  %13317 = vmatpush3.msra.mxu1 %v6053_v32  ;;  %v2445_v32 = vmul.f32 0.35355338, %v15167_v12 }
 0x175   : > { %13328 = vmatpush3.msra.mxu0 %v15332_v11  ;;  %13318 = vmatprep.subr.mxu1 %v13883_v3  ;;  %v15481_v11 = vsub.f32 %v6877_v62, %v15471_v8  ;;  %v2446_v62 = vmul.f32 0.35355338, %v15286_v60 }
 0x176   : > { %13329 = vmatprep.subr.mxu0 %v13883_v3  ;;  %13319 = vmatpush3.msra.mxu1 %v6060_v45  ;;  %v2901_v19 = vpop.f32.mrf.mxu0  ;;  %v7329_v12 = vsel %vm6423_vm2, %v2445_v32, 0 }
 0x177   : > { %13330 = vmatpush3.msra.mxu0 %v15344_v14  ;;  %13320 = vmatprep.subr.mxu1 %v13883_v3  ;;  %v2902_v44 = vadd.f32 %v2901_v19, %v2819_v43  ;;  %v6950_v7 = vand.u32 4294901760, %v15481_v11  ;;  %v7781_v60 = vsel %vm6423_vm2, %v2446_v62, 0 }
 0x178   : > { %13331 = vmatprep.subr.mxu0 %v13883_v3  ;;  %13321 = vmatpush3.msra.mxu1 %v6067_v34  ;;  %v2976_v47 = vpop.f32.mrf.mxu1  ;;  %v12895_v49 = vpop.f32.mrf.mxu0  ;;  %v15528_v34 = vand.u32 4294901760, %v7329_v12 }
 0x179   : > { %13332 = vmatpush3.msra.mxu0 %v15355_v18  ;;  %13322 = vmatprep.mubr.msk.f32.mxu1 %vm13884_vm0, %v13883_v3  ;;  %v2977_v50 = vadd.f32 %v2976_v47, %v2902_v44 }
 0x17a   : > { %13333 = vmatprep.mubr.msk.f32.mxu0 %vm13884_vm0, %v13883_v3  ;;  %13336 = vmatprep.subr.mxu1 %v13883_v3  ;;  %v12906_v22 = vpop.f32.mrf.mxu1  ;;  %v7401_v44 = vsub.f32 %v7329_v12, %v15528_v34 }
 0x17b   : > { %13347 = vmatprep.subr.mxu0 %v13883_v3  ;;  %13323 = vmatmul.mubr.f32.vlgmr.msra.gmra.mxu1 %v14954_v54  ;;  %v6428_v53 = vsel %vm6423_vm2, %v2977_v50, 0 }
 0x17c   : > { %13334 = vmatmul.mubr.f32.vlgmr.msra.gmra.mxu0 %v14976_v61  ;;  %13337 = vmatpush3.msra.mxu1 %v15301_v2  ;;  %v15420_v46 = vand.u32 4294901760, %v6428_v53  ;;  %v7402_v50 = vand.u32 4294901760, %v7401_v44 }
 0x17d   : > { %13348 = vmatpush3.msra.mxu0 %v6044_v16  ;;  %13338 = vmatprep.subr.mxu1 %v13883_v3 }
 0x17e   : > { %13349 = vmatprep.subr.mxu0 %v13883_v3  ;;  %13339 = vmatpush3.msra.mxu1 %v15311_v59  ;;  %v6538_v57 = vsub.f32 %v6428_v53, %v15420_v46 }
 0x17f   : > { %13350 = vmatpush3.msra.mxu0 %v6051_v20  ;;  %13340 = vmatprep.subr.mxu1 %v13883_v3 }
 0x180   : > { %13351 = vmatprep.subr.mxu0 %v13883_v3  ;;  %13341 = vmatpush3.msra.mxu1 %v15324_v9  ;;  %v3055_v61 = vpop.f32.mrf.mxu0  ;;  %v6539_v58 = vand.u32 4294901760, %v6538_v57 }
 0x181   : > { %13352 = vmatpush3.msra.mxu0 %v6058_v24  ;;  %13342 = vmatprep.subr.mxu1 %v13883_v3  ;;  %v3056_v29 = vadd.f32 %v12059_v0, %v3055_v61  ;;  %v6951_v24 = vsub.f32 %v15481_v11, %v6950_v7  ;;  %v7403_v61 = vsub.f32 %v7401_v44, %v7402_v50 }
 0x182   : > { %13353 = vmatprep.subr.mxu0 %v13883_v3  ;;  %13343 = vmatpush3.msra.mxu1 %v15334_v13  ;;  %v3146_v26 = vpop.f32.mrf.mxu1  ;;  %v12917_v31 = vpop.f32.mrf.mxu0  ;;  %v6540_v5 = vsub.f32 %v6538_v57, %v6539_v58 }
 0x183   : > { %13354 = vmatpush3.msra.mxu0 %v6065_v27  ;;  %13355 = vmatprep.mubr.msk.f32.mxu0 %vm13884_vm0, %v13883_v3  ;;  %v3147_v10 = vadd.f32 %v3146_v26, %v3056_v29  ;;  %v6952_v17 = vand.u32 4294901760, %v6951_v24 }
 0x184   : > { %13344 = vmatprep.mubr.msk.f32.mxu1 %vm13884_vm0, %v13883_v3  ;;  %13356 = vmatmul.mubr.f32.vlgmr.msra.gmra.mxu0 %v14954_v54  ;;  %v12928_v28 = vpop.f32.mrf.mxu1 }
 0x185   : > { %13358 = vmatprep.subr.mxu1 %v13883_v3  ;;  %13369 = vmatprep.subr.mxu0 %v13883_v3 }
 0x186   : > { %13345 = vmatmul.mubr.f32.vlgmr.msra.gmra.mxu1 %v14997_v1  ;;  %13370 = vmatpush3.xpose.msra.mxu0 %v15420_v46 }
 0x187   : > { %13359 = vmatpush3.msra.mxu1 %v15301_v2  ;;  %13371 = vmatprep.mubr.msk.f32.mxu0 %vm13884_vm0, %v13883_v3  ;;  %v6541_v2 = vand.u32 4294901760, %v6540_v5 }
 0x188   : > { %13360 = vmatprep.subr.mxu1 %v13883_v3  ;;  %13379 = vmatprep.subr.mxu0 %v13883_v3 }
 0x189   : > { %13361 = vmatpush3.msra.mxu1 %v15311_v59  ;;  %13372 = vmatmul.mubr.f32.vlgmr.msra.gmra.mxu0 %v6500_v51 }
 0x18a   : > { %13362 = vmatprep.subr.mxu1 %v13883_v3  ;;  %13380 = vmatpush3.xpose.msra.mxu0 %v6538_v57  ;;  %v3226_v1 = vpop.f32.mrf.mxu0 }
 0x18b   : > { %13363 = vmatpush3.msra.mxu1 %v15324_v9  ;;  %13366 = vmatprep.mubr.msk.f32.mxu1 %vm13884_vm0, %v13883_v3  ;;  %v3227_v4 = vadd.f32 %v3226_v1, %v3147_v10  ;;  %v12061_v1 = vld [vmem:[%s15988_s8 + $0x3] ss:$0 sm:$0xff]  ;;  %v7852_v10 = vand.u32 4294901760, %v7781_v60 }
 0x18c   : > { %13364 = vmatprep.subr.mxu1 %v13883_v3  ;;  %13381 = vmatprep.mubr.msk.f32.mxu0 %vm13884_vm0, %v13883_v3  ;;  %v3303_v6 = vpop.f32.mrf.mxu1  ;;  %v12939_v59 = vpop.f32.mrf.mxu0 }
 0x18d   : > { %13365 = vmatpush3.msra.mxu1 %v15334_v13  ;;  %13382 = vmatmul.mubr.f32.vlgmr.msra.gmra.mxu0 %v15413_v52 }
 0x18e   : > { %13367 = vmatmul.mubr.f32.vlgmr.msra.gmra.mxu1 %v14954_v54  ;;  %13374 = vmatprep.subr.mxu1 %v13883_v3  ;;  %v12950_v9 = vpop.f32.mrf.mxu1  ;;  %v3304_v54 = vadd.f32 %v3303_v6, %v3227_v4 }
 0x18f   : > { %13389 = vmatprep.subr.mxu0 %v13883_v3  ;;  %13375 = vmatpush3.xpose.msra.mxu1 %v6541_v2 }
 0x190   : > { %13390 = vmatpush3.xpose.msra.mxu0 %v6539_v58  ;;  %13376 = vmatprep.mubr.msk.f32.mxu1 %vm13884_vm0, %v13883_v3  ;;  %v7404_v58 = vand.u32 4294901760, %v7403_v61 }
 0x191   : > { %13391 = vmatprep.mubr.msk.f32.mxu0 %vm13884_vm0, %v13883_v3  ;;  %13384 = vmatprep.subr.mxu1 %v13883_v3 }
 0x192   : > { %13377 = vmatmul.mubr.f32.vlgmr.msra.gmra.mxu1 %v15401_v37  ;;  %13399 = vmatprep.subr.mxu0 %v13883_v3 }
 0x193   : > { %13392 = vmatmul.mubr.f32.vlgmr.msra.gmra.mxu0 %v15401_v37  ;;  %13385 = vmatpush3.xpose.msra.mxu1 %v15420_v46 }
 0x194   : > { %13386 = vmatprep.mubr.msk.f32.mxu1 %vm13884_vm0, %v13883_v3  ;;  %13394 = vmatprep.subr.mxu1 %v13883_v3  ;;  %v3386_v13 = vpop.f32.mrf.mxu0 }
 0x195   : > { %v3387_v14 = vadd.f32 %v3386_v13, %v3304_v54  ;;  %13401 = vmatprep.mubr.msk.f32.mxu0 %vm13884_vm0, %v13883_v3  ;;  %v7853_v54 = vsub.f32 %v7781_v60, %v7852_v10 }
 0x196   : > { %13387 = vmatmul.mubr.f32.vlgmr.msra.gmra.mxu1 %v6498_v56  ;;  %v3461_v16 = vpop.f32.mrf.mxu1  ;;  %v12961_v55 = vpop.f32.mrf.mxu0 }
 0x197   : > { %13395 = vmatpush3.xpose.msra.mxu1 %v15420_v46  ;;  %v3462_v18 = vadd.f32 %v3461_v16, %v3387_v14  ;;  %13396 = vmatprep.mubr.msk.f32.mxu1 %vm13884_vm0, %v13883_v3  ;;  %v7854_v14 = vand.u32 4294901760, %v7853_v54 }
 0x198   : > { %v12972_v20 = vpop.f32.mrf.mxu1  ;;  %13404 = vmatprep.subr.mxu1 %v13883_v3 }
 0x199   : > { %v6880_v21 = vsel %vm6423_vm2, %v3462_v18, 0 }
 0x19a   : > { %v6913_v15 = vand.u32 4294901760, %v6880_v21  ;;  %13397 = vmatmul.mubr.f32.vlgmr.msra.gmra.mxu1 %v15401_v37 }
 0x19b   : > { %13406 = vmatprep.mubr.msk.f32.mxu1 %vm13884_vm0, %v13883_v3 }
 0x19c   : > { %v6990_v25 = vsub.f32 %v6880_v21, %v6913_v15  ;;  %13400 = vmatpush3.xpose.msra.mxu0 %v6913_v15 }
 0x19d   : > { %13409 = vmatprep.subr.mxu0 %v13883_v3 }
 0x19e   : > { %v6991_v27 = vand.u32 4294901760, %v6990_v25  ;;  %v3540_v30 = vpop.f32.mrf.mxu0 }
 0x19f   : > { %13402 = vmatmul.mubr.f32.vlgmr.msra.gmra.mxu0 %v6952_v17  ;;  %v3541_v40 = vadd.f32 %v12060_v39, %v3540_v30 }
 0x1a0   : > { %v3631_v33 = vpop.f32.mrf.mxu1  ;;  %v12983_v35 = vpop.f32.mrf.mxu0  ;;  %13410 = vmatpush3.xpose.msra.mxu0 %v6990_v25  ;;  %13411 = vmatprep.mubr.msk.f32.mxu0 %vm13884_vm0, %v13883_v3  ;;  %v6992_v23 = vsub.f32 %v6990_v25, %v6991_v27 }
 0x1a1   : > { %13419 = vmatprep.subr.mxu0 %v13883_v3  ;;  %v3632_v43 = vadd.f32 %v3631_v33, %v3541_v40 }
 0x1a2   : > { %v12994_v36 = vpop.f32.mrf.mxu1  ;;  %v6993_v38 = vand.u32 4294901760, %v6992_v23 }
 0x1a3   : > { %13412 = vmatmul.mubr.f32.vlgmr.msra.gmra.mxu0 %v15481_v11 }
 0x1a4   : > { %13405 = vmatpush3.xpose.msra.mxu1 %v6993_v38  ;;  %13420 = vmatpush3.xpose.msra.mxu0 %v6991_v27  ;;  %v12062_v38 = vld [vmem:[%s15989_s9] ss:$0 sm:$0xff] }
 0x1a5   : > { %13421 = vmatprep.mubr.msk.f32.mxu0 %vm13884_vm0, %v13883_v3  ;;  %13414 = vmatprep.subr.mxu1 %v13883_v3 }
 0x1a6   : > { %13429 = vmatprep.subr.mxu0 %v13883_v3 }
 0x1a7   : > { %13407 = vmatmul.mubr.f32.vlgmr.msra.gmra.mxu1 %v15471_v8  ;;  %13422 = vmatmul.mubr.f32.vlgmr.msra.gmra.mxu0 %v15471_v8 }
 0x1a8   : > { %v3711_v41 = vpop.f32.mrf.mxu0  ;;  %13415 = vmatpush3.xpose.msra.mxu1 %v6913_v15  ;;  %13416 = vmatprep.mubr.msk.f32.mxu1 %vm13884_vm0, %v13883_v3 }
 0x1a9   : > { %13424 = vmatprep.subr.mxu1 %v13883_v3  ;;  %13431 = vmatprep.mubr.msk.f32.mxu0 %vm13884_vm0, %v13883_v3  ;;  %v3712_v37 = vadd.f32 %v3711_v41, %v3632_v43 }
 0x1aa   : > { %v3788_v45 = vpop.f32.mrf.mxu1  ;;  %v13005_v42 = vpop.f32.mrf.mxu0 }
 0x1ab   : > { %13417 = vmatmul.mubr.f32.vlgmr.msra.gmra.mxu1 %v6950_v7  ;;  %v3789_v47 = vadd.f32 %v3788_v45, %v3712_v37 }
 0x1ac   : > { %v13016_v19 = vpop.f32.mrf.mxu1  ;;  %13425 = vmatpush3.xpose.msra.mxu1 %v6913_v15  ;;  %13426 = vmatprep.mubr.msk.f32.mxu1 %vm13884_vm0, %v13883_v3  ;;  %v7855_v15 = vsub.f32 %v7853_v54, %v7854_v14 }
 0x1ad   : > { %13434 = vmatprep.subr.mxu1 %v13883_v3 }
 0x1ae   : > { %v7856_v27 = vand.u32 4294901760, %v7855_v15 }
 0x1af   : > { %13427 = vmatmul.mubr.f32.vlgmr.msra.gmra.mxu1 %v15471_v8 }
 0x1b0   : > { %13436 = vmatprep.mubr.msk.f32.mxu1 %vm13884_vm0, %v13883_v3 }
 0x1b2   : > { %v3871_v49 = vpop.f32.mrf.mxu0 }
 0x1b3   : > { %v3872_v22 = vadd.f32 %v3871_v49, %v3789_v47 }
 0x1b4   : > { %v3946_v52 = vpop.f32.mrf.mxu1  ;;  %v13027_v53 = vpop.f32.mrf.mxu0 }
 0x1b5   : > { %v3947_v46 = vadd.f32 %v3946_v52, %v3872_v22 }
 0x1b6   : > { %v13038_v56 = vpop.f32.mrf.mxu1 }
 0x1b7   : > { %v7332_v57 = vsel %vm6423_vm2, %v3947_v46, 0  ;;  %v12063_v56 = vld [vmem:[%s15989_s9 + $0x1] ss:$0 sm:$0xff] }
 0x1b8   : > { %v7365_v26 = vand.u32 4294901760, %v7332_v57 }
 0x1ba   : > { %v7442_v31 = vsub.f32 %v7332_v57, %v7365_v26  ;;  %13430 = vmatpush3.xpose.msra.mxu0 %v7365_v26 }
 0x1bb   : > { %13439 = vmatprep.subr.mxu0 %v13883_v3 }
 0x1bc   : > { %v7443_v48 = vand.u32 4294901760, %v7442_v31  ;;  %v4025_v28 = vpop.f32.mrf.mxu0 }
 0x1bd   : > { %13432 = vmatmul.mubr.f32.vlgmr.msra.gmra.mxu0 %v7404_v58  ;;  %v4026_v2 = vadd.f32 %v12061_v1, %v4025_v28 }
 0x1be   : > { %v4116_v63 = vpop.f32.mrf.mxu1  ;;  %v13049_v0 = vpop.f32.mrf.mxu0  ;;  %13440 = vmatpush3.xpose.msra.mxu0 %v7442_v31  ;;  %13441 = vmatprep.mubr.msk.f32.mxu0 %vm13884_vm0, %v13883_v3  ;;  %v7444_v51 = vsub.f32 %v7442_v31, %v7443_v48 }
 0x1bf   : > { %13449 = vmatprep.subr.mxu0 %v13883_v3  ;;  %v4117_v9 = vadd.f32 %v4116_v63, %v4026_v2 }
 0x1c0   : > { %v13060_v5 = vpop.f32.mrf.mxu1  ;;  %v7445_v29 = vand.u32 4294901760, %v7444_v51 }
 0x1c1   : > { %13442 = vmatmul.mubr.f32.vlgmr.msra.gmra.mxu0 %v7401_v44 }
 0x1c2   : > { %13435 = vmatpush3.xpose.msra.mxu1 %v7445_v29  ;;  %13450 = vmatpush3.xpose.msra.mxu0 %v7443_v48 }
 0x1c3   : > { %13451 = vmatprep.mubr.msk.f32.mxu0 %vm13884_vm0, %v13883_v3  ;;  %13444 = vmatprep.subr.mxu1 %v13883_v3 }
 0x1c4   : > { %13459 = vmatprep.subr.mxu0 %v13883_v3 }
 0x1c5   : > { %13437 = vmatmul.mubr.f32.vlgmr.msra.gmra.mxu1 %v15528_v34  ;;  %13452 = vmatmul.mubr.f32.vlgmr.msra.gmra.mxu0 %v15528_v34 }
 0x1c6   : > { %v4196_v6 = vpop.f32.mrf.mxu0  ;;  %13445 = vmatpush3.xpose.msra.mxu1 %v7365_v26  ;;  %13446 = vmatprep.mubr.msk.f32.mxu1 %vm13884_vm0, %v13883_v3 }
 0x1c7   : > { %13454 = vmatprep.subr.mxu1 %v13883_v3  ;;  %13461 = vmatprep.mubr.msk.f32.mxu0 %vm13884_vm0, %v13883_v3  ;;  %v4197_v11 = vadd.f32 %v4196_v6, %v4117_v9 }
 0x1c8   : > { %v4273_v59 = vpop.f32.mrf.mxu1  ;;  %v13071_v8 = vpop.f32.mrf.mxu0 }
 0x1c9   : > { %13447 = vmatmul.mubr.f32.vlgmr.msra.gmra.mxu1 %v7402_v50  ;;  %v4274_v13 = vadd.f32 %v4273_v59, %v4197_v11  ;;  %v12064_v11 = vld [vmem:[%s15989_s9 + $0x2] ss:$0 sm:$0xff] }
 0x1ca   : > { %v13082_v4 = vpop.f32.mrf.mxu1  ;;  %13455 = vmatpush3.xpose.msra.mxu1 %v7365_v26  ;;  %13456 = vmatprep.mubr.msk.f32.mxu1 %vm13884_vm0, %v13883_v3 }
 0x1cb   : > { %13464 = vmatprep.subr.mxu1 %v13883_v3 }
 0x1cd   : > { %13457 = vmatmul.mubr.f32.vlgmr.msra.gmra.mxu1 %v15528_v34 }
 0x1ce   : > { %13466 = vmatprep.mubr.msk.f32.mxu1 %vm13884_vm0, %v13883_v3 }
 0x1d0   : > { %v4356_v7 = vpop.f32.mrf.mxu0 }
 0x1d1   : > { %v4357_v16 = vadd.f32 %v4356_v7, %v4274_v13 }
 0x1d2   : > { %v4431_v55 = vpop.f32.mrf.mxu1  ;;  %v13093_v18 = vpop.f32.mrf.mxu0 }
 0x1d3   : > { %v4432_v20 = vadd.f32 %v4431_v55, %v4357_v16 }
 0x1d4   : > { %v13104_v21 = vpop.f32.mrf.mxu1 }
 0x1d5   : > { %v7784_v24 = vsel %vm6423_vm2, %v4432_v20, 0 }
 0x1d6   : > { %v7817_v25 = vand.u32 4294901760, %v7784_v24 }
 0x1d8   : > { %v7894_v17 = vsub.f32 %v7784_v24, %v7817_v25  ;;  %13460 = vmatpush3.xpose.msra.mxu0 %v7817_v25 }
 0x1d9   : > { %13469 = vmatprep.subr.mxu0 %v13883_v3 }
 0x1da   : > { %v7895_v30 = vand.u32 4294901760, %v7894_v17  ;;  %v4558_v33 = vpop.f32.mrf.mxu0 }
 0x1db   : > { %13462 = vmatmul.mubr.f32.vlgmr.msra.gmra.mxu0 %v7856_v27  ;;  %v4559_v39 = vadd.f32 %v12062_v38, %v4558_v33 }
 0x1dc   : > { %13470 = vmatpush3.xpose.msra.mxu0 %v7894_v17  ;;  %13471 = vmatprep.mubr.msk.f32.mxu0 %vm13884_vm0, %v13883_v3  ;;  %v7896_v35 = vsub.f32 %v7894_v17, %v7895_v30  ;;  %v13115_v23 = vpop.f32.mrf.mxu0 }
 0x1dd   : > { %13479 = vmatprep.subr.mxu0 %v13883_v3 }
 0x1de   : > { %v7897_v36 = vand.u32 4294901760, %v7896_v35 }
 0x1df   : > { %13472 = vmatmul.mubr.f32.vlgmr.msra.gmra.mxu0 %v7853_v54 }
 0x1e0   : > { %13465 = vmatpush3.xpose.msra.mxu1 %v7897_v36  ;;  %13480 = vmatpush3.xpose.msra.mxu0 %v7895_v30  ;;  %v4649_v32 = vpop.f32.mrf.mxu1  ;;  %v12065_v36 = vld [vmem:[%s15989_s9 + $0x3] ss:$0 sm:$0xff] }
 0x1e1   : > { %13481 = vmatprep.mubr.msk.f32.mxu0 %vm13884_vm0, %v13883_v3  ;;  %13474 = vmatprep.subr.mxu1 %v13883_v3  ;;  %v4650_v45 = vadd.f32 %v4649_v32, %v4559_v39 }
 0x1e2   : > { %v13126_v40 = vpop.f32.mrf.mxu1  ;;  %v4729_v12 = vpop.f32.mrf.mxu0  ;;  %13489 = vmatprep.subr.mxu0 %v13883_v3 }
 0x1e3   : > { %13467 = vmatmul.mubr.f32.vlgmr.msra.gmra.mxu1 %v7852_v10  ;;  %13482 = vmatmul.mubr.f32.vlgmr.msra.gmra.mxu0 %v7852_v10  ;;  %v4730_v42 = vadd.f32 %v4729_v12, %v4650_v45 }
 0x1e4   : > { %13475 = vmatpush3.xpose.msra.mxu1 %v7817_v25  ;;  %13476 = vmatprep.mubr.msk.f32.mxu1 %vm13884_vm0, %v13883_v3  ;;  %v13137_v41 = vpop.f32.mrf.mxu0 }
 0x1e5   : > { %13484 = vmatprep.subr.mxu1 %v13883_v3  ;;  %13491 = vmatprep.mubr.msk.f32.mxu0 %vm13884_vm0, %v13883_v3 }
 0x1e7   : > { %13477 = vmatmul.mubr.f32.vlgmr.msra.gmra.mxu1 %v7854_v14 }
 0x1e8   : > { %13485 = vmatpush3.xpose.msra.mxu1 %v7817_v25  ;;  %13486 = vmatprep.mubr.msk.f32.mxu1 %vm13884_vm0, %v13883_v3 }
 0x1e9   : > { %13494 = vmatprep.subr.mxu1 %v13883_v3 }
 0x1eb   : > { %13487 = vmatmul.mubr.f32.vlgmr.msra.gmra.mxu1 %v7852_v10  ;;  %v4806_v34 = vpop.f32.mrf.mxu1 }
 0x1ec   : > { %v4889_v43 = vpop.f32.mrf.mxu0  ;;  %13496 = vmatprep.mubr.msk.f32.mxu1 %vm13884_vm0, %v13883_v3  ;;  %v4807_v37 = vadd.f32 %v4806_v34, %v4730_v42 }
 0x1ed   : > { %v13148_v19 = vpop.f32.mrf.mxu1 }
 0x1ee   : > { %v13159_v44 = vpop.f32.mrf.mxu0  ;;  %v4890_v47 = vadd.f32 %v4889_v43, %v4807_v37 }
 0x1f5   : > { %v4964_v49 = vpop.f32.mrf.mxu1 }
 0x1f6   : > { %v4965_v50 = vadd.f32 %v4964_v49, %v4890_v47  ;;  %v5043_v22 = vpop.f32.mrf.mxu0 }
 0x1f7   : > { %v13170_v52 = vpop.f32.mrf.mxu1  ;;  %v5044_v26 = vadd.f32 %v12063_v56, %v5043_v22 }
 0x1f8   : > { %v15586_v53 = vand.u32 4294901760, %v4965_v50  ;;  %v13181_v46 = vpop.f32.mrf.mxu0 }
 0x1fa   : > { %v15592_v57 = vsub.f32 %v4965_v50, %v15586_v53  ;;  %13490 = vmatpush3.msra.mxu0 %v15586_v53 }
 0x1fb   : > { %13499 = vmatprep.subr.mxu0 %v13883_v3 }
 0x1fc   : > { %v8398_v61 = vand.u32 4294901760, %v15592_v57 }
 0x1fe   : > { %v8399_v31 = vsub.f32 %v15592_v57, %v8398_v61 }
 0x1ff   : > { %v5134_v58 = vpop.f32.mrf.mxu1 }
 0x200   : > { %v5214_v48 = vpop.f32.mrf.mxu0  ;;  %v8400_v28 = vand.u32 4294901760, %v8399_v31  ;;  %v5135_v63 = vadd.f32 %v5134_v58, %v5044_v26 }
 0x201   : > { %v13192_v0 = vpop.f32.mrf.mxu1 }
 0x202   : > { %v13203_v51 = vpop.f32.mrf.mxu0  ;;  %13495 = vmatpush3.msra.mxu1 %v8400_v28  ;;  %v5215_v5 = vadd.f32 %v5214_v48, %v5135_v63 }
 0x203   : > { %13504 = vmatprep.subr.mxu1 %v13883_v3 }
 0x209   : > { %v5291_v29 = vpop.f32.mrf.mxu1 }
 0x20a   : > { %v5374_v62 = vpop.f32.mrf.mxu0  ;;  %v5292_v1 = vadd.f32 %v5291_v29, %v5215_v5 }
 0x20b   : > { %v13214_v2 = vpop.f32.mrf.mxu1 }
 0x20c   : > { %v13225_v60 = vpop.f32.mrf.mxu0  ;;  %v5375_v6 = vadd.f32 %v5374_v62, %v5292_v1 }
 0x213   : > { %v5449_v59 = vpop.f32.mrf.mxu1 }
 0x214   : > { %v5528_v8 = vpop.f32.mrf.mxu0  ;;  %v15601_v10 = vadd.f32 %v5449_v59, %v5375_v6 }
 0x215   : > { %v13236_v9 = vpop.f32.mrf.mxu1  ;;  %v5529_v54 = vadd.f32 %v12064_v11, %v5528_v8 }
 0x216   : > { %v13247_v4 = vpop.f32.mrf.mxu0 }
 0x21d   : > { %v5619_v13 = vpop.f32.mrf.mxu1 }
 0x21e   : > { %v5699_v7 = vpop.f32.mrf.mxu0  ;;  %v5620_v14 = vadd.f32 %v5619_v13, %v5529_v54 }
 0x21f   : > { %v13258_v16 = vpop.f32.mrf.mxu1 }
 0x220   : > { %v13269_v55 = vpop.f32.mrf.mxu0  ;;  %v5700_v18 = vadd.f32 %v5699_v7, %v5620_v14 }
 0x227   : > { %v5776_v20 = vpop.f32.mrf.mxu1 }
 0x228   : > { %v5859_v21 = vpop.f32.mrf.mxu0  ;;  %v5777_v24 = vadd.f32 %v5776_v20, %v5700_v18 }
 0x229   : > { %v13280_v15 = vpop.f32.mrf.mxu1 }
 0x22a   : > { %v13291_v25 = vpop.f32.mrf.mxu0  ;;  %v5860_v17 = vadd.f32 %v5859_v21, %v5777_v24 }
 0x231   : > { %v5934_v27 = vpop.f32.mrf.mxu1 }
 0x232   : > { %v6013_v30 = vpop.f32.mrf.mxu0  ;;  %v15606_v33 = vadd.f32 %v5934_v27, %v5860_v17 }
 0x233   : > { %v13302_v35 = vpop.f32.mrf.mxu1  ;;  %v6014_v38 = vadd.f32 %v12065_v36, %v6013_v30 }
 0x234   : > { %v13313_v23 = vpop.f32.mrf.mxu0 }
 0x23b   : > { %v6104_v32 = vpop.f32.mrf.mxu1 }
 0x23c   : > { %v6184_v39 = vpop.f32.mrf.mxu0  ;;  %v6105_v40 = vadd.f32 %v6104_v32, %v6014_v38 }
 0x23d   : > { %v13324_v12 = vpop.f32.mrf.mxu1 }
 0x23e   : > { %v13335_v41 = vpop.f32.mrf.mxu0  ;;  %v6185_v45 = vadd.f32 %v6184_v39, %v6105_v40 }
 0x244   : > { %v6344_v42 = vpop.f32.mrf.mxu0 }
 0x246   : > { %v13357_v34 = vpop.f32.mrf.mxu0  ;;  %v6261_v43 = vpop.f32.mrf.mxu1 }
 0x247   : > { %v6262_v19 = vadd.f32 %v6261_v43, %v6185_v45 }
 0x248   : > { %v13346_v37 = vpop.f32.mrf.mxu1 }
 0x249   : > { %v6502_v44 = vpop.f32.mrf.mxu0  ;;  %v6345_v47 = vadd.f32 %v6344_v42, %v6262_v19 }
 0x24b   : > { %v13373_v49 = vpop.f32.mrf.mxu0 }
 0x24d   : > { %v6652_v50 = vpop.f32.mrf.mxu0 }
 0x24e   : > { %v6419_v22 = vpop.f32.mrf.mxu1 }
 0x24f   : > { %v15611_v52 = vadd.f32 %v6419_v22, %v6345_v47  ;;  %v13383_v46 = vpop.f32.mrf.mxu0 }
 0x250   : > { %v13368_v56 = vpop.f32.mrf.mxu1 }
 0x252   : > { %v6578_v26 = vpop.f32.mrf.mxu1 }
 0x253   : > { %v6579_v31 = vadd.f32 %v6578_v26, %v6502_v44  ;;  %v6800_v58 = vpop.f32.mrf.mxu0 }
 0x254   : > { %v13378_v48 = vpop.f32.mrf.mxu1 }
 0x255   : > { %v13393_v28 = vpop.f32.mrf.mxu0  ;;  %v6653_v63 = vadd.f32 %v6652_v50, %v6579_v31 }
 0x256   : > { %v6726_v0 = vpop.f32.mrf.mxu1 }
 0x257   : > { %v6727_v51 = vadd.f32 %v6726_v0, %v6653_v63 }
 0x258   : > { %v13388_v5 = vpop.f32.mrf.mxu1 }
 0x259   : > { %v6801_v29 = vadd.f32 %v6800_v58, %v6727_v51 }
 0x25a   : > { %v6872_v62 = vpop.f32.mrf.mxu1 }
 0x25b   : > { %v15613_v1 = vadd.f32 %v6872_v62, %v6801_v29 }
 0x25c   : > { %v13398_v2 = vpop.f32.mrf.mxu1 }
 0x25d   : > { %v8232_v60 = vsel %vm6423_vm2, %v15613_v1, -inf }
 0x25e   : > { %8233 = vmax.xlane.f32.xlu0 %v8232_v60 }
 0x25f   : > { %v6954_v6 = vpop.f32.mrf.mxu0 }
 0x261   : > { %v13403_v59 = vpop.f32.mrf.mxu0 }
 0x263   : > { %v7104_v8 = vpop.f32.mrf.mxu0 }
 0x265   : > { %v13413_v9 = vpop.f32.mrf.mxu0 }
 0x267   : > { %v7030_v4 = vpop.f32.mrf.mxu1  ;;  %v7252_v11 = vpop.f32.mrf.mxu0 }
 0x268   : > { %v7031_v54 = vadd.f32 %v7030_v4, %v6954_v6 }
 0x269   : > { %v13408_v13 = vpop.f32.mrf.mxu1  ;;  %v13423_v7 = vpop.f32.mrf.mxu0 }
 0x26a   : > { %v7105_v14 = vadd.f32 %v7104_v8, %v7031_v54 }
 0x26b   : > { %v7178_v16 = vpop.f32.mrf.mxu1 }
 0x26c   : > { %v7179_v55 = vadd.f32 %v7178_v16, %v7105_v14 }
 0x26d   : > { %v13418_v18 = vpop.f32.mrf.mxu1 }
 0x26e   : > { %v7253_v20 = vadd.f32 %v7252_v11, %v7179_v55 }
 0x26f   : > { %v7324_v21 = vpop.f32.mrf.mxu1 }
 0x270   : > { %v7325_v24 = vadd.f32 %v7324_v21, %v7253_v20 }
 0x271   : > { %v13428_v15 = vpop.f32.mrf.mxu1 }
 0x272   : > { %v8235_v25 = vsel %vm6423_vm2, %v7325_v24, -inf }
 0x273   : > { %8236 = vmax.xlane.f32.xlu0 %v8235_v25 }
 0x27d   : > { %v7406_v17 = vpop.f32.mrf.mxu0 }
 0x27f   : > { %v13433_v27 = vpop.f32.mrf.mxu0 }
 0x281   : > { %v7556_v30 = vpop.f32.mrf.mxu0 }
 0x283   : > { %v13443_v35 = vpop.f32.mrf.mxu0 }
 0x285   : > { %v7482_v23 = vpop.f32.mrf.mxu1  ;;  %v7704_v36 = vpop.f32.mrf.mxu0 }
 0x286   : > { %v7483_v38 = vadd.f32 %v7482_v23, %v7406_v17  ;;  %v8769_v17 = vand.u32 4294901760, %v15601_v10 }
 0x287   : > { %v13438_v32 = vpop.f32.mrf.mxu1  ;;  %v13453_v39 = vpop.f32.mrf.mxu0 }
 0x288   : > { %v7557_v40 = vadd.f32 %v7556_v30, %v7483_v38  ;;  %v15633_v30 = vsub.f32 %v15601_v10, %v8769_v17 }
 0x289   : > { %v7630_v12 = vpop.f32.mrf.mxu1 }
 0x28a   : > { %v7631_v41 = vadd.f32 %v7630_v12, %v7557_v40  ;;  %v8847_v38 = vand.u32 4294901760, %v15633_v30 }
 0x28b   : > { %v13448_v45 = vpop.f32.mrf.mxu1 }
 0x28c   : > { %v7705_v42 = vadd.f32 %v7704_v36, %v7631_v41  ;;  %v8848_v40 = vsub.f32 %v15633_v30, %v8847_v38 }
 0x28d   : > { %v7776_v34 = vpop.f32.mrf.mxu1 }
 0x28e   : > { %v7777_v43 = vadd.f32 %v7776_v34, %v7705_v42  ;;  %v8849_v45 = vand.u32 4294901760, %v8848_v40  ;;  %v10083_v40 = vld [vmem:[%s15986_s6 + $0x8] sm:$0xff] }
 0x28f   : > { %v13458_v19 = vpop.f32.mrf.mxu1 }
 0x290   : > { %v8238_v37 = vsel %vm6423_vm2, %v7777_v43, -inf }
 0x291   : > { %8239 = vmax.xlane.f32.xlu1 %v8238_v37 }
 0x29b   : > { %v7858_v44 = vpop.f32.mrf.mxu0 }
 0x29d   : > { %v13463_v47 = vpop.f32.mrf.mxu0 }
 0x29f   : > { %v8008_v49 = vpop.f32.mrf.mxu0 }
 0x2a1   : > { %v13473_v50 = vpop.f32.mrf.mxu0 }
 0x2a3   : > { %v7934_v22 = vpop.f32.mrf.mxu1  ;;  %v8156_v46 = vpop.f32.mrf.mxu0 }
 0x2a4   : > { %v7935_v56 = vadd.f32 %v7934_v22, %v7858_v44 }
 0x2a5   : > { %v13468_v26 = vpop.f32.mrf.mxu1  ;;  %v13483_v31 = vpop.f32.mrf.mxu0 }
 0x2a6   : > { %v8009_v58 = vadd.f32 %v8008_v49, %v7935_v56 }
 0x2a7   : > { %v8082_v48 = vpop.f32.mrf.mxu1 }
 0x2a8   : > { %v8083_v28 = vadd.f32 %v8082_v48, %v8009_v58 }
 0x2a9   : > { %v13478_v63 = vpop.f32.mrf.mxu1 }
 0x2aa   : > { %v8157_v0 = vadd.f32 %v8156_v46, %v8083_v28  ;;  %v15704_v46 = vand.u32 4294901760, %v15611_v52 }
 0x2ab   : > { %v8228_v51 = vpop.f32.mrf.mxu1 }
 0x2ac   : > { %v8229_v5 = vadd.f32 %v8228_v51, %v8157_v0  ;;  %v15708_v26 = vsub.f32 %v15611_v52, %v15704_v46 }
 0x2ad   : > { %v13488_v29 = vpop.f32.mrf.mxu1 }
 0x2ae   : > { %v8241_v62 = vsel %vm6423_vm2, %v8229_v5, -inf  ;;  %v9745_v28 = vand.u32 4294901760, %v15708_v26 }
 0x2af   : > { %8242 = vmax.xlane.f32.xlu1 %v8241_v62 }
 0x2b0   : > { %v9746_v52 = vsub.f32 %v15708_v26, %v9745_v28 }
 0x2b2   : > { %v9747_v29 = vand.u32 4294901760, %v9746_v52 }
 0x2e7   : > { %v8234_v2 = vpop.xlane.xlu0 %8233 }
 0x2e8   : > { %v8244_v60 = vsub.f32 %v15613_v1, %v8234_v2 }
 0x2ea   : > { %v8248_v6 = vmul.f32 1.442695, %v8244_v60 }
 0x2ec   : > { %13775 = vpow2.f32 %v8248_v6 }
 0x2f9   : > { %v13776_v59 = vpop.eup %13775 }
 0x2fa   : > { %v8256_v8 = vsel %vm6423_vm2, %v13776_v59, 0.0 }
 0x2fb   : > { %8257 = vadd.xlane.f32.xlu0 %v8256_v8 }
 0x2fc   : > { %v8237_v9 = vpop.xlane.xlu0 %8236 }
 0x2fd   : > { %v8245_v4 = vsub.f32 %v7325_v24, %v8237_v9 }
 0x2ff   : > { %v8250_v11 = vmul.f32 1.442695, %v8245_v4 }
 0x301   : > { %13777 = vpow2.f32 %v8250_v11 }
 0x30e   : > { %v13778_v54 = vpop.eup %13777 }
 0x30f   : > { %v8259_v13 = vsel %vm6423_vm2, %v13778_v54, 0.0 }
 0x310   : > { %8260 = vadd.xlane.f32.xlu1 %v8259_v13 }
 0x31a   : > { %v8240_v7 = vpop.xlane.xlu1 %8239 }
 0x31b   : > { %v8246_v14 = vsub.f32 %v7777_v43, %v8240_v7 }
 0x31d   : > { %v8252_v16 = vmul.f32 1.442695, %v8246_v14 }
 0x31f   : > { %13779 = vpow2.f32 %v8252_v16 }
 0x32c   : > { %v15623_v55 = vpop.eup %13779 }
 0x32d   : > { %v8262_v1 = vsel %vm6423_vm2, %v15623_v55, 0.0 }
 0x32e   : > { %8263 = vadd.xlane.f32.xlu0 %v8262_v1 }
 0x338   : > { %v8243_v18 = vpop.xlane.xlu1 %8242 }
 0x339   : > { %v8247_v20 = vsub.f32 %v8229_v5, %v8243_v18  ;;  %v10082_v18 = vld [vmem:[%s15986_s6] sm:$0xff] }
 0x33b   : > { %v8254_v21 = vmul.f32 1.442695, %v8247_v20 }
 0x33d   : > { %13781 = vpow2.f32 %v8254_v21  ;;  %v10120_v21 = vand.u32 4294901760, %v10082_v18 }
 0x34a   : > { %v15627_v24 = vpop.eup %13781 }
 0x34b   : > { %v8265_v15 = vsel %vm6423_vm2, %v15627_v24, 0.0 }
 0x34c   : > { %8266 = vadd.xlane.f32.xlu1 %v8265_v15 }
 0x384   : > { %v8258_v25 = vpop.xlane.xlu0 %8257 }
 0x385   : > { %13783 = vrcp.f32 %v8258_v25 }
 0x392   : > { %v13784_v27 = vpop.eup %13783 }
 0x393   : > { %v15635_v35 = vmul.f32 %v13784_v27, %v13776_v59 }
 0x395   : > { %v8287_v23 = vsel %vm6423_vm2, %v15635_v35, 0  ;;  %v8276_v60 = vsel %vm6423_vm2, %v15635_v35, 0.0 }
 0x396   : > { %v8355_v36 = vand.u32 4294901760, %v8287_v23 }
 0x398   : > { %v8356_v32 = vsub.f32 %v8287_v23, %v8355_v36  ;;  %13497 = vmatmul.mubr.f32.vlgmr.msra.gmra.mxu1 %v8355_v36 }
 0x399   : > { %13505 = vmatpush3.msra.mxu1 %v15586_v53  ;;  %13506 = vmatprep.mubr.msk.f32.mxu1 %vm13884_vm0, %v13883_v3  ;;  %v8261_v39 = vpop.xlane.xlu1 %8260 }
 0x39a   : > { %13514 = vmatprep.subr.mxu1 %v13883_v3  ;;  %v8357_v10 = vand.u32 4294901760, %v8356_v32  ;;  %13785 = vrcp.f32 %v8261_v39 }
 0x39c   : > { %13507 = vmatmul.mubr.f32.vlgmr.msra.gmra.mxu1 %v8357_v10  ;;  %v8358_v12 = vsub.f32 %v8356_v32, %v8357_v10 }
 0x39d   : > { %13515 = vmatpush3.msra.mxu1 %v15586_v53  ;;  %13516 = vmatprep.mubr.msk.f32.mxu1 %vm13884_vm0, %v13883_v3  ;;  %v15659_v53 = vand.u32 4294901760, %v15606_v33 }
 0x39e   : > { %13524 = vmatprep.subr.mxu1 %v13883_v3  ;;  %v8359_v41 = vand.u32 4294901760, %v8358_v12 }
 0x39f   : > { %v15668_v34 = vsub.f32 %v15606_v33, %v15659_v53 }
 0x3a0   : > { %13492 = vmatmul.mubr.f32.vlgmr.msra.gmra.mxu0 %v8359_v41  ;;  %13517 = vmatmul.mubr.f32.vlgmr.msra.gmra.mxu1 %v8355_v36 }
 0x3a1   : > { %13500 = vmatpush3.msra.mxu0 %v15592_v57  ;;  %13525 = vmatpush3.msra.mxu1 %v8849_v45  ;;  %v9296_v19 = vand.u32 4294901760, %v15668_v34 }
 0x3a2   : > { %13501 = vmatprep.mubr.msk.f32.mxu0 %vm13884_vm0, %v13883_v3  ;;  %13509 = vmatprep.subr.mxu0 %v13883_v3 }
 0x3a3   : > { %13526 = vmatprep.mubr.msk.f32.mxu1 %vm13884_vm0, %v13883_v3  ;;  %13534 = vmatprep.subr.mxu1 %v13883_v3  ;;  %v9297_v44 = vsub.f32 %v15668_v34, %v9296_v19 }
 0x3a4   : > { %13502 = vmatmul.mubr.f32.vlgmr.msra.gmra.mxu0 %v8356_v32 }
 0x3a5   : > { %13510 = vmatpush3.msra.mxu0 %v8398_v61  ;;  %13511 = vmatprep.mubr.msk.f32.mxu0 %vm13884_vm0, %v13883_v3  ;;  %v9298_v50 = vand.u32 4294901760, %v9297_v44 }
 0x3a6   : > { %13519 = vmatprep.subr.mxu0 %v13883_v3 }
 0x3a7   : > { %v13786_v42 = vpop.eup %13785 }
 0x3a8   : > { %13512 = vmatmul.mubr.f32.vlgmr.msra.gmra.mxu0 %v8355_v36  ;;  %v15670_v43 = vmul.f32 %v13786_v42, %v13778_v54 }
 0x3a9   : > { %13520 = vmatpush3.msra.mxu0 %v8769_v17  ;;  %13521 = vmatprep.mubr.msk.f32.mxu0 %vm13884_vm0, %v13883_v3 }
 0x3aa   : > { %v8736_v57 = vsel %vm6423_vm2, %v15670_v43, 0  ;;  %13529 = vmatprep.subr.mxu0 %v13883_v3  ;;  %v8277_v2 = vsel %vm6423_vm2, %v15670_v43, 0.0 }
 0x3ab   : > { %v8804_v61 = vand.u32 4294901760, %v8736_v57  ;;  %v8278_v8 = vadd.f32 %v8277_v2, %v8276_v60 }
 0x3ad   : > { %v8805_v37 = vsub.f32 %v8736_v57, %v8804_v61  ;;  %13527 = vmatmul.mubr.f32.vlgmr.msra.gmra.mxu1 %v8804_v61 }
 0x3ae   : > { %13535 = vmatpush3.msra.mxu1 %v8769_v17  ;;  %13536 = vmatprep.mubr.msk.f32.mxu1 %vm13884_vm0, %v13883_v3 }
 0x3af   : > { %13544 = vmatprep.subr.mxu1 %v13883_v3  ;;  %v8806_v33 = vand.u32 4294901760, %v8805_v37 }
 0x3b1   : > { %13537 = vmatmul.mubr.f32.vlgmr.msra.gmra.mxu1 %v8806_v33  ;;  %v8807_v47 = vsub.f32 %v8805_v37, %v8806_v33 }
 0x3b2   : > { %13545 = vmatpush3.msra.mxu1 %v8769_v17  ;;  %13546 = vmatprep.mubr.msk.f32.mxu1 %vm13884_vm0, %v13883_v3 }
 0x3b3   : > { %13554 = vmatprep.subr.mxu1 %v13883_v3  ;;  %v8808_v49 = vand.u32 4294901760, %v8807_v47 }
 0x3b5   : > { %13522 = vmatmul.mubr.f32.vlgmr.msra.gmra.mxu0 %v8808_v49  ;;  %13547 = vmatmul.mubr.f32.vlgmr.msra.gmra.mxu1 %v8804_v61 }
 0x3b6   : > { %13530 = vmatpush3.msra.mxu0 %v15633_v30  ;;  %13555 = vmatpush3.msra.mxu1 %v9298_v50 }
 0x3b7   : > { %v8264_v22 = vpop.xlane.xlu0 %8263  ;;  %13531 = vmatprep.mubr.msk.f32.mxu0 %vm13884_vm0, %v13883_v3  ;;  %13539 = vmatprep.subr.mxu0 %v13883_v3 }
 0x3b8   : > { %13787 = vrcp.f32 %v8264_v22  ;;  %13556 = vmatprep.mubr.msk.f32.mxu1 %vm13884_vm0, %v13883_v3  ;;  %13564 = vmatprep.subr.mxu1 %v13883_v3 }
 0x3b9   : > { %13532 = vmatmul.mubr.f32.vlgmr.msra.gmra.mxu0 %v8805_v37 }
 0x3ba   : > { %13540 = vmatpush3.msra.mxu0 %v8847_v38  ;;  %13541 = vmatprep.mubr.msk.f32.mxu0 %vm13884_vm0, %v13883_v3 }
 0x3bb   : > { %13549 = vmatprep.subr.mxu0 %v13883_v3 }
 0x3bd   : > { %13542 = vmatmul.mubr.f32.vlgmr.msra.gmra.mxu0 %v8804_v61 }
 0x3be   : > { %13550 = vmatpush3.msra.mxu0 %v15659_v53  ;;  %13551 = vmatprep.mubr.msk.f32.mxu0 %vm13884_vm0, %v13883_v3 }
 0x3bf   : > { %13559 = vmatprep.subr.mxu0 %v13883_v3 }
 0x3c5   : > { %v13788_v56 = vpop.eup %13787 }
 0x3c6   : > { %v8273_v31 = vmul.f32 %v13788_v56, %v15623_v55 }
 0x3c8   : > { %v9185_v58 = vsel %vm6423_vm2, %v8273_v31, 0  ;;  %v8279_v6 = vsel %vm6423_vm2, %v8273_v31, 0.0 }
 0x3c9   : > { %v9253_v48 = vand.u32 4294901760, %v9185_v58  ;;  %v8280_v4 = vadd.f32 %v8279_v6, %v8278_v8 }
 0x3cb   : > { %v9254_v63 = vsub.f32 %v9185_v58, %v9253_v48  ;;  %13557 = vmatmul.mubr.f32.vlgmr.msra.gmra.mxu1 %v9253_v48 }
 0x3cc   : > { %13565 = vmatpush3.msra.mxu1 %v15659_v53  ;;  %13566 = vmatprep.mubr.msk.f32.mxu1 %vm13884_vm0, %v13883_v3 }
 0x3cd   : > { %13574 = vmatprep.subr.mxu1 %v13883_v3  ;;  %v9255_v0 = vand.u32 4294901760, %v9254_v63 }
 0x3cf   : > { %13567 = vmatmul.mubr.f32.vlgmr.msra.gmra.mxu1 %v9255_v0  ;;  %v9256_v51 = vsub.f32 %v9254_v63, %v9255_v0 }
 0x3d0   : > { %13575 = vmatpush3.msra.mxu1 %v15659_v53  ;;  %13576 = vmatprep.mubr.msk.f32.mxu1 %vm13884_vm0, %v13883_v3  ;;  %v15793_v53 = vand.u32 4294901760, %v10083_v40 }
 0x3d1   : > { %13584 = vmatprep.subr.mxu1 %v13883_v3  ;;  %v9257_v5 = vand.u32 4294901760, %v9256_v51 }
 0x3d2   : > { %v15796_v61 = vsub.f32 %v10083_v40, %v15793_v53 }
 0x3d3   : > { %13552 = vmatmul.mubr.f32.vlgmr.msra.gmra.mxu0 %v9257_v5  ;;  %13577 = vmatmul.mubr.f32.vlgmr.msra.gmra.mxu1 %v9253_v48  ;;  %v10084_v5 = vld [vmem:[%s15986_s6 + $0x10] sm:$0xff] }
 0x3d4   : > { %13560 = vmatpush3.msra.mxu0 %v15668_v34  ;;  %13585 = vmatpush3.msra.mxu1 %v9747_v29  ;;  %v10647_v47 = vand.u32 4294901760, %v15796_v61  ;;  %v15819_v60 = vand.u32 4294901760, %v10084_v5 }
 0x3d5   : > { %v8267_v62 = vpop.xlane.xlu1 %8266  ;;  %13561 = vmatprep.mubr.msk.f32.mxu0 %vm13884_vm0, %v13883_v3  ;;  %13569 = vmatprep.subr.mxu0 %v13883_v3 }
 0x3d6   : > { %13789 = vrcp.f32 %v8267_v62  ;;  %13586 = vmatprep.mubr.msk.f32.mxu1 %vm13884_vm0, %v13883_v3  ;;  %13594 = vmatprep.subr.mxu1 %v13883_v3  ;;  %v10648_v56 = vsub.f32 %v15796_v61, %v10647_v47 }
 0x3d7   : > { %13562 = vmatmul.mubr.f32.vlgmr.msra.gmra.mxu0 %v9254_v63 }
 0x3d8   : > { %13570 = vmatpush3.msra.mxu0 %v9296_v19  ;;  %13571 = vmatprep.mubr.msk.f32.mxu0 %vm13884_vm0, %v13883_v3  ;;  %v10649_v63 = vand.u32 4294901760, %v10648_v56 }
 0x3d9   : > { %13579 = vmatprep.subr.mxu0 %v13883_v3 }
 0x3db   : > { %13572 = vmatmul.mubr.f32.vlgmr.msra.gmra.mxu0 %v9253_v48 }
 0x3dc   : > { %13580 = vmatpush3.msra.mxu0 %v15704_v46  ;;  %13581 = vmatprep.mubr.msk.f32.mxu0 %vm13884_vm0, %v13883_v3 }
 0x3dd   : > { %13589 = vmatprep.subr.mxu0 %v13883_v3 }
 0x3e3   : > { %v13790_v59 = vpop.eup %13789 }
 0x3e4   : > { %v8275_v9 = vmul.f32 %v13790_v59, %v15627_v24  ;;  %v15769_v24 = vsub.f32 %v10082_v18, %v10120_v21 }
 0x3e6   : > { %v9634_v11 = vsel %vm6423_vm2, %v8275_v9, 0  ;;  %v8281_v54 = vsel %vm6423_vm2, %v8275_v9, 0.0  ;;  %v10198_v15 = vand.u32 4294901760, %v15769_v24 }
 0x3e7   : > { %v9702_v13 = vand.u32 4294901760, %v9634_v11  ;;  %v8282_v7 = vadd.f32 %v8281_v54, %v8280_v4  ;;  %v15827_v4 = vsub.f32 %v10084_v5, %v15819_v60 }
 0x3e8   : > { %v10199_v25 = vsub.f32 %v15769_v24, %v10198_v15 }
 0x3e9   : > { %v9703_v14 = vsub.f32 %v9634_v11, %v9702_v13  ;;  %13587 = vmatmul.mubr.f32.vlgmr.msra.gmra.mxu1 %v9702_v13  ;;  %v8284_v16 = vmul.f32 0.25, %v8282_v7  ;;  %v11096_v7 = vand.u32 4294901760, %v15827_v4 }
 0x3ea   : > { %13595 = vmatpush3.msra.mxu1 %v15704_v46  ;;  %13596 = vmatprep.mubr.msk.f32.mxu1 %vm13884_vm0, %v13883_v3  ;;  %v10200_v17 = vand.u32 4294901760, %v10199_v25 }
 0x3eb   : > { %13604 = vmatprep.subr.mxu1 %v13883_v3  ;;  %v9704_v55 = vand.u32 4294901760, %v9703_v14  ;;  %8285 = vst.msk [vmem:[%s15758_s15] sm:$0xff] %vm6423_vm2, %v8284_v16 }
 0x3ed   : > { %13597 = vmatmul.mubr.f32.vlgmr.msra.gmra.mxu1 %v9704_v55  ;;  %v9705_v1 = vsub.f32 %v9703_v14, %v9704_v55  ;;  %v11097_v55 = vsub.f32 %v15827_v4, %v11096_v7 }
 0x3ee   : > { %13605 = vmatpush3.msra.mxu1 %v15704_v46  ;;  %13606 = vmatprep.mubr.msk.f32.mxu1 %vm13884_vm0, %v13883_v3 }
 0x3ef   : > { %v9706_v20 = vand.u32 4294901760, %v9705_v1  ;;  %13614 = vmatprep.subr.mxu1 %v13883_v3 }
 0x3f1   : > { %13582 = vmatmul.mubr.f32.vlgmr.msra.gmra.mxu0 %v9706_v20  ;;  %13607 = vmatmul.mubr.f32.vlgmr.msra.gmra.mxu1 %v9702_v13 }
 0x3f2   : > { %13590 = vmatpush3.msra.mxu0 %v15708_v26  ;;  %13591 = vmatprep.mubr.msk.f32.mxu0 %vm13884_vm0, %v13883_v3 }
 0x3f3   : > { %13599 = vmatprep.subr.mxu0 %v13883_v3  ;;  %13616 = vmatprep.mubr.msk.f32.mxu1 %vm13884_vm0, %v13883_v3 }
 0x3f4   : > { %13615 = vmatpush3.msra.mxu1 %v10200_v17 }
 0x3f5   : > { %13592 = vmatmul.mubr.f32.vlgmr.msra.gmra.mxu0 %v9703_v14  ;;  %13624 = vmatprep.subr.mxu1 %v13883_v3 }
 0x3f6   : > { %13600 = vmatpush3.msra.mxu0 %v9745_v28  ;;  %13601 = vmatprep.mubr.msk.f32.mxu0 %vm13884_vm0, %v13883_v3 }
 0x3f7   : > { %13609 = vmatprep.subr.mxu0 %v13883_v3 }
 0x3f9   : > { %13602 = vmatmul.mubr.f32.vlgmr.msra.gmra.mxu0 %v9702_v13 }
 0x3fa   : > { %13610 = vmatpush3.msra.mxu0 %v10120_v21  ;;  %13611 = vmatprep.mubr.msk.f32.mxu0 %vm13884_vm0, %v13883_v3 }
 0x3fb   : > { %13619 = vmatprep.subr.mxu0 %v13883_v3 }
 0x458   : > { %v8437_v27 = vpop.f32.mrf.mxu1 }
 0x45a   : > { %v13498_v30 = vpop.f32.mrf.mxu1 }
 0x45c   : > { %v8585_v35 = vpop.f32.mrf.mxu1 }
 0x45e   : > { %v13508_v23 = vpop.f32.mrf.mxu1 }
 0x460   : > { %v8361_v36 = vpop.f32.mrf.mxu0  ;;  %v8731_v38 = vpop.f32.mrf.mxu1 }
 0x461   : > { %v8438_v10 = vadd.f32 %v8437_v27, %v8361_v36  ;;  %v10085_v36 = vld [vmem:[%s15986_s6 + $0x18] sm:$0xff] }
 0x462   : > { %v13493_v32 = vpop.f32.mrf.mxu0  ;;  %v13518_v39 = vpop.f32.mrf.mxu1 }
 0x464   : > { %v8511_v12 = vpop.f32.mrf.mxu0 }
 0x465   : > { %v8512_v41 = vadd.f32 %v8511_v12, %v8438_v10  ;;  %v15865_v10 = vand.u32 4294901760, %v10085_v36 }
 0x466   : > { %v13503_v45 = vpop.f32.mrf.mxu0 }
 0x467   : > { %v8586_v42 = vadd.f32 %v8585_v35, %v8512_v41 }
 0x468   : > { %v8659_v34 = vpop.f32.mrf.mxu0 }
 0x469   : > { %v8660_v43 = vadd.f32 %v8659_v34, %v8586_v42 }
 0x46a   : > { %v13513_v57 = vpop.f32.mrf.mxu0 }
 0x46b   : > { %v8732_v19 = vadd.f32 %v8731_v38, %v8660_v43 }
 0x46d   : > { %v10087_v37 = vsel %vm6423_vm2, %v8732_v19, 0  ;;  %v8886_v33 = vpop.f32.mrf.mxu1 }
 0x46e   : > { %v10155_v44 = vand.u32 4294901760, %v10087_v37 }
 0x46f   : > { %v13528_v49 = vpop.f32.mrf.mxu1 }
 0x470   : > { %v10156_v50 = vsub.f32 %v10087_v37, %v10155_v44  ;;  %13617 = vmatmul.mubr.f32.vlgmr.msra.gmra.mxu1 %v10155_v44 }
 0x471   : > { %13625 = vmatpush3.msra.mxu1 %v10120_v21  ;;  %13626 = vmatprep.mubr.msk.f32.mxu1 %vm13884_vm0, %v13883_v3  ;;  %v9034_v22 = vpop.f32.mrf.mxu1 }
 0x472   : > { %v10157_v46 = vand.u32 4294901760, %v10156_v50  ;;  %13634 = vmatprep.subr.mxu1 %v13883_v3 }
 0x473   : > { %v13538_v26 = vpop.f32.mrf.mxu1 }
 0x474   : > { %v10158_v31 = vsub.f32 %v10156_v50, %v10157_v46  ;;  %13627 = vmatmul.mubr.f32.vlgmr.msra.gmra.mxu1 %v10157_v46 }
 0x475   : > { %13635 = vmatpush3.msra.mxu1 %v10120_v21  ;;  %13636 = vmatprep.mubr.msk.f32.mxu1 %vm13884_vm0, %v13883_v3  ;;  %v8810_v58 = vpop.f32.mrf.mxu0  ;;  %v9180_v48 = vpop.f32.mrf.mxu1  ;;  %v11098_v21 = vand.u32 4294901760, %v11097_v55 }
 0x476   : > { %v10159_v28 = vand.u32 4294901760, %v10158_v31  ;;  %13644 = vmatprep.subr.mxu1 %v13883_v3  ;;  %v8887_v51 = vadd.f32 %v8886_v33, %v8810_v58 }
 0x477   : > { %v13523_v0 = vpop.f32.mrf.mxu0  ;;  %v13548_v52 = vpop.f32.mrf.mxu1 }
 0x478   : > { %13612 = vmatmul.mubr.f32.vlgmr.msra.gmra.mxu0 %v10159_v28  ;;  %13637 = vmatmul.mubr.f32.vlgmr.msra.gmra.mxu1 %v10155_v44 }
 0x479   : > { %13620 = vmatpush3.msra.mxu0 %v15769_v24  ;;  %13621 = vmatprep.mubr.msk.f32.mxu0 %vm13884_vm0, %v13883_v3  ;;  %v8960_v29 = vpop.f32.mrf.mxu0 }
 0x47a   : > { %v8961_v62 = vadd.f32 %v8960_v29, %v8887_v51  ;;  %13629 = vmatprep.subr.mxu0 %v13883_v3  ;;  %13645 = vmatpush3.msra.mxu1 %v10649_v63 }
 0x47b   : > { %v13533_v2 = vpop.f32.mrf.mxu0  ;;  %13646 = vmatprep.mubr.msk.f32.mxu1 %vm13884_vm0, %v13883_v3  ;;  %13654 = vmatprep.subr.mxu1 %v13883_v3 }
 0x47c   : > { %13622 = vmatmul.mubr.f32.vlgmr.msra.gmra.mxu0 %v10156_v50  ;;  %v9035_v6 = vadd.f32 %v9034_v22, %v8961_v62 }
 0x47d   : > { %13630 = vmatpush3.msra.mxu0 %v10198_v15  ;;  %13631 = vmatprep.mubr.msk.f32.mxu0 %vm13884_vm0, %v13883_v3  ;;  %v9108_v59 = vpop.f32.mrf.mxu0 }
 0x47e   : > { %v9109_v8 = vadd.f32 %v9108_v59, %v9035_v6  ;;  %13639 = vmatprep.subr.mxu0 %v13883_v3 }
 0x47f   : > { %v13543_v9 = vpop.f32.mrf.mxu0 }
 0x480   : > { %v9181_v11 = vadd.f32 %v9180_v48, %v9109_v8  ;;  %13632 = vmatmul.mubr.f32.vlgmr.msra.gmra.mxu0 %v10155_v44 }
 0x481   : > { %13640 = vmatpush3.msra.mxu0 %v15793_v53  ;;  %13641 = vmatprep.mubr.msk.f32.mxu0 %vm13884_vm0, %v13883_v3 }
 0x482   : > { %v10536_v54 = vsel %vm6423_vm2, %v9181_v11, 0  ;;  %13649 = vmatprep.subr.mxu0 %v13883_v3 }
 0x483   : > { %v10604_v13 = vand.u32 4294901760, %v10536_v54 }
 0x485   : > { %v10605_v14 = vsub.f32 %v10536_v54, %v10604_v13  ;;  %13647 = vmatmul.mubr.f32.vlgmr.msra.gmra.mxu1 %v10604_v13 }
 0x486   : > { %13655 = vmatpush3.msra.mxu1 %v15793_v53  ;;  %13656 = vmatprep.mubr.msk.f32.mxu1 %vm13884_vm0, %v13883_v3 }
 0x487   : > { %v10606_v16 = vand.u32 4294901760, %v10605_v14  ;;  %13664 = vmatprep.subr.mxu1 %v13883_v3 }
 0x489   : > { %v10607_v1 = vsub.f32 %v10605_v14, %v10606_v16  ;;  %13657 = vmatmul.mubr.f32.vlgmr.msra.gmra.mxu1 %v10606_v16 }
 0x48a   : > { %13665 = vmatpush3.msra.mxu1 %v15793_v53  ;;  %13666 = vmatprep.mubr.msk.f32.mxu1 %vm13884_vm0, %v13883_v3  ;;  %v15868_v53 = vsub.f32 %v10085_v36, %v15865_v10 }
 0x48b   : > { %v10608_v18 = vand.u32 4294901760, %v10607_v1  ;;  %v9335_v20 = vpop.f32.mrf.mxu1  ;;  %13674 = vmatprep.subr.mxu1 %v13883_v3 }
 0x48c   : > { %v11545_v57 = vand.u32 4294901760, %v15868_v53 }
 0x48d   : > { %v13558_v24 = vpop.f32.mrf.mxu1  ;;  %13642 = vmatmul.mubr.f32.vlgmr.msra.gmra.mxu0 %v10608_v18  ;;  %13667 = vmatmul.mubr.f32.vlgmr.msra.gmra.mxu1 %v10604_v13 }
 0x48e   : > { %13650 = vmatpush3.msra.mxu0 %v15796_v61  ;;  %13651 = vmatprep.mubr.msk.f32.mxu0 %vm13884_vm0, %v13883_v3  ;;  %v11546_v37 = vsub.f32 %v15868_v53, %v11545_v57 }
 0x48f   : > { %v9483_v15 = vpop.f32.mrf.mxu1  ;;  %13659 = vmatprep.subr.mxu0 %v13883_v3  ;;  %13675 = vmatpush3.msra.mxu1 %v11098_v21 }
 0x490   : > { %13676 = vmatprep.mubr.msk.f32.mxu1 %vm13884_vm0, %v13883_v3  ;;  %13684 = vmatprep.subr.mxu1 %v13883_v3  ;;  %v11547_v49 = vand.u32 4294901760, %v11546_v37 }
 0x491   : > { %v13568_v25 = vpop.f32.mrf.mxu1  ;;  %13652 = vmatmul.mubr.f32.vlgmr.msra.gmra.mxu0 %v10605_v14 }
 0x492   : > { %13660 = vmatpush3.msra.mxu0 %v10647_v47  ;;  %13661 = vmatprep.mubr.msk.f32.mxu0 %vm13884_vm0, %v13883_v3 }
 0x493   : > { %v9259_v17 = vpop.f32.mrf.mxu0  ;;  %v9629_v27 = vpop.f32.mrf.mxu1  ;;  %13669 = vmatprep.subr.mxu0 %v13883_v3 }
 0x494   : > { %v9336_v23 = vadd.f32 %v9335_v20, %v9259_v17 }
 0x495   : > { %v13553_v30 = vpop.f32.mrf.mxu0  ;;  %v13578_v35 = vpop.f32.mrf.mxu1  ;;  %13662 = vmatmul.mubr.f32.vlgmr.msra.gmra.mxu0 %v10604_v13 }
 0x496   : > { %13670 = vmatpush3.msra.mxu0 %v15819_v60  ;;  %13671 = vmatprep.mubr.msk.f32.mxu0 %vm13884_vm0, %v13883_v3 }
 0x497   : > { %v9409_v38 = vpop.f32.mrf.mxu0  ;;  %13679 = vmatprep.subr.mxu0 %v13883_v3 }
 0x498   : > { %v9410_v32 = vadd.f32 %v9409_v38, %v9336_v23 }
 0x499   : > { %v13563_v39 = vpop.f32.mrf.mxu0 }
 0x49a   : > { %v9484_v40 = vadd.f32 %v9483_v15, %v9410_v32 }
 0x49b   : > { %v9557_v12 = vpop.f32.mrf.mxu0 }
 0x49c   : > { %v9558_v41 = vadd.f32 %v9557_v12, %v9484_v40 }
 0x49d   : > { %v13573_v45 = vpop.f32.mrf.mxu0 }
 0x49e   : > { %v9630_v42 = vadd.f32 %v9629_v27, %v9558_v41 }
 0x4a0   : > { %v10985_v34 = vsel %vm6423_vm2, %v9630_v42, 0 }
 0x4a1   : > { %v11053_v43 = vand.u32 4294901760, %v10985_v34 }
 0x4a3   : > { %v11054_v61 = vsub.f32 %v10985_v34, %v11053_v43  ;;  %13677 = vmatmul.mubr.f32.vlgmr.msra.gmra.mxu1 %v11053_v43 }
 0x4a4   : > { %13685 = vmatpush3.msra.mxu1 %v15819_v60  ;;  %13686 = vmatprep.mubr.msk.f32.mxu1 %vm13884_vm0, %v13883_v3 }
 0x4a5   : > { %v11055_v19 = vand.u32 4294901760, %v11054_v61  ;;  %13694 = vmatprep.subr.mxu1 %v13883_v3 }
 0x4a7   : > { %v11056_v33 = vsub.f32 %v11054_v61, %v11055_v19  ;;  %13687 = vmatmul.mubr.f32.vlgmr.msra.gmra.mxu1 %v11055_v19 }
 0x4a8   : > { %13695 = vmatpush3.msra.mxu1 %v15819_v60  ;;  %13696 = vmatprep.mubr.msk.f32.mxu1 %vm13884_vm0, %v13883_v3 }
 0x4a9   : > { %v11057_v44 = vand.u32 4294901760, %v11056_v33  ;;  %v9784_v47 = vpop.f32.mrf.mxu1  ;;  %13704 = vmatprep.subr.mxu1 %v13883_v3 }
 0x4ab   : > { %v13588_v50 = vpop.f32.mrf.mxu1  ;;  %13672 = vmatmul.mubr.f32.vlgmr.msra.gmra.mxu0 %v11057_v44  ;;  %13697 = vmatmul.mubr.f32.vlgmr.msra.gmra.mxu1 %v11053_v43 }
 0x4ac   : > { %13680 = vmatpush3.msra.mxu0 %v15827_v4  ;;  %13681 = vmatprep.mubr.msk.f32.mxu0 %vm13884_vm0, %v13883_v3 }
 0x4ad   : > { %v9932_v22 = vpop.f32.mrf.mxu1  ;;  %13689 = vmatprep.subr.mxu0 %v13883_v3  ;;  %13705 = vmatpush3.msra.mxu1 %v11547_v49 }
 0x4ae   : > { %13706 = vmatprep.mubr.msk.f32.mxu1 %vm13884_vm0, %v13883_v3  ;;  %13714 = vmatprep.subr.mxu1 %v13883_v3 }
 0x4af   : > { %v13598_v46 = vpop.f32.mrf.mxu1  ;;  %13682 = vmatmul.mubr.f32.vlgmr.msra.gmra.mxu0 %v11054_v61 }
 0x4b0   : > { %13690 = vmatpush3.msra.mxu0 %v11096_v7  ;;  %13691 = vmatprep.mubr.msk.f32.mxu0 %vm13884_vm0, %v13883_v3 }
 0x4b1   : > { %v9708_v56 = vpop.f32.mrf.mxu0  ;;  %v10078_v26 = vpop.f32.mrf.mxu1  ;;  %13699 = vmatprep.subr.mxu0 %v13883_v3 }
 0x4b2   : > { %v9785_v48 = vadd.f32 %v9784_v47, %v9708_v56 }
 0x4b3   : > { %v13583_v31 = vpop.f32.mrf.mxu0  ;;  %v13608_v58 = vpop.f32.mrf.mxu1  ;;  %13692 = vmatmul.mubr.f32.vlgmr.msra.gmra.mxu0 %v11053_v43 }
 0x4b4   : > { %13700 = vmatpush3.msra.mxu0 %v15865_v10  ;;  %13701 = vmatprep.mubr.msk.f32.mxu0 %vm13884_vm0, %v13883_v3 }
 0x4b5   : > { %v9858_v28 = vpop.f32.mrf.mxu0  ;;  %13709 = vmatprep.subr.mxu0 %v13883_v3 }
 0x4b6   : > { %v9859_v63 = vadd.f32 %v9858_v28, %v9785_v48 }
 0x4b7   : > { %v13593_v0 = vpop.f32.mrf.mxu0 }
 0x4b8   : > { %v9933_v52 = vadd.f32 %v9932_v22, %v9859_v63 }
 0x4b9   : > { %v10006_v51 = vpop.f32.mrf.mxu0 }
 0x4ba   : > { %v10007_v5 = vadd.f32 %v10006_v51, %v9933_v52 }
 0x4bb   : > { %v13603_v29 = vpop.f32.mrf.mxu0 }
 0x4bc   : > { %v10079_v62 = vadd.f32 %v10078_v26, %v10007_v5 }
 0x4be   : > { %v11434_v2 = vsel %vm6423_vm2, %v10079_v62, 0 }
 0x4bf   : > { %v11502_v60 = vand.u32 4294901760, %v11434_v2 }
 0x4c1   : > { %v11503_v6 = vsub.f32 %v11434_v2, %v11502_v60  ;;  %13707 = vmatmul.mubr.f32.vlgmr.msra.gmra.mxu1 %v11502_v60 }
 0x4c2   : > { %13715 = vmatpush3.msra.mxu1 %v15865_v10  ;;  %13716 = vmatprep.mubr.msk.f32.mxu1 %vm13884_vm0, %v13883_v3 }
 0x4c3   : > { %v11504_v59 = vand.u32 4294901760, %v11503_v6  ;;  %13724 = vmatprep.subr.mxu1 %v13883_v3 }
 0x4c5   : > { %v11505_v8 = vsub.f32 %v11503_v6, %v11504_v59  ;;  %13717 = vmatmul.mubr.f32.vlgmr.msra.gmra.mxu1 %v11504_v59 }
 0x4c6   : > { %13725 = vmatpush3.msra.mxu1 %v15865_v10  ;;  %13726 = vmatprep.mubr.msk.f32.mxu1 %vm13884_vm0, %v13883_v3 }
 0x4c7   : > { %v11506_v9 = vand.u32 4294901760, %v11505_v8 }
 0x4c9   : > { %13702 = vmatmul.mubr.f32.vlgmr.msra.gmra.mxu0 %v11506_v9  ;;  %13727 = vmatmul.mubr.f32.vlgmr.msra.gmra.mxu1 %v11502_v60 }
 0x4ca   : > { %13710 = vmatpush3.msra.mxu0 %v15868_v53  ;;  %13711 = vmatprep.mubr.msk.f32.mxu0 %vm13884_vm0, %v13883_v3 }
 0x4cb   : > { %13719 = vmatprep.subr.mxu0 %v13883_v3 }
 0x4cd   : > { %13712 = vmatmul.mubr.f32.vlgmr.msra.gmra.mxu0 %v11503_v6 }
 0x4ce   : > { %13720 = vmatpush3.msra.mxu0 %v11545_v57  ;;  %13721 = vmatprep.mubr.msk.f32.mxu0 %vm13884_vm0, %v13883_v3 }
 0x4d1   : > { %13722 = vmatmul.mubr.f32.vlgmr.msra.gmra.mxu0 %v11502_v60 }
 0x4d2   : > { %13804 = shalt.err (!%p13801_p3)
}
 0x4d3   : > { %s13805_s3 = scalar_lea.hbm %s11928_s18, 128  ;;  %s13809_s17 = scalar_lea.hbm %s15992_s12, 256 }
 0x4d4   : > { %p13806_p4 = scmp.ne.s32.totalorder %s11928_s18, %s13805_s3  ;;  %p13810_p9 = scmp.lt.s32.totalorder %s11928_s18, %s15992_s12 }
 0x4d5   : > { %p13811_p10 = scmp.lt.s32.totalorder %s13809_s17, %s13805_s3 }
 0x4d6   : > { %p13807_p7 = pnand %p13806_p4, %p13990_p5 }
 0x4d7   : > { %p13812_p11 = por %p13811_p10, %p13810_p9 }
 0x4d8   : > { %p13808_p8 = pneg %p13807_p7 }
 0x4da   : > { %p13813_p12 = pnand %p13812_p11, %p13808_p8 }
 0x4dc   : > { %13816 = shalt.err (!%p13813_p12)
}
 0x4dd   : > { %13730 = dma.vmem_to_hbm [thread:$0]  (%p13990_p5), %s11931_s26, 128, %s11928_s18, %s11904_s28  }
 0x4de   : > { %s16007_s2 = sshll.u32 %s15745_s19, 3  ;;  %s16008_s20 = sshll.u32 %s13973_s25, 7 }
 0x4df   : > { %s434_s3 = scalar_lea.vmem [#allocation2], %s16007_s2  ;;  %s11915_s26 = scalar_lea.hbm %s15991_s11, %s16008_s20 }
 0x4e0   : > { %s11917_s4 = sshll.u32 %s434_s3, 4  ;;  %s11899_s28 = scalar_lea.sflag [#allocation3], %s15745_s19  ;;  %s11918_s4 = int_to_ptr.vmem [resolvable:$true] %s11917_s4 }
 0x4e1   : > { %s13817_s15 = scalar_lea.vmem %s11918_s4, 128  ;;  %s13886_s16 = smov [#allocation2]  }
 0x4e2   : > { %p13818_p13 = scmp.ne.s32.totalorder %s11918_s4, %s13817_s15  ;;  %s13821_s17 = sshll.u32 %s13886_s16, 4  ;;  %s13822_s17 = int_to_ptr.vmem [resolvable:$false] %s13821_s17 }
 0x4e3   : > { %s13823_s0 = scalar_lea.vmem %s13822_s17, 256  ;;  %p13824_p2 = scmp.lt.s32.totalorder %s11918_s4, %s13822_s17 }
 0x4e4   : > { %p13819_p0 = pnand %p13818_p13, %p13990_p5  ;;  %p13825_p3 = scmp.lt.s32.totalorder %s13823_s0, %s13817_s15 }
 0x4e6   : > { %p13820_p1 = pneg %p13819_p0  ;;  %p13826_p4 = por %p13825_p3, %p13824_p2 }
 0x4e8   : > { %p13827_p7 = pnand %p13826_p4, %p13820_p1 }
 0x530   : > { %v10237_v3 = vpop.f32.mrf.mxu1 }
 0x532   : > { %v13618_v4 = vpop.f32.mrf.mxu1 }
 0x534   : > { %v10385_v11 = vpop.f32.mrf.mxu1 }
 0x536   : > { %v13628_v54 = vpop.f32.mrf.mxu1 }
 0x538   : > { %v10161_v13 = vpop.f32.mrf.mxu0  ;;  %v10531_v7 = vpop.f32.mrf.mxu1 }
 0x539   : > { %v10238_v14 = vadd.f32 %v10237_v3, %v10161_v13 }
 0x53a   : > { %v13613_v16 = vpop.f32.mrf.mxu0  ;;  %v13638_v55 = vpop.f32.mrf.mxu1 }
 0x53c   : > { %v10311_v1 = vpop.f32.mrf.mxu0 }
 0x53d   : > { %v10312_v18 = vadd.f32 %v10311_v1, %v10238_v14 }
 0x53e   : > { %v13623_v20 = vpop.f32.mrf.mxu0 }
 0x53f   : > { %v10386_v21 = vadd.f32 %v10385_v11, %v10312_v18  ;;  %v12066_v18 = vld [vmem:[%s15990_s10] ss:$0 sm:$0xff] }
 0x540   : > { %v10459_v24 = vpop.f32.mrf.mxu0 }
 0x541   : > { %v10460_v15 = vadd.f32 %v10459_v24, %v10386_v21 }
 0x542   : > { %v13633_v25 = vpop.f32.mrf.mxu0 }
 0x543   : > { %v10532_v17 = vadd.f32 %v10531_v7, %v10460_v15 }
 0x545   : > { %v10686_v27 = vpop.f32.mrf.mxu1  ;;  %v11882_v57 = vsel %vm499_vm1, %v10532_v17, 0.0 }
 0x547   : > { %v13648_v30 = vpop.f32.mrf.mxu1 }
 0x549   : > { %v10834_v35 = vpop.f32.mrf.mxu1 }
 0x54b   : > { %v13658_v23 = vpop.f32.mrf.mxu1 }
 0x54d   : > { %v10610_v36 = vpop.f32.mrf.mxu0  ;;  %v10980_v38 = vpop.f32.mrf.mxu1 }
 0x54e   : > { %v10687_v10 = vadd.f32 %v10686_v27, %v10610_v36 }
 0x54f   : > { %v13643_v32 = vpop.f32.mrf.mxu0  ;;  %v13668_v39 = vpop.f32.mrf.mxu1 }
 0x551   : > { %v10760_v40 = vpop.f32.mrf.mxu0 }
 0x552   : > { %v10761_v12 = vadd.f32 %v10760_v40, %v10687_v10 }
 0x553   : > { %v13653_v41 = vpop.f32.mrf.mxu0 }
 0x554   : > { %v10835_v45 = vadd.f32 %v10834_v35, %v10761_v12 }
 0x555   : > { %v10908_v53 = vpop.f32.mrf.mxu0 }
 0x556   : > { %v10909_v42 = vadd.f32 %v10908_v53, %v10835_v45 }
 0x557   : > { %v13663_v34 = vpop.f32.mrf.mxu0 }
 0x558   : > { %v10981_v43 = vadd.f32 %v10980_v38, %v10909_v42 }
 0x55a   : > { %v11883_v61 = vsel %vm499_vm1, %v10981_v43, 0.0 }
 0x55b   : > { %v11884_v19 = vadd.f32 %v11883_v61, %v11882_v57 }
 0x563   : > { %v11135_v37 = vpop.f32.mrf.mxu1 }
 0x565   : > { %v13678_v33 = vpop.f32.mrf.mxu1 }
 0x567   : > { %v11283_v44 = vpop.f32.mrf.mxu1 }
 0x569   : > { %v13688_v47 = vpop.f32.mrf.mxu1 }
 0x56b   : > { %v11059_v49 = vpop.f32.mrf.mxu0  ;;  %v11429_v50 = vpop.f32.mrf.mxu1 }
 0x56c   : > { %v11136_v48 = vadd.f32 %v11135_v37, %v11059_v49 }
 0x56d   : > { %v13673_v22 = vpop.f32.mrf.mxu0  ;;  %v13698_v46 = vpop.f32.mrf.mxu1 }
 0x56f   : > { %v11209_v56 = vpop.f32.mrf.mxu0 }
 0x570   : > { %v11210_v63 = vadd.f32 %v11209_v56, %v11136_v48 }
 0x571   : > { %v13683_v26 = vpop.f32.mrf.mxu0 }
 0x572   : > { %v11284_v51 = vadd.f32 %v11283_v44, %v11210_v63 }
 0x573   : > { %v11357_v31 = vpop.f32.mrf.mxu0 }
 0x574   : > { %v11358_v2 = vadd.f32 %v11357_v31, %v11284_v51 }
 0x575   : > { %v13693_v58 = vpop.f32.mrf.mxu0 }
 0x576   : > { %v11430_v9 = vadd.f32 %v11429_v50, %v11358_v2 }
 0x578   : > { %v11885_v13 = vsel %vm499_vm1, %v11430_v9, 0.0 }
 0x579   : > { %v11886_v55 = vadd.f32 %v11885_v13, %v11884_v19 }
 0x581   : > { %v11584_v28 = vpop.f32.mrf.mxu1 }
 0x583   : > { %v13708_v0 = vpop.f32.mrf.mxu1 }
 0x585   : > { %v11732_v52 = vpop.f32.mrf.mxu1 }
 0x587   : > { %v13718_v5 = vpop.f32.mrf.mxu1 }
 0x589   : > { %v11508_v29 = vpop.f32.mrf.mxu0  ;;  %v11878_v62 = vpop.f32.mrf.mxu1 }
 0x58a   : > { %v11585_v59 = vadd.f32 %v11584_v28, %v11508_v29 }
 0x58b   : > { %v13703_v60 = vpop.f32.mrf.mxu0  ;;  %v13728_v6 = vpop.f32.mrf.mxu1 }
 0x58d   : > { %v11658_v8 = vpop.f32.mrf.mxu0 }
 0x58e   : > { %v11659_v3 = vadd.f32 %v11658_v8, %v11585_v59 }
 0x58f   : > { %v13713_v4 = vpop.f32.mrf.mxu0 }
 0x590   : > { %v11733_v11 = vadd.f32 %v11732_v52, %v11659_v3 }
 0x591   : > { %v11806_v54 = vpop.f32.mrf.mxu0 }
 0x592   : > { %v11807_v7 = vadd.f32 %v11806_v54, %v11733_v11 }
 0x593   : > { %v13723_v14 = vpop.f32.mrf.mxu0 }
 0x594   : > { %v11879_v16 = vadd.f32 %v11878_v62, %v11807_v7 }
 0x596   : > { %v11887_v1 = vsel %vm499_vm1, %v11879_v16, 0.0 }
 0x597   : > { %v11888_v20 = vadd.f32 %v11887_v1, %v11886_v55 }
 0x599   : > { %v11896_v21 = vadd.f32 %v12066_v18, %v11888_v20 }
 0x59b   : > { %11897 = vst.msk [vmem:[%s434_s3] sm:$0xff] %vm499_vm1, %v11896_v21 }
 0x59c   : > { %13830 = shalt.err (!%p13827_p7)
}
 0x59d   : > { %s13831_s25 = scalar_lea.hbm %s11915_s26, 128  ;;  %s13835_s2 = scalar_lea.hbm %s15991_s11, 256 }
 0x59e   : > { %p13832_p8 = scmp.ne.s32.totalorder %s11915_s26, %s13831_s25  ;;  %p13836_p11 = scmp.lt.s32.totalorder %s11915_s26, %s15991_s11 }
 0x59f   : > { %p13837_p12 = scmp.lt.s32.totalorder %s13835_s2, %s13831_s25 }
 0x5a0   : > { %p13833_p9 = pnand %p13832_p8, %p13990_p5 }
 0x5a1   : > { %p13838_p13 = por %p13837_p12, %p13836_p11 }
 0x5a2   : > { %p13834_p10 = pneg %p13833_p9 }
 0x5a4   : > { %p13839_p0 = pnand %p13838_p13, %p13834_p10 }
 0x5a6   : > { %13842 = shalt.err (!%p13839_p0)
}
 0x5a7   : > { %13729 = dma.vmem_to_hbm [thread:$0]  (%p13990_p5), %s11918_s4, 128, %s11915_s26, %s11899_s28  }
 0x5a8 PF: > { %p13740_p1 = scmp.ge.s32.totalorder %s13881_s24, 2  ;;  %s11942_s29 = sand.u32 1, %s13869_s21  }
 0x5a9   : > { %s11943_s18 = scalar_lea.sflag [#allocation3], %s11942_s29 }
 0x5aa   : > { %p13734_p2 = pnand %p13740_p1, %p13994_p6 }
 0x5ac   : > { %p13735_p3 = pneg %p13734_p2 }
 0x5ae   : > { %13860 = dma.done.wait (%p13735_p3), %s11943_s18, 128  }
 0x5af   : > { %13862 = vsyncadd (%p13735_p3), %s11943_s18, 4294967168  ;;  %s11952_s15 = scalar_lea.sflag [#allocation5], %s11942_s29 }
 0x5b0   : > { %13864 = dma.done.wait (%p13735_p3), %s11952_s15, 128  }
 0x5b1   : > { %13866 = vsyncadd (%p13735_p3), %s11952_s15, 4294967168  ;;  %p26_p5 = scmp.ge.s32.totalorder %s13977_s27, 4   ;;  %s16009_s21 = smov %s13873_s22 }
 0x5b2   : > { %s16010_s22 = smov %s13877_s23  ;;  %s16011_s23 = smov %s13988_s30 }
 0x5b3   : > { %s16012_s24 = smov %s13977_s27  ;;  %28 = sbr.rel (!%p26_p5) target bundleno = 11 (0xb), region = 122 }
 0x5b8   :  { %11957 = vsyncpa [#allocation3], 1 }
 0x5b9   :  { %11959 = vsyncpa [#allocation3 + $0x1], 1 }
 0x5ba   :  { %11960 = vsyncpa [#allocation5], 1 }
 0x5bb   :  { %11962 = vsyncpa [#allocation5 + $0x1], 1 }

</bundles_post_ra>
